<compile_context>
chip_gen: v5e
topology: v5e:2x2
jax: 0.10.0
libtpu: 0.0.40
codegen_flags: <defaults>
</compile_context>

<pallas_src>
import jax
import jax.numpy as jnp
from jax import lax
from jax.experimental import pallas as pl
from jax.experimental.pallas import tpu as pltpu

_BBLK = 128          # samples per grid step (batch sits on lanes in-kernel)
_N_SQUARINGS = 8     # G -> G^(2^8), trace-normalized each time
_N_POWER = 4         # power steps with the squared matrix
_N_POLISH = 6        # polish steps with the original Gram


def _pca_kernel(fe_ref, t_ref, mask_ref, vt_ref):
    # fe_ref  : (C, Bblk, HW) bf16   features, channel-major, batch second-minor
    # t_ref   : (K, HW)       bf16   templates
    # mask_ref: (Bblk, HW)    f32    mask = v^T @ T
    # vt_ref  : (K, Bblk)     f32    top eigenvector of D per sample (transposed)
    C, Bblk, HW = fe_ref.shape
    K = t_ref.shape[0]
    eps = 1e-30

    fe = fe_ref[...].reshape(C * Bblk, HW)        # leading-dim merge (tile aligned)
    t = t_ref[...]

    # --- M0 = T @ Fe^T for the whole block: one MXU op, contraction depth HW.
    m0 = lax.dot_general(t, fe, (((1,), (1,)), ((), ())),
                         preferred_element_type=jnp.float32)   # (K, C*Bblk)

    # Per-channel (K, Bblk) views (128-aligned lane slices) + channel centering
    # folded into M:  M_c -= mean_c(M0_c)  (== centering fe over channels).
    m = [m0[:, c * Bblk:(c + 1) * Bblk] for c in range(C)]
    mbar = m[0]
    for c in range(1, C):
        mbar = mbar + m[c]
    mbar = mbar * (1.0 / C)
    m = [mc - mbar for mc in m]                    # M[b] = T @ Fd[b]^T  (K x C)

    # --- 4x4 Gram G = M^T M per sample, batch on lanes: G[c][d] is (1, Bblk).
    g = [[None] * C for _ in range(C)]
    for c in range(C):
        for d in range(c, C):
            gcd = jnp.sum(m[c] * m[d], axis=0, keepdims=True)
            g[c][d] = gcd
            g[d][c] = gcd

    def _trace_normalize(a):
        tr = a[0][0]
        for i in range(1, C):
            tr = tr + a[i][i]
        inv = pl.reciprocal(jnp.maximum(tr, eps), approx=True)
        return [[a[i][j] * inv for j in range(C)] for i in range(C)]

    def _square(a):
        out = [[None] * C for _ in range(C)]
        for i in range(C):
            for j in range(i, C):
                s = a[i][0] * a[0][j]
                for e in range(1, C):
                    s = s + a[i][e] * a[e][j]
                out[i][j] = s
                out[j][i] = s
        return _trace_normalize(out)

    def _apply(a, u):
        w = []
        for i in range(C):
            s = a[i][0] * u[0]
            for e in range(1, C):
                s = s + a[i][e] * u[e]
            w.append(s)
        n2 = w[0] * w[0]
        for i in range(1, C):
            n2 = n2 + w[i] * w[i]
        inv = lax.rsqrt(jnp.maximum(n2, eps))
        return [wi * inv for wi in w]

    # TODO(synk): torch.symeig has no Pallas/TPU eigensolver primitive; the top
    # eigenvector is computed via trace-normalized squaring + power iteration on
    # the rank<=C-1 Gram (parity with symeig up to sign / degenerate spectra).
    g = _trace_normalize(g)
    gp = g
    for _ in range(_N_SQUARINGS):
        gp = _square(gp)                           # effectively G^(2^8)
    u = [jnp.ones((1, Bblk), jnp.float32) for _ in range(C)]
    for _ in range(_N_POWER):
        u = _apply(gp, u)
    for _ in range(_N_POLISH):
        u = _apply(g, u)

    # --- v = M u / ||M u||  == top eigenvector of D = M M^T. ---------------
    y = m[0] * u[0]
    for c in range(1, C):
        y = y + m[c] * u[c]                        # (K, Bblk)
    n2 = jnp.sum(y * y, axis=0, keepdims=True)
    v = y * lax.rsqrt(jnp.maximum(n2, eps))        # unit-norm, (K, Bblk)
    vt_ref[...] = v

    # --- mask = v^T @ T : (Bblk, HW), lane-dense store. ---------------------
    mask_ref[...] = lax.dot_general(v.astype(t.dtype), t,
                                    (((0,), (0,)), ((), ())),
                                    preferred_element_type=jnp.float32)


def pca_template_map(x, templates):
    """x: (B, C, H, W); templates: (K, H, W) with K=10, H*W=361 -> (mask, v)."""
    B, C, H, W = x.shape
    HW = H * W
    K = templates.shape[0]
    t2d = templates.reshape(K, HW).astype(jnp.bfloat16)

    bblk = _BBLK
    bpad = ((B + bblk - 1) // bblk) * bblk
    # NCHW -> (C, B, HW): channel-major with batch second-to-last so the single
    # in-kernel matmul puts the batch on lanes (layout plumbing only).
    fe = jnp.transpose(x.reshape(B, C, HW), (1, 0, 2)).astype(jnp.bfloat16)
    if bpad != B:
        fe = jnp.pad(fe, ((0, 0), (0, bpad - B), (0, 0)))

    mask_flat, vt = pl.pallas_call(
        _pca_kernel,
        out_shape=(jax.ShapeDtypeStruct((bpad, HW), jnp.float32),
                   jax.ShapeDtypeStruct((K, bpad), jnp.float32)),
        grid=(bpad // bblk,),
        in_specs=[
            pl.BlockSpec((C, bblk, HW), lambda i: (0, i, 0)),
            pl.BlockSpec((K, HW), lambda i: (0, 0)),
        ],
        out_specs=(
            pl.BlockSpec((bblk, HW), lambda i: (i, 0)),
            pl.BlockSpec((K, bblk), lambda i: (0, i)),
        ),
        compiler_params=pltpu.CompilerParams(
            dimension_semantics=("parallel",)),
    )(fe, t2d)

    v = jnp.transpose(vt[:, :B])                   # (B, K)
    mask = mask_flat[:B].reshape(B, 1, H, W)
    return mask, v


if __name__ == "__main__":
    key = jax.random.PRNGKey(0)
    kx, kt = jax.random.split(key)

    # The module hardcodes 10 templates on a 19x19 spatial grid (HW = 361).
    B, C, H, W = 2, 4, 19, 19
    x = jax.random.normal(kx, (B, C, H, W), dtype=jnp.float32)
    templates = jax.random.normal(kt, (10, H, W), dtype=jnp.float32)

    mask, v = jax.jit(pca_template_map)(x, templates)
    jax.block_until_ready((mask, v))

    assert mask.shape == (B, 1, H, W) and v.shape == (B, 10)
    assert bool(jnp.all(jnp.isfinite(mask))) and bool(jnp.all(jnp.isfinite(v)))
    # v rows must be unit-norm (eigenvector convention of symeig).
    norms = jnp.linalg.norm(v, axis=-1)
    assert bool(jnp.all(jnp.abs(norms - 1.0) < 1e-3)), norms

    # Reference check: Rayleigh quotient of kernel v on D (built from the same
    # bf16-cast operands) must match the top eigenvalue (sign is arbitrary in
    # both symeig and this kernel, so compare eigenvalues, not vectors).
    t2d = templates.reshape(10, -1).astype(jnp.bfloat16).astype(jnp.float32)
    fe = x.reshape(B, C, -1).astype(jnp.bfloat16).astype(jnp.float32)
    fe_t = jnp.transpose(fe, (0, 2, 1))                       # (B, HW, C)
    fd = fe_t - jnp.mean(fe_t, axis=2, keepdims=True)
    m_ref = jnp.einsum("kh,bhc->bkc", t2d, fd,
                       precision=lax.Precision.HIGHEST)       # (B, K, C)
    d_ref = jnp.einsum("bkc,bjc->bkj", m_ref, m_ref,
                       precision=lax.Precision.HIGHEST)       # (B, K, K)
    lam_top = jnp.linalg.eigvalsh(d_ref)[:, -1]
    rayleigh = jnp.einsum("bk,bkj,bj->b", v, d_ref, v)
    assert bool(jnp.all(rayleigh >= (1.0 - 3e-2) * lam_top)), (rayleigh, lam_top)

    print("KERNEL_OK")
</pallas_src>

<mosaic_0001>
module attributes {stable_mosaic.version = 11 : i64} {
  func.func @_pca_kernel(%arg0: i32, %arg1: memref<4x128x361xbf16, #tpu.memory_space<vmem>>, %arg2: memref<10x361xbf16, #tpu.memory_space<vmem>>, %arg3: memref<128x361xf32, #tpu.memory_space<vmem>>, %arg4: memref<10x128xf32, #tpu.memory_space<vmem>>) attributes {dimension_semantics = [#tpu.dimension_semantics<parallel>], iteration_bounds = array<i64: 1>, scalar_prefetch = 0 : i64, scratch_operands = 0 : i64, tpu.core_type = #tpu.core_type<tc>, window_params = [{transform_indices = @transform_0, window_bounds = array<i64: 4, 128, 361>}, {pipeline_mode = #tpu.pipeline_mode<synchronous>, transform_indices = @transform_1, window_bounds = array<i64: 10, 361>}, {transform_indices = @transform_2, window_bounds = array<i64: 128, 361>}, {transform_indices = @transform_3, window_bounds = array<i64: 10, 128>}]} {
    %c0 = arith.constant 0 : index
    %c0_0 = arith.constant 0 : index
    %c0_1 = arith.constant 0 : index
    %0 = vector.load %arg1[%c0, %c0_0, %c0_1] : memref<4x128x361xbf16, #tpu.memory_space<vmem>>, vector<4x128x361xbf16>
    %1 = vector.shape_cast %0 : vector<4x128x361xbf16> to vector<512x361xbf16>
    %c0_2 = arith.constant 0 : index
    %c0_3 = arith.constant 0 : index
    %2 = vector.load %arg2[%c0_2, %c0_3] : memref<10x361xbf16, #tpu.memory_space<vmem>>, vector<10x361xbf16>
    %cst = arith.constant dense<0.000000e+00> : vector<10x512xf32>
    %3 = tpu.matmul %2, %1, %cst {dimension_numbers = #tpu.dot_dimension_numbers<[1], [1], [0], [0], [0, 0, 1, 0], [], []>} : vector<10x361xbf16>, vector<512x361xbf16>, vector<10x512xf32> -> vector<10x512xf32>
    %4 = vector.extract_strided_slice %3 {offsets = [0, 0], sizes = [10, 128], strides = [1, 1]} : vector<10x512xf32> to vector<10x128xf32>
    %5 = vector.extract_strided_slice %3 {offsets = [0, 128], sizes = [10, 128], strides = [1, 1]} : vector<10x512xf32> to vector<10x128xf32>
    %6 = vector.extract_strided_slice %3 {offsets = [0, 256], sizes = [10, 128], strides = [1, 1]} : vector<10x512xf32> to vector<10x128xf32>
    %7 = vector.extract_strided_slice %3 {offsets = [0, 384], sizes = [10, 128], strides = [1, 1]} : vector<10x512xf32> to vector<10x128xf32>
    %8 = arith.addf %4, %5 : vector<10x128xf32>
    %9 = arith.addf %8, %6 : vector<10x128xf32>
    %10 = arith.addf %9, %7 : vector<10x128xf32>
    %cst_4 = arith.constant 2.500000e-01 : f32
    %11 = vector.broadcast %cst_4 : f32 to vector<10x128xf32>
    %12 = arith.mulf %10, %11 : vector<10x128xf32>
    %13 = arith.subf %4, %12 : vector<10x128xf32>
    %14 = arith.subf %5, %12 : vector<10x128xf32>
    %15 = arith.subf %6, %12 : vector<10x128xf32>
    %16 = arith.subf %7, %12 : vector<10x128xf32>
    %17 = arith.mulf %13, %13 : vector<10x128xf32>
    %cst_5 = arith.constant dense<0.000000e+00> : vector<128xf32>
    %18 = vector.multi_reduction <add>, %17, %cst_5 [0] : vector<10x128xf32> to vector<128xf32>
    %19 = vector.shape_cast %18 : vector<128xf32> to vector<1x128xf32>
    %20 = arith.mulf %13, %14 : vector<10x128xf32>
    %cst_6 = arith.constant dense<0.000000e+00> : vector<128xf32>
    %21 = vector.multi_reduction <add>, %20, %cst_6 [0] : vector<10x128xf32> to vector<128xf32>
    %22 = vector.shape_cast %21 : vector<128xf32> to vector<1x128xf32>
    %23 = arith.mulf %13, %15 : vector<10x128xf32>
    %cst_7 = arith.constant dense<0.000000e+00> : vector<128xf32>
    %24 = vector.multi_reduction <add>, %23, %cst_7 [0] : vector<10x128xf32> to vector<128xf32>
    %25 = vector.shape_cast %24 : vector<128xf32> to vector<1x128xf32>
    %26 = arith.mulf %13, %16 : vector<10x128xf32>
    %cst_8 = arith.constant dense<0.000000e+00> : vector<128xf32>
    %27 = vector.multi_reduction <add>, %26, %cst_8 [0] : vector<10x128xf32> to vector<128xf32>
    %28 = vector.shape_cast %27 : vector<128xf32> to vector<1x128xf32>
    %29 = arith.mulf %14, %14 : vector<10x128xf32>
    %cst_9 = arith.constant dense<0.000000e+00> : vector<128xf32>
    %30 = vector.multi_reduction <add>, %29, %cst_9 [0] : vector<10x128xf32> to vector<128xf32>
    %31 = vector.shape_cast %30 : vector<128xf32> to vector<1x128xf32>
    %32 = arith.mulf %14, %15 : vector<10x128xf32>
    %cst_10 = arith.constant dense<0.000000e+00> : vector<128xf32>
    %33 = vector.multi_reduction <add>, %32, %cst_10 [0] : vector<10x128xf32> to vector<128xf32>
    %34 = vector.shape_cast %33 : vector<128xf32> to vector<1x128xf32>
    %35 = arith.mulf %14, %16 : vector<10x128xf32>
    %cst_11 = arith.constant dense<0.000000e+00> : vector<128xf32>
    %36 = vector.multi_reduction <add>, %35, %cst_11 [0] : vector<10x128xf32> to vector<128xf32>
    %37 = vector.shape_cast %36 : vector<128xf32> to vector<1x128xf32>
    %38 = arith.mulf %15, %15 : vector<10x128xf32>
    %cst_12 = arith.constant dense<0.000000e+00> : vector<128xf32>
    %39 = vector.multi_reduction <add>, %38, %cst_12 [0] : vector<10x128xf32> to vector<128xf32>
    %40 = vector.shape_cast %39 : vector<128xf32> to vector<1x128xf32>
    %41 = arith.mulf %15, %16 : vector<10x128xf32>
    %cst_13 = arith.constant dense<0.000000e+00> : vector<128xf32>
    %42 = vector.multi_reduction <add>, %41, %cst_13 [0] : vector<10x128xf32> to vector<128xf32>
    %43 = vector.shape_cast %42 : vector<128xf32> to vector<1x128xf32>
    %44 = arith.mulf %16, %16 : vector<10x128xf32>
    %cst_14 = arith.constant dense<0.000000e+00> : vector<128xf32>
    %45 = vector.multi_reduction <add>, %44, %cst_14 [0] : vector<10x128xf32> to vector<128xf32>
    %46 = vector.shape_cast %45 : vector<128xf32> to vector<1x128xf32>
    %47 = arith.addf %19, %31 : vector<1x128xf32>
    %48 = arith.addf %47, %40 : vector<1x128xf32>
    %49 = arith.addf %48, %46 : vector<1x128xf32>
    %cst_15 = arith.constant 1.000000e-30 : f32
    %50 = vector.broadcast %cst_15 : f32 to vector<1x128xf32>
    %51 = arith.maximumf %49, %50 : vector<1x128xf32>
    %52 = tpu.reciprocal %51 {approx = true} : vector<1x128xf32> -> vector<1x128xf32>
    %53 = arith.mulf %19, %52 : vector<1x128xf32>
    %54 = arith.mulf %22, %52 : vector<1x128xf32>
    %55 = arith.mulf %25, %52 : vector<1x128xf32>
    %56 = arith.mulf %28, %52 : vector<1x128xf32>
    %57 = arith.mulf %22, %52 : vector<1x128xf32>
    %58 = arith.mulf %31, %52 : vector<1x128xf32>
    %59 = arith.mulf %34, %52 : vector<1x128xf32>
    %60 = arith.mulf %37, %52 : vector<1x128xf32>
    %61 = arith.mulf %25, %52 : vector<1x128xf32>
    %62 = arith.mulf %34, %52 : vector<1x128xf32>
    %63 = arith.mulf %40, %52 : vector<1x128xf32>
    %64 = arith.mulf %43, %52 : vector<1x128xf32>
    %65 = arith.mulf %28, %52 : vector<1x128xf32>
    %66 = arith.mulf %37, %52 : vector<1x128xf32>
    %67 = arith.mulf %43, %52 : vector<1x128xf32>
    %68 = arith.mulf %46, %52 : vector<1x128xf32>
    %69 = arith.mulf %53, %53 : vector<1x128xf32>
    %70 = arith.mulf %54, %57 : vector<1x128xf32>
    %71 = arith.addf %69, %70 : vector<1x128xf32>
    %72 = arith.mulf %55, %61 : vector<1x128xf32>
    %73 = arith.addf %71, %72 : vector<1x128xf32>
    %74 = arith.mulf %56, %65 : vector<1x128xf32>
    %75 = arith.addf %73, %74 : vector<1x128xf32>
    %76 = arith.mulf %53, %54 : vector<1x128xf32>
    %77 = arith.mulf %54, %58 : vector<1x128xf32>
    %78 = arith.addf %76, %77 : vector<1x128xf32>
    %79 = arith.mulf %55, %62 : vector<1x128xf32>
    %80 = arith.addf %78, %79 : vector<1x128xf32>
    %81 = arith.mulf %56, %66 : vector<1x128xf32>
    %82 = arith.addf %80, %81 : vector<1x128xf32>
    %83 = arith.mulf %53, %55 : vector<1x128xf32>
    %84 = arith.mulf %54, %59 : vector<1x128xf32>
    %85 = arith.addf %83, %84 : vector<1x128xf32>
    %86 = arith.mulf %55, %63 : vector<1x128xf32>
    %87 = arith.addf %85, %86 : vector<1x128xf32>
    %88 = arith.mulf %56, %67 : vector<1x128xf32>
    %89 = arith.addf %87, %88 : vector<1x128xf32>
    %90 = arith.mulf %53, %56 : vector<1x128xf32>
    %91 = arith.mulf %54, %60 : vector<1x128xf32>
    %92 = arith.addf %90, %91 : vector<1x128xf32>
    %93 = arith.mulf %55, %64 : vector<1x128xf32>
    %94 = arith.addf %92, %93 : vector<1x128xf32>
    %95 = arith.mulf %56, %68 : vector<1x128xf32>
    %96 = arith.addf %94, %95 : vector<1x128xf32>
    %97 = arith.mulf %57, %54 : vector<1x128xf32>
    %98 = arith.mulf %58, %58 : vector<1x128xf32>
    %99 = arith.addf %97, %98 : vector<1x128xf32>
    %100 = arith.mulf %59, %62 : vector<1x128xf32>
    %101 = arith.addf %99, %100 : vector<1x128xf32>
    %102 = arith.mulf %60, %66 : vector<1x128xf32>
    %103 = arith.addf %101, %102 : vector<1x128xf32>
    %104 = arith.mulf %57, %55 : vector<1x128xf32>
    %105 = arith.mulf %58, %59 : vector<1x128xf32>
    %106 = arith.addf %104, %105 : vector<1x128xf32>
    %107 = arith.mulf %59, %63 : vector<1x128xf32>
    %108 = arith.addf %106, %107 : vector<1x128xf32>
    %109 = arith.mulf %60, %67 : vector<1x128xf32>
    %110 = arith.addf %108, %109 : vector<1x128xf32>
    %111 = arith.mulf %57, %56 : vector<1x128xf32>
    %112 = arith.mulf %58, %60 : vector<1x128xf32>
    %113 = arith.addf %111, %112 : vector<1x128xf32>
    %114 = arith.mulf %59, %64 : vector<1x128xf32>
    %115 = arith.addf %113, %114 : vector<1x128xf32>
    %116 = arith.mulf %60, %68 : vector<1x128xf32>
    %117 = arith.addf %115, %116 : vector<1x128xf32>
    %118 = arith.mulf %61, %55 : vector<1x128xf32>
    %119 = arith.mulf %62, %59 : vector<1x128xf32>
    %120 = arith.addf %118, %119 : vector<1x128xf32>
    %121 = arith.mulf %63, %63 : vector<1x128xf32>
    %122 = arith.addf %120, %121 : vector<1x128xf32>
    %123 = arith.mulf %64, %67 : vector<1x128xf32>
    %124 = arith.addf %122, %123 : vector<1x128xf32>
    %125 = arith.mulf %61, %56 : vector<1x128xf32>
    %126 = arith.mulf %62, %60 : vector<1x128xf32>
    %127 = arith.addf %125, %126 : vector<1x128xf32>
    %128 = arith.mulf %63, %64 : vector<1x128xf32>
    %129 = arith.addf %127, %128 : vector<1x128xf32>
    %130 = arith.mulf %64, %68 : vector<1x128xf32>
    %131 = arith.addf %129, %130 : vector<1x128xf32>
    %132 = arith.mulf %65, %56 : vector<1x128xf32>
    %133 = arith.mulf %66, %60 : vector<1x128xf32>
    %134 = arith.addf %132, %133 : vector<1x128xf32>
    %135 = arith.mulf %67, %64 : vector<1x128xf32>
    %136 = arith.addf %134, %135 : vector<1x128xf32>
    %137 = arith.mulf %68, %68 : vector<1x128xf32>
    %138 = arith.addf %136, %137 : vector<1x128xf32>
    %139 = arith.addf %75, %103 : vector<1x128xf32>
    %140 = arith.addf %139, %124 : vector<1x128xf32>
    %141 = arith.addf %140, %138 : vector<1x128xf32>
    %cst_16 = arith.constant 1.000000e-30 : f32
    %142 = vector.broadcast %cst_16 : f32 to vector<1x128xf32>
    %143 = arith.maximumf %141, %142 : vector<1x128xf32>
    %144 = tpu.reciprocal %143 {approx = true} : vector<1x128xf32> -> vector<1x128xf32>
    %145 = arith.mulf %75, %144 : vector<1x128xf32>
    %146 = arith.mulf %82, %144 : vector<1x128xf32>
    %147 = arith.mulf %89, %144 : vector<1x128xf32>
    %148 = arith.mulf %96, %144 : vector<1x128xf32>
    %149 = arith.mulf %82, %144 : vector<1x128xf32>
    %150 = arith.mulf %103, %144 : vector<1x128xf32>
    %151 = arith.mulf %110, %144 : vector<1x128xf32>
    %152 = arith.mulf %117, %144 : vector<1x128xf32>
    %153 = arith.mulf %89, %144 : vector<1x128xf32>
    %154 = arith.mulf %110, %144 : vector<1x128xf32>
    %155 = arith.mulf %124, %144 : vector<1x128xf32>
    %156 = arith.mulf %131, %144 : vector<1x128xf32>
    %157 = arith.mulf %96, %144 : vector<1x128xf32>
    %158 = arith.mulf %117, %144 : vector<1x128xf32>
    %159 = arith.mulf %131, %144 : vector<1x128xf32>
    %160 = arith.mulf %138, %144 : vector<1x128xf32>
    %161 = arith.mulf %145, %145 : vector<1x128xf32>
    %162 = arith.mulf %146, %149 : vector<1x128xf32>
    %163 = arith.addf %161, %162 : vector<1x128xf32>
    %164 = arith.mulf %147, %153 : vector<1x128xf32>
    %165 = arith.addf %163, %164 : vector<1x128xf32>
    %166 = arith.mulf %148, %157 : vector<1x128xf32>
    %167 = arith.addf %165, %166 : vector<1x128xf32>
    %168 = arith.mulf %145, %146 : vector<1x128xf32>
    %169 = arith.mulf %146, %150 : vector<1x128xf32>
    %170 = arith.addf %168, %169 : vector<1x128xf32>
    %171 = arith.mulf %147, %154 : vector<1x128xf32>
    %172 = arith.addf %170, %171 : vector<1x128xf32>
    %173 = arith.mulf %148, %158 : vector<1x128xf32>
    %174 = arith.addf %172, %173 : vector<1x128xf32>
    %175 = arith.mulf %145, %147 : vector<1x128xf32>
    %176 = arith.mulf %146, %151 : vector<1x128xf32>
    %177 = arith.addf %175, %176 : vector<1x128xf32>
    %178 = arith.mulf %147, %155 : vector<1x128xf32>
    %179 = arith.addf %177, %178 : vector<1x128xf32>
    %180 = arith.mulf %148, %159 : vector<1x128xf32>
    %181 = arith.addf %179, %180 : vector<1x128xf32>
    %182 = arith.mulf %145, %148 : vector<1x128xf32>
    %183 = arith.mulf %146, %152 : vector<1x128xf32>
    %184 = arith.addf %182, %183 : vector<1x128xf32>
    %185 = arith.mulf %147, %156 : vector<1x128xf32>
    %186 = arith.addf %184, %185 : vector<1x128xf32>
    %187 = arith.mulf %148, %160 : vector<1x128xf32>
    %188 = arith.addf %186, %187 : vector<1x128xf32>
    %189 = arith.mulf %149, %146 : vector<1x128xf32>
    %190 = arith.mulf %150, %150 : vector<1x128xf32>
    %191 = arith.addf %189, %190 : vector<1x128xf32>
    %192 = arith.mulf %151, %154 : vector<1x128xf32>
    %193 = arith.addf %191, %192 : vector<1x128xf32>
    %194 = arith.mulf %152, %158 : vector<1x128xf32>
    %195 = arith.addf %193, %194 : vector<1x128xf32>
    %196 = arith.mulf %149, %147 : vector<1x128xf32>
    %197 = arith.mulf %150, %151 : vector<1x128xf32>
    %198 = arith.addf %196, %197 : vector<1x128xf32>
    %199 = arith.mulf %151, %155 : vector<1x128xf32>
    %200 = arith.addf %198, %199 : vector<1x128xf32>
    %201 = arith.mulf %152, %159 : vector<1x128xf32>
    %202 = arith.addf %200, %201 : vector<1x128xf32>
    %203 = arith.mulf %149, %148 : vector<1x128xf32>
    %204 = arith.mulf %150, %152 : vector<1x128xf32>
    %205 = arith.addf %203, %204 : vector<1x128xf32>
    %206 = arith.mulf %151, %156 : vector<1x128xf32>
    %207 = arith.addf %205, %206 : vector<1x128xf32>
    %208 = arith.mulf %152, %160 : vector<1x128xf32>
    %209 = arith.addf %207, %208 : vector<1x128xf32>
    %210 = arith.mulf %153, %147 : vector<1x128xf32>
    %211 = arith.mulf %154, %151 : vector<1x128xf32>
    %212 = arith.addf %210, %211 : vector<1x128xf32>
    %213 = arith.mulf %155, %155 : vector<1x128xf32>
    %214 = arith.addf %212, %213 : vector<1x128xf32>
    %215 = arith.mulf %156, %159 : vector<1x128xf32>
    %216 = arith.addf %214, %215 : vector<1x128xf32>
    %217 = arith.mulf %153, %148 : vector<1x128xf32>
    %218 = arith.mulf %154, %152 : vector<1x128xf32>
    %219 = arith.addf %217, %218 : vector<1x128xf32>
    %220 = arith.mulf %155, %156 : vector<1x128xf32>
    %221 = arith.addf %219, %220 : vector<1x128xf32>
    %222 = arith.mulf %156, %160 : vector<1x128xf32>
    %223 = arith.addf %221, %222 : vector<1x128xf32>
    %224 = arith.mulf %157, %148 : vector<1x128xf32>
    %225 = arith.mulf %158, %152 : vector<1x128xf32>
    %226 = arith.addf %224, %225 : vector<1x128xf32>
    %227 = arith.mulf %159, %156 : vector<1x128xf32>
    %228 = arith.addf %226, %227 : vector<1x128xf32>
    %229 = arith.mulf %160, %160 : vector<1x128xf32>
    %230 = arith.addf %228, %229 : vector<1x128xf32>
    %231 = arith.addf %167, %195 : vector<1x128xf32>
    %232 = arith.addf %231, %216 : vector<1x128xf32>
    %233 = arith.addf %232, %230 : vector<1x128xf32>
    %cst_17 = arith.constant 1.000000e-30 : f32
    %234 = vector.broadcast %cst_17 : f32 to vector<1x128xf32>
    %235 = arith.maximumf %233, %234 : vector<1x128xf32>
    %236 = tpu.reciprocal %235 {approx = true} : vector<1x128xf32> -> vector<1x128xf32>
    %237 = arith.mulf %167, %236 : vector<1x128xf32>
    %238 = arith.mulf %174, %236 : vector<1x128xf32>
    %239 = arith.mulf %181, %236 : vector<1x128xf32>
    %240 = arith.mulf %188, %236 : vector<1x128xf32>
    %241 = arith.mulf %174, %236 : vector<1x128xf32>
    %242 = arith.mulf %195, %236 : vector<1x128xf32>
    %243 = arith.mulf %202, %236 : vector<1x128xf32>
    %244 = arith.mulf %209, %236 : vector<1x128xf32>
    %245 = arith.mulf %181, %236 : vector<1x128xf32>
    %246 = arith.mulf %202, %236 : vector<1x128xf32>
    %247 = arith.mulf %216, %236 : vector<1x128xf32>
    %248 = arith.mulf %223, %236 : vector<1x128xf32>
    %249 = arith.mulf %188, %236 : vector<1x128xf32>
    %250 = arith.mulf %209, %236 : vector<1x128xf32>
    %251 = arith.mulf %223, %236 : vector<1x128xf32>
    %252 = arith.mulf %230, %236 : vector<1x128xf32>
    %253 = arith.mulf %237, %237 : vector<1x128xf32>
    %254 = arith.mulf %238, %241 : vector<1x128xf32>
    %255 = arith.addf %253, %254 : vector<1x128xf32>
    %256 = arith.mulf %239, %245 : vector<1x128xf32>
    %257 = arith.addf %255, %256 : vector<1x128xf32>
    %258 = arith.mulf %240, %249 : vector<1x128xf32>
    %259 = arith.addf %257, %258 : vector<1x128xf32>
    %260 = arith.mulf %237, %238 : vector<1x128xf32>
    %261 = arith.mulf %238, %242 : vector<1x128xf32>
    %262 = arith.addf %260, %261 : vector<1x128xf32>
    %263 = arith.mulf %239, %246 : vector<1x128xf32>
    %264 = arith.addf %262, %263 : vector<1x128xf32>
    %265 = arith.mulf %240, %250 : vector<1x128xf32>
    %266 = arith.addf %264, %265 : vector<1x128xf32>
    %267 = arith.mulf %237, %239 : vector<1x128xf32>
    %268 = arith.mulf %238, %243 : vector<1x128xf32>
    %269 = arith.addf %267, %268 : vector<1x128xf32>
    %270 = arith.mulf %239, %247 : vector<1x128xf32>
    %271 = arith.addf %269, %270 : vector<1x128xf32>
    %272 = arith.mulf %240, %251 : vector<1x128xf32>
    %273 = arith.addf %271, %272 : vector<1x128xf32>
    %274 = arith.mulf %237, %240 : vector<1x128xf32>
    %275 = arith.mulf %238, %244 : vector<1x128xf32>
    %276 = arith.addf %274, %275 : vector<1x128xf32>
    %277 = arith.mulf %239, %248 : vector<1x128xf32>
    %278 = arith.addf %276, %277 : vector<1x128xf32>
    %279 = arith.mulf %240, %252 : vector<1x128xf32>
    %280 = arith.addf %278, %279 : vector<1x128xf32>
    %281 = arith.mulf %241, %238 : vector<1x128xf32>
    %282 = arith.mulf %242, %242 : vector<1x128xf32>
    %283 = arith.addf %281, %282 : vector<1x128xf32>
    %284 = arith.mulf %243, %246 : vector<1x128xf32>
    %285 = arith.addf %283, %284 : vector<1x128xf32>
    %286 = arith.mulf %244, %250 : vector<1x128xf32>
    %287 = arith.addf %285, %286 : vector<1x128xf32>
    %288 = arith.mulf %241, %239 : vector<1x128xf32>
    %289 = arith.mulf %242, %243 : vector<1x128xf32>
    %290 = arith.addf %288, %289 : vector<1x128xf32>
    %291 = arith.mulf %243, %247 : vector<1x128xf32>
    %292 = arith.addf %290, %291 : vector<1x128xf32>
    %293 = arith.mulf %244, %251 : vector<1x128xf32>
    %294 = arith.addf %292, %293 : vector<1x128xf32>
    %295 = arith.mulf %241, %240 : vector<1x128xf32>
    %296 = arith.mulf %242, %244 : vector<1x128xf32>
    %297 = arith.addf %295, %296 : vector<1x128xf32>
    %298 = arith.mulf %243, %248 : vector<1x128xf32>
    %299 = arith.addf %297, %298 : vector<1x128xf32>
    %300 = arith.mulf %244, %252 : vector<1x128xf32>
    %301 = arith.addf %299, %300 : vector<1x128xf32>
    %302 = arith.mulf %245, %239 : vector<1x128xf32>
    %303 = arith.mulf %246, %243 : vector<1x128xf32>
    %304 = arith.addf %302, %303 : vector<1x128xf32>
    %305 = arith.mulf %247, %247 : vector<1x128xf32>
    %306 = arith.addf %304, %305 : vector<1x128xf32>
    %307 = arith.mulf %248, %251 : vector<1x128xf32>
    %308 = arith.addf %306, %307 : vector<1x128xf32>
    %309 = arith.mulf %245, %240 : vector<1x128xf32>
    %310 = arith.mulf %246, %244 : vector<1x128xf32>
    %311 = arith.addf %309, %310 : vector<1x128xf32>
    %312 = arith.mulf %247, %248 : vector<1x128xf32>
    %313 = arith.addf %311, %312 : vector<1x128xf32>
    %314 = arith.mulf %248, %252 : vector<1x128xf32>
    %315 = arith.addf %313, %314 : vector<1x128xf32>
    %316 = arith.mulf %249, %240 : vector<1x128xf32>
    %317 = arith.mulf %250, %244 : vector<1x128xf32>
    %318 = arith.addf %316, %317 : vector<1x128xf32>
    %319 = arith.mulf %251, %248 : vector<1x128xf32>
    %320 = arith.addf %318, %319 : vector<1x128xf32>
    %321 = arith.mulf %252, %252 : vector<1x128xf32>
    %322 = arith.addf %320, %321 : vector<1x128xf32>
    %323 = arith.addf %259, %287 : vector<1x128xf32>
    %324 = arith.addf %323, %308 : vector<1x128xf32>
    %325 = arith.addf %324, %322 : vector<1x128xf32>
    %cst_18 = arith.constant 1.000000e-30 : f32
    %326 = vector.broadcast %cst_18 : f32 to vector<1x128xf32>
    %327 = arith.maximumf %325, %326 : vector<1x128xf32>
    %328 = tpu.reciprocal %327 {approx = true} : vector<1x128xf32> -> vector<1x128xf32>
    %329 = arith.mulf %259, %328 : vector<1x128xf32>
    %330 = arith.mulf %266, %328 : vector<1x128xf32>
    %331 = arith.mulf %273, %328 : vector<1x128xf32>
    %332 = arith.mulf %280, %328 : vector<1x128xf32>
    %333 = arith.mulf %266, %328 : vector<1x128xf32>
    %334 = arith.mulf %287, %328 : vector<1x128xf32>
    %335 = arith.mulf %294, %328 : vector<1x128xf32>
    %336 = arith.mulf %301, %328 : vector<1x128xf32>
    %337 = arith.mulf %273, %328 : vector<1x128xf32>
    %338 = arith.mulf %294, %328 : vector<1x128xf32>
    %339 = arith.mulf %308, %328 : vector<1x128xf32>
    %340 = arith.mulf %315, %328 : vector<1x128xf32>
    %341 = arith.mulf %280, %328 : vector<1x128xf32>
    %342 = arith.mulf %301, %328 : vector<1x128xf32>
    %343 = arith.mulf %315, %328 : vector<1x128xf32>
    %344 = arith.mulf %322, %328 : vector<1x128xf32>
    %345 = arith.mulf %329, %329 : vector<1x128xf32>
    %346 = arith.mulf %330, %333 : vector<1x128xf32>
    %347 = arith.addf %345, %346 : vector<1x128xf32>
    %348 = arith.mulf %331, %337 : vector<1x128xf32>
    %349 = arith.addf %347, %348 : vector<1x128xf32>
    %350 = arith.mulf %332, %341 : vector<1x128xf32>
    %351 = arith.addf %349, %350 : vector<1x128xf32>
    %352 = arith.mulf %329, %330 : vector<1x128xf32>
    %353 = arith.mulf %330, %334 : vector<1x128xf32>
    %354 = arith.addf %352, %353 : vector<1x128xf32>
    %355 = arith.mulf %331, %338 : vector<1x128xf32>
    %356 = arith.addf %354, %355 : vector<1x128xf32>
    %357 = arith.mulf %332, %342 : vector<1x128xf32>
    %358 = arith.addf %356, %357 : vector<1x128xf32>
    %359 = arith.mulf %329, %331 : vector<1x128xf32>
    %360 = arith.mulf %330, %335 : vector<1x128xf32>
    %361 = arith.addf %359, %360 : vector<1x128xf32>
    %362 = arith.mulf %331, %339 : vector<1x128xf32>
    %363 = arith.addf %361, %362 : vector<1x128xf32>
    %364 = arith.mulf %332, %343 : vector<1x128xf32>
    %365 = arith.addf %363, %364 : vector<1x128xf32>
    %366 = arith.mulf %329, %332 : vector<1x128xf32>
    %367 = arith.mulf %330, %336 : vector<1x128xf32>
    %368 = arith.addf %366, %367 : vector<1x128xf32>
    %369 = arith.mulf %331, %340 : vector<1x128xf32>
    %370 = arith.addf %368, %369 : vector<1x128xf32>
    %371 = arith.mulf %332, %344 : vector<1x128xf32>
    %372 = arith.addf %370, %371 : vector<1x128xf32>
    %373 = arith.mulf %333, %330 : vector<1x128xf32>
    %374 = arith.mulf %334, %334 : vector<1x128xf32>
    %375 = arith.addf %373, %374 : vector<1x128xf32>
    %376 = arith.mulf %335, %338 : vector<1x128xf32>
    %377 = arith.addf %375, %376 : vector<1x128xf32>
    %378 = arith.mulf %336, %342 : vector<1x128xf32>
    %379 = arith.addf %377, %378 : vector<1x128xf32>
    %380 = arith.mulf %333, %331 : vector<1x128xf32>
    %381 = arith.mulf %334, %335 : vector<1x128xf32>
    %382 = arith.addf %380, %381 : vector<1x128xf32>
    %383 = arith.mulf %335, %339 : vector<1x128xf32>
    %384 = arith.addf %382, %383 : vector<1x128xf32>
    %385 = arith.mulf %336, %343 : vector<1x128xf32>
    %386 = arith.addf %384, %385 : vector<1x128xf32>
    %387 = arith.mulf %333, %332 : vector<1x128xf32>
    %388 = arith.mulf %334, %336 : vector<1x128xf32>
    %389 = arith.addf %387, %388 : vector<1x128xf32>
    %390 = arith.mulf %335, %340 : vector<1x128xf32>
    %391 = arith.addf %389, %390 : vector<1x128xf32>
    %392 = arith.mulf %336, %344 : vector<1x128xf32>
    %393 = arith.addf %391, %392 : vector<1x128xf32>
    %394 = arith.mulf %337, %331 : vector<1x128xf32>
    %395 = arith.mulf %338, %335 : vector<1x128xf32>
    %396 = arith.addf %394, %395 : vector<1x128xf32>
    %397 = arith.mulf %339, %339 : vector<1x128xf32>
    %398 = arith.addf %396, %397 : vector<1x128xf32>
    %399 = arith.mulf %340, %343 : vector<1x128xf32>
    %400 = arith.addf %398, %399 : vector<1x128xf32>
    %401 = arith.mulf %337, %332 : vector<1x128xf32>
    %402 = arith.mulf %338, %336 : vector<1x128xf32>
    %403 = arith.addf %401, %402 : vector<1x128xf32>
    %404 = arith.mulf %339, %340 : vector<1x128xf32>
    %405 = arith.addf %403, %404 : vector<1x128xf32>
    %406 = arith.mulf %340, %344 : vector<1x128xf32>
    %407 = arith.addf %405, %406 : vector<1x128xf32>
    %408 = arith.mulf %341, %332 : vector<1x128xf32>
    %409 = arith.mulf %342, %336 : vector<1x128xf32>
    %410 = arith.addf %408, %409 : vector<1x128xf32>
    %411 = arith.mulf %343, %340 : vector<1x128xf32>
    %412 = arith.addf %410, %411 : vector<1x128xf32>
    %413 = arith.mulf %344, %344 : vector<1x128xf32>
    %414 = arith.addf %412, %413 : vector<1x128xf32>
    %415 = arith.addf %351, %379 : vector<1x128xf32>
    %416 = arith.addf %415, %400 : vector<1x128xf32>
    %417 = arith.addf %416, %414 : vector<1x128xf32>
    %cst_19 = arith.constant 1.000000e-30 : f32
    %418 = vector.broadcast %cst_19 : f32 to vector<1x128xf32>
    %419 = arith.maximumf %417, %418 : vector<1x128xf32>
    %420 = tpu.reciprocal %419 {approx = true} : vector<1x128xf32> -> vector<1x128xf32>
    %421 = arith.mulf %351, %420 : vector<1x128xf32>
    %422 = arith.mulf %358, %420 : vector<1x128xf32>
    %423 = arith.mulf %365, %420 : vector<1x128xf32>
    %424 = arith.mulf %372, %420 : vector<1x128xf32>
    %425 = arith.mulf %358, %420 : vector<1x128xf32>
    %426 = arith.mulf %379, %420 : vector<1x128xf32>
    %427 = arith.mulf %386, %420 : vector<1x128xf32>
    %428 = arith.mulf %393, %420 : vector<1x128xf32>
    %429 = arith.mulf %365, %420 : vector<1x128xf32>
    %430 = arith.mulf %386, %420 : vector<1x128xf32>
    %431 = arith.mulf %400, %420 : vector<1x128xf32>
    %432 = arith.mulf %407, %420 : vector<1x128xf32>
    %433 = arith.mulf %372, %420 : vector<1x128xf32>
    %434 = arith.mulf %393, %420 : vector<1x128xf32>
    %435 = arith.mulf %407, %420 : vector<1x128xf32>
    %436 = arith.mulf %414, %420 : vector<1x128xf32>
    %437 = arith.mulf %421, %421 : vector<1x128xf32>
    %438 = arith.mulf %422, %425 : vector<1x128xf32>
    %439 = arith.addf %437, %438 : vector<1x128xf32>
    %440 = arith.mulf %423, %429 : vector<1x128xf32>
    %441 = arith.addf %439, %440 : vector<1x128xf32>
    %442 = arith.mulf %424, %433 : vector<1x128xf32>
    %443 = arith.addf %441, %442 : vector<1x128xf32>
    %444 = arith.mulf %421, %422 : vector<1x128xf32>
    %445 = arith.mulf %422, %426 : vector<1x128xf32>
    %446 = arith.addf %444, %445 : vector<1x128xf32>
    %447 = arith.mulf %423, %430 : vector<1x128xf32>
    %448 = arith.addf %446, %447 : vector<1x128xf32>
    %449 = arith.mulf %424, %434 : vector<1x128xf32>
    %450 = arith.addf %448, %449 : vector<1x128xf32>
    %451 = arith.mulf %421, %423 : vector<1x128xf32>
    %452 = arith.mulf %422, %427 : vector<1x128xf32>
    %453 = arith.addf %451, %452 : vector<1x128xf32>
    %454 = arith.mulf %423, %431 : vector<1x128xf32>
    %455 = arith.addf %453, %454 : vector<1x128xf32>
    %456 = arith.mulf %424, %435 : vector<1x128xf32>
    %457 = arith.addf %455, %456 : vector<1x128xf32>
    %458 = arith.mulf %421, %424 : vector<1x128xf32>
    %459 = arith.mulf %422, %428 : vector<1x128xf32>
    %460 = arith.addf %458, %459 : vector<1x128xf32>
    %461 = arith.mulf %423, %432 : vector<1x128xf32>
    %462 = arith.addf %460, %461 : vector<1x128xf32>
    %463 = arith.mulf %424, %436 : vector<1x128xf32>
    %464 = arith.addf %462, %463 : vector<1x128xf32>
    %465 = arith.mulf %425, %422 : vector<1x128xf32>
    %466 = arith.mulf %426, %426 : vector<1x128xf32>
    %467 = arith.addf %465, %466 : vector<1x128xf32>
    %468 = arith.mulf %427, %430 : vector<1x128xf32>
    %469 = arith.addf %467, %468 : vector<1x128xf32>
    %470 = arith.mulf %428, %434 : vector<1x128xf32>
    %471 = arith.addf %469, %470 : vector<1x128xf32>
    %472 = arith.mulf %425, %423 : vector<1x128xf32>
    %473 = arith.mulf %426, %427 : vector<1x128xf32>
    %474 = arith.addf %472, %473 : vector<1x128xf32>
    %475 = arith.mulf %427, %431 : vector<1x128xf32>
    %476 = arith.addf %474, %475 : vector<1x128xf32>
    %477 = arith.mulf %428, %435 : vector<1x128xf32>
    %478 = arith.addf %476, %477 : vector<1x128xf32>
    %479 = arith.mulf %425, %424 : vector<1x128xf32>
    %480 = arith.mulf %426, %428 : vector<1x128xf32>
    %481 = arith.addf %479, %480 : vector<1x128xf32>
    %482 = arith.mulf %427, %432 : vector<1x128xf32>
    %483 = arith.addf %481, %482 : vector<1x128xf32>
    %484 = arith.mulf %428, %436 : vector<1x128xf32>
    %485 = arith.addf %483, %484 : vector<1x128xf32>
    %486 = arith.mulf %429, %423 : vector<1x128xf32>
    %487 = arith.mulf %430, %427 : vector<1x128xf32>
    %488 = arith.addf %486, %487 : vector<1x128xf32>
    %489 = arith.mulf %431, %431 : vector<1x128xf32>
    %490 = arith.addf %488, %489 : vector<1x128xf32>
    %491 = arith.mulf %432, %435 : vector<1x128xf32>
    %492 = arith.addf %490, %491 : vector<1x128xf32>
    %493 = arith.mulf %429, %424 : vector<1x128xf32>
    %494 = arith.mulf %430, %428 : vector<1x128xf32>
    %495 = arith.addf %493, %494 : vector<1x128xf32>
    %496 = arith.mulf %431, %432 : vector<1x128xf32>
    %497 = arith.addf %495, %496 : vector<1x128xf32>
    %498 = arith.mulf %432, %436 : vector<1x128xf32>
    %499 = arith.addf %497, %498 : vector<1x128xf32>
    %500 = arith.mulf %433, %424 : vector<1x128xf32>
    %501 = arith.mulf %434, %428 : vector<1x128xf32>
    %502 = arith.addf %500, %501 : vector<1x128xf32>
    %503 = arith.mulf %435, %432 : vector<1x128xf32>
    %504 = arith.addf %502, %503 : vector<1x128xf32>
    %505 = arith.mulf %436, %436 : vector<1x128xf32>
    %506 = arith.addf %504, %505 : vector<1x128xf32>
    %507 = arith.addf %443, %471 : vector<1x128xf32>
    %508 = arith.addf %507, %492 : vector<1x128xf32>
    %509 = arith.addf %508, %506 : vector<1x128xf32>
    %cst_20 = arith.constant 1.000000e-30 : f32
    %510 = vector.broadcast %cst_20 : f32 to vector<1x128xf32>
    %511 = arith.maximumf %509, %510 : vector<1x128xf32>
    %512 = tpu.reciprocal %511 {approx = true} : vector<1x128xf32> -> vector<1x128xf32>
    %513 = arith.mulf %443, %512 : vector<1x128xf32>
    %514 = arith.mulf %450, %512 : vector<1x128xf32>
    %515 = arith.mulf %457, %512 : vector<1x128xf32>
    %516 = arith.mulf %464, %512 : vector<1x128xf32>
    %517 = arith.mulf %450, %512 : vector<1x128xf32>
    %518 = arith.mulf %471, %512 : vector<1x128xf32>
    %519 = arith.mulf %478, %512 : vector<1x128xf32>
    %520 = arith.mulf %485, %512 : vector<1x128xf32>
    %521 = arith.mulf %457, %512 : vector<1x128xf32>
    %522 = arith.mulf %478, %512 : vector<1x128xf32>
    %523 = arith.mulf %492, %512 : vector<1x128xf32>
    %524 = arith.mulf %499, %512 : vector<1x128xf32>
    %525 = arith.mulf %464, %512 : vector<1x128xf32>
    %526 = arith.mulf %485, %512 : vector<1x128xf32>
    %527 = arith.mulf %499, %512 : vector<1x128xf32>
    %528 = arith.mulf %506, %512 : vector<1x128xf32>
    %529 = arith.mulf %513, %513 : vector<1x128xf32>
    %530 = arith.mulf %514, %517 : vector<1x128xf32>
    %531 = arith.addf %529, %530 : vector<1x128xf32>
    %532 = arith.mulf %515, %521 : vector<1x128xf32>
    %533 = arith.addf %531, %532 : vector<1x128xf32>
    %534 = arith.mulf %516, %525 : vector<1x128xf32>
    %535 = arith.addf %533, %534 : vector<1x128xf32>
    %536 = arith.mulf %513, %514 : vector<1x128xf32>
    %537 = arith.mulf %514, %518 : vector<1x128xf32>
    %538 = arith.addf %536, %537 : vector<1x128xf32>
    %539 = arith.mulf %515, %522 : vector<1x128xf32>
    %540 = arith.addf %538, %539 : vector<1x128xf32>
    %541 = arith.mulf %516, %526 : vector<1x128xf32>
    %542 = arith.addf %540, %541 : vector<1x128xf32>
    %543 = arith.mulf %513, %515 : vector<1x128xf32>
    %544 = arith.mulf %514, %519 : vector<1x128xf32>
    %545 = arith.addf %543, %544 : vector<1x128xf32>
    %546 = arith.mulf %515, %523 : vector<1x128xf32>
    %547 = arith.addf %545, %546 : vector<1x128xf32>
    %548 = arith.mulf %516, %527 : vector<1x128xf32>
    %549 = arith.addf %547, %548 : vector<1x128xf32>
    %550 = arith.mulf %513, %516 : vector<1x128xf32>
    %551 = arith.mulf %514, %520 : vector<1x128xf32>
    %552 = arith.addf %550, %551 : vector<1x128xf32>
    %553 = arith.mulf %515, %524 : vector<1x128xf32>
    %554 = arith.addf %552, %553 : vector<1x128xf32>
    %555 = arith.mulf %516, %528 : vector<1x128xf32>
    %556 = arith.addf %554, %555 : vector<1x128xf32>
    %557 = arith.mulf %517, %514 : vector<1x128xf32>
    %558 = arith.mulf %518, %518 : vector<1x128xf32>
    %559 = arith.addf %557, %558 : vector<1x128xf32>
    %560 = arith.mulf %519, %522 : vector<1x128xf32>
    %561 = arith.addf %559, %560 : vector<1x128xf32>
    %562 = arith.mulf %520, %526 : vector<1x128xf32>
    %563 = arith.addf %561, %562 : vector<1x128xf32>
    %564 = arith.mulf %517, %515 : vector<1x128xf32>
    %565 = arith.mulf %518, %519 : vector<1x128xf32>
    %566 = arith.addf %564, %565 : vector<1x128xf32>
    %567 = arith.mulf %519, %523 : vector<1x128xf32>
    %568 = arith.addf %566, %567 : vector<1x128xf32>
    %569 = arith.mulf %520, %527 : vector<1x128xf32>
    %570 = arith.addf %568, %569 : vector<1x128xf32>
    %571 = arith.mulf %517, %516 : vector<1x128xf32>
    %572 = arith.mulf %518, %520 : vector<1x128xf32>
    %573 = arith.addf %571, %572 : vector<1x128xf32>
    %574 = arith.mulf %519, %524 : vector<1x128xf32>
    %575 = arith.addf %573, %574 : vector<1x128xf32>
    %576 = arith.mulf %520, %528 : vector<1x128xf32>
    %577 = arith.addf %575, %576 : vector<1x128xf32>
    %578 = arith.mulf %521, %515 : vector<1x128xf32>
    %579 = arith.mulf %522, %519 : vector<1x128xf32>
    %580 = arith.addf %578, %579 : vector<1x128xf32>
    %581 = arith.mulf %523, %523 : vector<1x128xf32>
    %582 = arith.addf %580, %581 : vector<1x128xf32>
    %583 = arith.mulf %524, %527 : vector<1x128xf32>
    %584 = arith.addf %582, %583 : vector<1x128xf32>
    %585 = arith.mulf %521, %516 : vector<1x128xf32>
    %586 = arith.mulf %522, %520 : vector<1x128xf32>
    %587 = arith.addf %585, %586 : vector<1x128xf32>
    %588 = arith.mulf %523, %524 : vector<1x128xf32>
    %589 = arith.addf %587, %588 : vector<1x128xf32>
    %590 = arith.mulf %524, %528 : vector<1x128xf32>
    %591 = arith.addf %589, %590 : vector<1x128xf32>
    %592 = arith.mulf %525, %516 : vector<1x128xf32>
    %593 = arith.mulf %526, %520 : vector<1x128xf32>
    %594 = arith.addf %592, %593 : vector<1x128xf32>
    %595 = arith.mulf %527, %524 : vector<1x128xf32>
    %596 = arith.addf %594, %595 : vector<1x128xf32>
    %597 = arith.mulf %528, %528 : vector<1x128xf32>
    %598 = arith.addf %596, %597 : vector<1x128xf32>
    %599 = arith.addf %535, %563 : vector<1x128xf32>
    %600 = arith.addf %599, %584 : vector<1x128xf32>
    %601 = arith.addf %600, %598 : vector<1x128xf32>
    %cst_21 = arith.constant 1.000000e-30 : f32
    %602 = vector.broadcast %cst_21 : f32 to vector<1x128xf32>
    %603 = arith.maximumf %601, %602 : vector<1x128xf32>
    %604 = tpu.reciprocal %603 {approx = true} : vector<1x128xf32> -> vector<1x128xf32>
    %605 = arith.mulf %535, %604 : vector<1x128xf32>
    %606 = arith.mulf %542, %604 : vector<1x128xf32>
    %607 = arith.mulf %549, %604 : vector<1x128xf32>
    %608 = arith.mulf %556, %604 : vector<1x128xf32>
    %609 = arith.mulf %542, %604 : vector<1x128xf32>
    %610 = arith.mulf %563, %604 : vector<1x128xf32>
    %611 = arith.mulf %570, %604 : vector<1x128xf32>
    %612 = arith.mulf %577, %604 : vector<1x128xf32>
    %613 = arith.mulf %549, %604 : vector<1x128xf32>
    %614 = arith.mulf %570, %604 : vector<1x128xf32>
    %615 = arith.mulf %584, %604 : vector<1x128xf32>
    %616 = arith.mulf %591, %604 : vector<1x128xf32>
    %617 = arith.mulf %556, %604 : vector<1x128xf32>
    %618 = arith.mulf %577, %604 : vector<1x128xf32>
    %619 = arith.mulf %591, %604 : vector<1x128xf32>
    %620 = arith.mulf %598, %604 : vector<1x128xf32>
    %621 = arith.mulf %605, %605 : vector<1x128xf32>
    %622 = arith.mulf %606, %609 : vector<1x128xf32>
    %623 = arith.addf %621, %622 : vector<1x128xf32>
    %624 = arith.mulf %607, %613 : vector<1x128xf32>
    %625 = arith.addf %623, %624 : vector<1x128xf32>
    %626 = arith.mulf %608, %617 : vector<1x128xf32>
    %627 = arith.addf %625, %626 : vector<1x128xf32>
    %628 = arith.mulf %605, %606 : vector<1x128xf32>
    %629 = arith.mulf %606, %610 : vector<1x128xf32>
    %630 = arith.addf %628, %629 : vector<1x128xf32>
    %631 = arith.mulf %607, %614 : vector<1x128xf32>
    %632 = arith.addf %630, %631 : vector<1x128xf32>
    %633 = arith.mulf %608, %618 : vector<1x128xf32>
    %634 = arith.addf %632, %633 : vector<1x128xf32>
    %635 = arith.mulf %605, %607 : vector<1x128xf32>
    %636 = arith.mulf %606, %611 : vector<1x128xf32>
    %637 = arith.addf %635, %636 : vector<1x128xf32>
    %638 = arith.mulf %607, %615 : vector<1x128xf32>
    %639 = arith.addf %637, %638 : vector<1x128xf32>
    %640 = arith.mulf %608, %619 : vector<1x128xf32>
    %641 = arith.addf %639, %640 : vector<1x128xf32>
    %642 = arith.mulf %605, %608 : vector<1x128xf32>
    %643 = arith.mulf %606, %612 : vector<1x128xf32>
    %644 = arith.addf %642, %643 : vector<1x128xf32>
    %645 = arith.mulf %607, %616 : vector<1x128xf32>
    %646 = arith.addf %644, %645 : vector<1x128xf32>
    %647 = arith.mulf %608, %620 : vector<1x128xf32>
    %648 = arith.addf %646, %647 : vector<1x128xf32>
    %649 = arith.mulf %609, %606 : vector<1x128xf32>
    %650 = arith.mulf %610, %610 : vector<1x128xf32>
    %651 = arith.addf %649, %650 : vector<1x128xf32>
    %652 = arith.mulf %611, %614 : vector<1x128xf32>
    %653 = arith.addf %651, %652 : vector<1x128xf32>
    %654 = arith.mulf %612, %618 : vector<1x128xf32>
    %655 = arith.addf %653, %654 : vector<1x128xf32>
    %656 = arith.mulf %609, %607 : vector<1x128xf32>
    %657 = arith.mulf %610, %611 : vector<1x128xf32>
    %658 = arith.addf %656, %657 : vector<1x128xf32>
    %659 = arith.mulf %611, %615 : vector<1x128xf32>
    %660 = arith.addf %658, %659 : vector<1x128xf32>
    %661 = arith.mulf %612, %619 : vector<1x128xf32>
    %662 = arith.addf %660, %661 : vector<1x128xf32>
    %663 = arith.mulf %609, %608 : vector<1x128xf32>
    %664 = arith.mulf %610, %612 : vector<1x128xf32>
    %665 = arith.addf %663, %664 : vector<1x128xf32>
    %666 = arith.mulf %611, %616 : vector<1x128xf32>
    %667 = arith.addf %665, %666 : vector<1x128xf32>
    %668 = arith.mulf %612, %620 : vector<1x128xf32>
    %669 = arith.addf %667, %668 : vector<1x128xf32>
    %670 = arith.mulf %613, %607 : vector<1x128xf32>
    %671 = arith.mulf %614, %611 : vector<1x128xf32>
    %672 = arith.addf %670, %671 : vector<1x128xf32>
    %673 = arith.mulf %615, %615 : vector<1x128xf32>
    %674 = arith.addf %672, %673 : vector<1x128xf32>
    %675 = arith.mulf %616, %619 : vector<1x128xf32>
    %676 = arith.addf %674, %675 : vector<1x128xf32>
    %677 = arith.mulf %613, %608 : vector<1x128xf32>
    %678 = arith.mulf %614, %612 : vector<1x128xf32>
    %679 = arith.addf %677, %678 : vector<1x128xf32>
    %680 = arith.mulf %615, %616 : vector<1x128xf32>
    %681 = arith.addf %679, %680 : vector<1x128xf32>
    %682 = arith.mulf %616, %620 : vector<1x128xf32>
    %683 = arith.addf %681, %682 : vector<1x128xf32>
    %684 = arith.mulf %617, %608 : vector<1x128xf32>
    %685 = arith.mulf %618, %612 : vector<1x128xf32>
    %686 = arith.addf %684, %685 : vector<1x128xf32>
    %687 = arith.mulf %619, %616 : vector<1x128xf32>
    %688 = arith.addf %686, %687 : vector<1x128xf32>
    %689 = arith.mulf %620, %620 : vector<1x128xf32>
    %690 = arith.addf %688, %689 : vector<1x128xf32>
    %691 = arith.addf %627, %655 : vector<1x128xf32>
    %692 = arith.addf %691, %676 : vector<1x128xf32>
    %693 = arith.addf %692, %690 : vector<1x128xf32>
    %cst_22 = arith.constant 1.000000e-30 : f32
    %694 = vector.broadcast %cst_22 : f32 to vector<1x128xf32>
    %695 = arith.maximumf %693, %694 : vector<1x128xf32>
    %696 = tpu.reciprocal %695 {approx = true} : vector<1x128xf32> -> vector<1x128xf32>
    %697 = arith.mulf %627, %696 : vector<1x128xf32>
    %698 = arith.mulf %634, %696 : vector<1x128xf32>
    %699 = arith.mulf %641, %696 : vector<1x128xf32>
    %700 = arith.mulf %648, %696 : vector<1x128xf32>
    %701 = arith.mulf %634, %696 : vector<1x128xf32>
    %702 = arith.mulf %655, %696 : vector<1x128xf32>
    %703 = arith.mulf %662, %696 : vector<1x128xf32>
    %704 = arith.mulf %669, %696 : vector<1x128xf32>
    %705 = arith.mulf %641, %696 : vector<1x128xf32>
    %706 = arith.mulf %662, %696 : vector<1x128xf32>
    %707 = arith.mulf %676, %696 : vector<1x128xf32>
    %708 = arith.mulf %683, %696 : vector<1x128xf32>
    %709 = arith.mulf %648, %696 : vector<1x128xf32>
    %710 = arith.mulf %669, %696 : vector<1x128xf32>
    %711 = arith.mulf %683, %696 : vector<1x128xf32>
    %712 = arith.mulf %690, %696 : vector<1x128xf32>
    %713 = arith.mulf %697, %697 : vector<1x128xf32>
    %714 = arith.mulf %698, %701 : vector<1x128xf32>
    %715 = arith.addf %713, %714 : vector<1x128xf32>
    %716 = arith.mulf %699, %705 : vector<1x128xf32>
    %717 = arith.addf %715, %716 : vector<1x128xf32>
    %718 = arith.mulf %700, %709 : vector<1x128xf32>
    %719 = arith.addf %717, %718 : vector<1x128xf32>
    %720 = arith.mulf %697, %698 : vector<1x128xf32>
    %721 = arith.mulf %698, %702 : vector<1x128xf32>
    %722 = arith.addf %720, %721 : vector<1x128xf32>
    %723 = arith.mulf %699, %706 : vector<1x128xf32>
    %724 = arith.addf %722, %723 : vector<1x128xf32>
    %725 = arith.mulf %700, %710 : vector<1x128xf32>
    %726 = arith.addf %724, %725 : vector<1x128xf32>
    %727 = arith.mulf %697, %699 : vector<1x128xf32>
    %728 = arith.mulf %698, %703 : vector<1x128xf32>
    %729 = arith.addf %727, %728 : vector<1x128xf32>
    %730 = arith.mulf %699, %707 : vector<1x128xf32>
    %731 = arith.addf %729, %730 : vector<1x128xf32>
    %732 = arith.mulf %700, %711 : vector<1x128xf32>
    %733 = arith.addf %731, %732 : vector<1x128xf32>
    %734 = arith.mulf %697, %700 : vector<1x128xf32>
    %735 = arith.mulf %698, %704 : vector<1x128xf32>
    %736 = arith.addf %734, %735 : vector<1x128xf32>
    %737 = arith.mulf %699, %708 : vector<1x128xf32>
    %738 = arith.addf %736, %737 : vector<1x128xf32>
    %739 = arith.mulf %700, %712 : vector<1x128xf32>
    %740 = arith.addf %738, %739 : vector<1x128xf32>
    %741 = arith.mulf %701, %698 : vector<1x128xf32>
    %742 = arith.mulf %702, %702 : vector<1x128xf32>
    %743 = arith.addf %741, %742 : vector<1x128xf32>
    %744 = arith.mulf %703, %706 : vector<1x128xf32>
    %745 = arith.addf %743, %744 : vector<1x128xf32>
    %746 = arith.mulf %704, %710 : vector<1x128xf32>
    %747 = arith.addf %745, %746 : vector<1x128xf32>
    %748 = arith.mulf %701, %699 : vector<1x128xf32>
    %749 = arith.mulf %702, %703 : vector<1x128xf32>
    %750 = arith.addf %748, %749 : vector<1x128xf32>
    %751 = arith.mulf %703, %707 : vector<1x128xf32>
    %752 = arith.addf %750, %751 : vector<1x128xf32>
    %753 = arith.mulf %704, %711 : vector<1x128xf32>
    %754 = arith.addf %752, %753 : vector<1x128xf32>
    %755 = arith.mulf %701, %700 : vector<1x128xf32>
    %756 = arith.mulf %702, %704 : vector<1x128xf32>
    %757 = arith.addf %755, %756 : vector<1x128xf32>
    %758 = arith.mulf %703, %708 : vector<1x128xf32>
    %759 = arith.addf %757, %758 : vector<1x128xf32>
    %760 = arith.mulf %704, %712 : vector<1x128xf32>
    %761 = arith.addf %759, %760 : vector<1x128xf32>
    %762 = arith.mulf %705, %699 : vector<1x128xf32>
    %763 = arith.mulf %706, %703 : vector<1x128xf32>
    %764 = arith.addf %762, %763 : vector<1x128xf32>
    %765 = arith.mulf %707, %707 : vector<1x128xf32>
    %766 = arith.addf %764, %765 : vector<1x128xf32>
    %767 = arith.mulf %708, %711 : vector<1x128xf32>
    %768 = arith.addf %766, %767 : vector<1x128xf32>
    %769 = arith.mulf %705, %700 : vector<1x128xf32>
    %770 = arith.mulf %706, %704 : vector<1x128xf32>
    %771 = arith.addf %769, %770 : vector<1x128xf32>
    %772 = arith.mulf %707, %708 : vector<1x128xf32>
    %773 = arith.addf %771, %772 : vector<1x128xf32>
    %774 = arith.mulf %708, %712 : vector<1x128xf32>
    %775 = arith.addf %773, %774 : vector<1x128xf32>
    %776 = arith.mulf %709, %700 : vector<1x128xf32>
    %777 = arith.mulf %710, %704 : vector<1x128xf32>
    %778 = arith.addf %776, %777 : vector<1x128xf32>
    %779 = arith.mulf %711, %708 : vector<1x128xf32>
    %780 = arith.addf %778, %779 : vector<1x128xf32>
    %781 = arith.mulf %712, %712 : vector<1x128xf32>
    %782 = arith.addf %780, %781 : vector<1x128xf32>
    %783 = arith.addf %719, %747 : vector<1x128xf32>
    %784 = arith.addf %783, %768 : vector<1x128xf32>
    %785 = arith.addf %784, %782 : vector<1x128xf32>
    %cst_23 = arith.constant 1.000000e-30 : f32
    %786 = vector.broadcast %cst_23 : f32 to vector<1x128xf32>
    %787 = arith.maximumf %785, %786 : vector<1x128xf32>
    %788 = tpu.reciprocal %787 {approx = true} : vector<1x128xf32> -> vector<1x128xf32>
    %789 = arith.mulf %719, %788 : vector<1x128xf32>
    %790 = arith.mulf %726, %788 : vector<1x128xf32>
    %791 = arith.mulf %733, %788 : vector<1x128xf32>
    %792 = arith.mulf %740, %788 : vector<1x128xf32>
    %793 = arith.mulf %726, %788 : vector<1x128xf32>
    %794 = arith.mulf %747, %788 : vector<1x128xf32>
    %795 = arith.mulf %754, %788 : vector<1x128xf32>
    %796 = arith.mulf %761, %788 : vector<1x128xf32>
    %797 = arith.mulf %733, %788 : vector<1x128xf32>
    %798 = arith.mulf %754, %788 : vector<1x128xf32>
    %799 = arith.mulf %768, %788 : vector<1x128xf32>
    %800 = arith.mulf %775, %788 : vector<1x128xf32>
    %801 = arith.mulf %740, %788 : vector<1x128xf32>
    %802 = arith.mulf %761, %788 : vector<1x128xf32>
    %803 = arith.mulf %775, %788 : vector<1x128xf32>
    %804 = arith.mulf %782, %788 : vector<1x128xf32>
    %cst_24 = arith.constant 1.000000e+00 : f32
    %805 = vector.broadcast %cst_24 : f32 to vector<1x128xf32>
    %cst_25 = arith.constant 1.000000e+00 : f32
    %806 = vector.broadcast %cst_25 : f32 to vector<1x128xf32>
    %cst_26 = arith.constant 1.000000e+00 : f32
    %807 = vector.broadcast %cst_26 : f32 to vector<1x128xf32>
    %cst_27 = arith.constant 1.000000e+00 : f32
    %808 = vector.broadcast %cst_27 : f32 to vector<1x128xf32>
    %809 = arith.mulf %789, %805 : vector<1x128xf32>
    %810 = arith.mulf %790, %806 : vector<1x128xf32>
    %811 = arith.addf %809, %810 : vector<1x128xf32>
    %812 = arith.mulf %791, %807 : vector<1x128xf32>
    %813 = arith.addf %811, %812 : vector<1x128xf32>
    %814 = arith.mulf %792, %808 : vector<1x128xf32>
    %815 = arith.addf %813, %814 : vector<1x128xf32>
    %816 = arith.mulf %793, %805 : vector<1x128xf32>
    %817 = arith.mulf %794, %806 : vector<1x128xf32>
    %818 = arith.addf %816, %817 : vector<1x128xf32>
    %819 = arith.mulf %795, %807 : vector<1x128xf32>
    %820 = arith.addf %818, %819 : vector<1x128xf32>
    %821 = arith.mulf %796, %808 : vector<1x128xf32>
    %822 = arith.addf %820, %821 : vector<1x128xf32>
    %823 = arith.mulf %797, %805 : vector<1x128xf32>
    %824 = arith.mulf %798, %806 : vector<1x128xf32>
    %825 = arith.addf %823, %824 : vector<1x128xf32>
    %826 = arith.mulf %799, %807 : vector<1x128xf32>
    %827 = arith.addf %825, %826 : vector<1x128xf32>
    %828 = arith.mulf %800, %808 : vector<1x128xf32>
    %829 = arith.addf %827, %828 : vector<1x128xf32>
    %830 = arith.mulf %801, %805 : vector<1x128xf32>
    %831 = arith.mulf %802, %806 : vector<1x128xf32>
    %832 = arith.addf %830, %831 : vector<1x128xf32>
    %833 = arith.mulf %803, %807 : vector<1x128xf32>
    %834 = arith.addf %832, %833 : vector<1x128xf32>
    %835 = arith.mulf %804, %808 : vector<1x128xf32>
    %836 = arith.addf %834, %835 : vector<1x128xf32>
    %837 = arith.mulf %815, %815 : vector<1x128xf32>
    %838 = arith.mulf %822, %822 : vector<1x128xf32>
    %839 = arith.addf %837, %838 : vector<1x128xf32>
    %840 = arith.mulf %829, %829 : vector<1x128xf32>
    %841 = arith.addf %839, %840 : vector<1x128xf32>
    %842 = arith.mulf %836, %836 : vector<1x128xf32>
    %843 = arith.addf %841, %842 : vector<1x128xf32>
    %cst_28 = arith.constant 1.000000e-30 : f32
    %844 = vector.broadcast %cst_28 : f32 to vector<1x128xf32>
    %845 = arith.maximumf %843, %844 : vector<1x128xf32>
    %846 = math.rsqrt %845 : vector<1x128xf32>
    %847 = arith.mulf %815, %846 : vector<1x128xf32>
    %848 = arith.mulf %822, %846 : vector<1x128xf32>
    %849 = arith.mulf %829, %846 : vector<1x128xf32>
    %850 = arith.mulf %836, %846 : vector<1x128xf32>
    %851 = arith.mulf %789, %847 : vector<1x128xf32>
    %852 = arith.mulf %790, %848 : vector<1x128xf32>
    %853 = arith.addf %851, %852 : vector<1x128xf32>
    %854 = arith.mulf %791, %849 : vector<1x128xf32>
    %855 = arith.addf %853, %854 : vector<1x128xf32>
    %856 = arith.mulf %792, %850 : vector<1x128xf32>
    %857 = arith.addf %855, %856 : vector<1x128xf32>
    %858 = arith.mulf %793, %847 : vector<1x128xf32>
    %859 = arith.mulf %794, %848 : vector<1x128xf32>
    %860 = arith.addf %858, %859 : vector<1x128xf32>
    %861 = arith.mulf %795, %849 : vector<1x128xf32>
    %862 = arith.addf %860, %861 : vector<1x128xf32>
    %863 = arith.mulf %796, %850 : vector<1x128xf32>
    %864 = arith.addf %862, %863 : vector<1x128xf32>
    %865 = arith.mulf %797, %847 : vector<1x128xf32>
    %866 = arith.mulf %798, %848 : vector<1x128xf32>
    %867 = arith.addf %865, %866 : vector<1x128xf32>
    %868 = arith.mulf %799, %849 : vector<1x128xf32>
    %869 = arith.addf %867, %868 : vector<1x128xf32>
    %870 = arith.mulf %800, %850 : vector<1x128xf32>
    %871 = arith.addf %869, %870 : vector<1x128xf32>
    %872 = arith.mulf %801, %847 : vector<1x128xf32>
    %873 = arith.mulf %802, %848 : vector<1x128xf32>
    %874 = arith.addf %872, %873 : vector<1x128xf32>
    %875 = arith.mulf %803, %849 : vector<1x128xf32>
    %876 = arith.addf %874, %875 : vector<1x128xf32>
    %877 = arith.mulf %804, %850 : vector<1x128xf32>
    %878 = arith.addf %876, %877 : vector<1x128xf32>
    %879 = arith.mulf %857, %857 : vector<1x128xf32>
    %880 = arith.mulf %864, %864 : vector<1x128xf32>
    %881 = arith.addf %879, %880 : vector<1x128xf32>
    %882 = arith.mulf %871, %871 : vector<1x128xf32>
    %883 = arith.addf %881, %882 : vector<1x128xf32>
    %884 = arith.mulf %878, %878 : vector<1x128xf32>
    %885 = arith.addf %883, %884 : vector<1x128xf32>
    %cst_29 = arith.constant 1.000000e-30 : f32
    %886 = vector.broadcast %cst_29 : f32 to vector<1x128xf32>
    %887 = arith.maximumf %885, %886 : vector<1x128xf32>
    %888 = math.rsqrt %887 : vector<1x128xf32>
    %889 = arith.mulf %857, %888 : vector<1x128xf32>
    %890 = arith.mulf %864, %888 : vector<1x128xf32>
    %891 = arith.mulf %871, %888 : vector<1x128xf32>
    %892 = arith.mulf %878, %888 : vector<1x128xf32>
    %893 = arith.mulf %789, %889 : vector<1x128xf32>
    %894 = arith.mulf %790, %890 : vector<1x128xf32>
    %895 = arith.addf %893, %894 : vector<1x128xf32>
    %896 = arith.mulf %791, %891 : vector<1x128xf32>
    %897 = arith.addf %895, %896 : vector<1x128xf32>
    %898 = arith.mulf %792, %892 : vector<1x128xf32>
    %899 = arith.addf %897, %898 : vector<1x128xf32>
    %900 = arith.mulf %793, %889 : vector<1x128xf32>
    %901 = arith.mulf %794, %890 : vector<1x128xf32>
    %902 = arith.addf %900, %901 : vector<1x128xf32>
    %903 = arith.mulf %795, %891 : vector<1x128xf32>
    %904 = arith.addf %902, %903 : vector<1x128xf32>
    %905 = arith.mulf %796, %892 : vector<1x128xf32>
    %906 = arith.addf %904, %905 : vector<1x128xf32>
    %907 = arith.mulf %797, %889 : vector<1x128xf32>
    %908 = arith.mulf %798, %890 : vector<1x128xf32>
    %909 = arith.addf %907, %908 : vector<1x128xf32>
    %910 = arith.mulf %799, %891 : vector<1x128xf32>
    %911 = arith.addf %909, %910 : vector<1x128xf32>
    %912 = arith.mulf %800, %892 : vector<1x128xf32>
    %913 = arith.addf %911, %912 : vector<1x128xf32>
    %914 = arith.mulf %801, %889 : vector<1x128xf32>
    %915 = arith.mulf %802, %890 : vector<1x128xf32>
    %916 = arith.addf %914, %915 : vector<1x128xf32>
    %917 = arith.mulf %803, %891 : vector<1x128xf32>
    %918 = arith.addf %916, %917 : vector<1x128xf32>
    %919 = arith.mulf %804, %892 : vector<1x128xf32>
    %920 = arith.addf %918, %919 : vector<1x128xf32>
    %921 = arith.mulf %899, %899 : vector<1x128xf32>
    %922 = arith.mulf %906, %906 : vector<1x128xf32>
    %923 = arith.addf %921, %922 : vector<1x128xf32>
    %924 = arith.mulf %913, %913 : vector<1x128xf32>
    %925 = arith.addf %923, %924 : vector<1x128xf32>
    %926 = arith.mulf %920, %920 : vector<1x128xf32>
    %927 = arith.addf %925, %926 : vector<1x128xf32>
    %cst_30 = arith.constant 1.000000e-30 : f32
    %928 = vector.broadcast %cst_30 : f32 to vector<1x128xf32>
    %929 = arith.maximumf %927, %928 : vector<1x128xf32>
    %930 = math.rsqrt %929 : vector<1x128xf32>
    %931 = arith.mulf %899, %930 : vector<1x128xf32>
    %932 = arith.mulf %906, %930 : vector<1x128xf32>
    %933 = arith.mulf %913, %930 : vector<1x128xf32>
    %934 = arith.mulf %920, %930 : vector<1x128xf32>
    %935 = arith.mulf %789, %931 : vector<1x128xf32>
    %936 = arith.mulf %790, %932 : vector<1x128xf32>
    %937 = arith.addf %935, %936 : vector<1x128xf32>
    %938 = arith.mulf %791, %933 : vector<1x128xf32>
    %939 = arith.addf %937, %938 : vector<1x128xf32>
    %940 = arith.mulf %792, %934 : vector<1x128xf32>
    %941 = arith.addf %939, %940 : vector<1x128xf32>
    %942 = arith.mulf %793, %931 : vector<1x128xf32>
    %943 = arith.mulf %794, %932 : vector<1x128xf32>
    %944 = arith.addf %942, %943 : vector<1x128xf32>
    %945 = arith.mulf %795, %933 : vector<1x128xf32>
    %946 = arith.addf %944, %945 : vector<1x128xf32>
    %947 = arith.mulf %796, %934 : vector<1x128xf32>
    %948 = arith.addf %946, %947 : vector<1x128xf32>
    %949 = arith.mulf %797, %931 : vector<1x128xf32>
    %950 = arith.mulf %798, %932 : vector<1x128xf32>
    %951 = arith.addf %949, %950 : vector<1x128xf32>
    %952 = arith.mulf %799, %933 : vector<1x128xf32>
    %953 = arith.addf %951, %952 : vector<1x128xf32>
    %954 = arith.mulf %800, %934 : vector<1x128xf32>
    %955 = arith.addf %953, %954 : vector<1x128xf32>
    %956 = arith.mulf %801, %931 : vector<1x128xf32>
    %957 = arith.mulf %802, %932 : vector<1x128xf32>
    %958 = arith.addf %956, %957 : vector<1x128xf32>
    %959 = arith.mulf %803, %933 : vector<1x128xf32>
    %960 = arith.addf %958, %959 : vector<1x128xf32>
    %961 = arith.mulf %804, %934 : vector<1x128xf32>
    %962 = arith.addf %960, %961 : vector<1x128xf32>
    %963 = arith.mulf %941, %941 : vector<1x128xf32>
    %964 = arith.mulf %948, %948 : vector<1x128xf32>
    %965 = arith.addf %963, %964 : vector<1x128xf32>
    %966 = arith.mulf %955, %955 : vector<1x128xf32>
    %967 = arith.addf %965, %966 : vector<1x128xf32>
    %968 = arith.mulf %962, %962 : vector<1x128xf32>
    %969 = arith.addf %967, %968 : vector<1x128xf32>
    %cst_31 = arith.constant 1.000000e-30 : f32
    %970 = vector.broadcast %cst_31 : f32 to vector<1x128xf32>
    %971 = arith.maximumf %969, %970 : vector<1x128xf32>
    %972 = math.rsqrt %971 : vector<1x128xf32>
    %973 = arith.mulf %941, %972 : vector<1x128xf32>
    %974 = arith.mulf %948, %972 : vector<1x128xf32>
    %975 = arith.mulf %955, %972 : vector<1x128xf32>
    %976 = arith.mulf %962, %972 : vector<1x128xf32>
    %977 = arith.mulf %53, %973 : vector<1x128xf32>
    %978 = arith.mulf %54, %974 : vector<1x128xf32>
    %979 = arith.addf %977, %978 : vector<1x128xf32>
    %980 = arith.mulf %55, %975 : vector<1x128xf32>
    %981 = arith.addf %979, %980 : vector<1x128xf32>
    %982 = arith.mulf %56, %976 : vector<1x128xf32>
    %983 = arith.addf %981, %982 : vector<1x128xf32>
    %984 = arith.mulf %57, %973 : vector<1x128xf32>
    %985 = arith.mulf %58, %974 : vector<1x128xf32>
    %986 = arith.addf %984, %985 : vector<1x128xf32>
    %987 = arith.mulf %59, %975 : vector<1x128xf32>
    %988 = arith.addf %986, %987 : vector<1x128xf32>
    %989 = arith.mulf %60, %976 : vector<1x128xf32>
    %990 = arith.addf %988, %989 : vector<1x128xf32>
    %991 = arith.mulf %61, %973 : vector<1x128xf32>
    %992 = arith.mulf %62, %974 : vector<1x128xf32>
    %993 = arith.addf %991, %992 : vector<1x128xf32>
    %994 = arith.mulf %63, %975 : vector<1x128xf32>
    %995 = arith.addf %993, %994 : vector<1x128xf32>
    %996 = arith.mulf %64, %976 : vector<1x128xf32>
    %997 = arith.addf %995, %996 : vector<1x128xf32>
    %998 = arith.mulf %65, %973 : vector<1x128xf32>
    %999 = arith.mulf %66, %974 : vector<1x128xf32>
    %1000 = arith.addf %998, %999 : vector<1x128xf32>
    %1001 = arith.mulf %67, %975 : vector<1x128xf32>
    %1002 = arith.addf %1000, %1001 : vector<1x128xf32>
    %1003 = arith.mulf %68, %976 : vector<1x128xf32>
    %1004 = arith.addf %1002, %1003 : vector<1x128xf32>
    %1005 = arith.mulf %983, %983 : vector<1x128xf32>
    %1006 = arith.mulf %990, %990 : vector<1x128xf32>
    %1007 = arith.addf %1005, %1006 : vector<1x128xf32>
    %1008 = arith.mulf %997, %997 : vector<1x128xf32>
    %1009 = arith.addf %1007, %1008 : vector<1x128xf32>
    %1010 = arith.mulf %1004, %1004 : vector<1x128xf32>
    %1011 = arith.addf %1009, %1010 : vector<1x128xf32>
    %cst_32 = arith.constant 1.000000e-30 : f32
    %1012 = vector.broadcast %cst_32 : f32 to vector<1x128xf32>
    %1013 = arith.maximumf %1011, %1012 : vector<1x128xf32>
    %1014 = math.rsqrt %1013 : vector<1x128xf32>
    %1015 = arith.mulf %983, %1014 : vector<1x128xf32>
    %1016 = arith.mulf %990, %1014 : vector<1x128xf32>
    %1017 = arith.mulf %997, %1014 : vector<1x128xf32>
    %1018 = arith.mulf %1004, %1014 : vector<1x128xf32>
    %1019 = arith.mulf %53, %1015 : vector<1x128xf32>
    %1020 = arith.mulf %54, %1016 : vector<1x128xf32>
    %1021 = arith.addf %1019, %1020 : vector<1x128xf32>
    %1022 = arith.mulf %55, %1017 : vector<1x128xf32>
    %1023 = arith.addf %1021, %1022 : vector<1x128xf32>
    %1024 = arith.mulf %56, %1018 : vector<1x128xf32>
    %1025 = arith.addf %1023, %1024 : vector<1x128xf32>
    %1026 = arith.mulf %57, %1015 : vector<1x128xf32>
    %1027 = arith.mulf %58, %1016 : vector<1x128xf32>
    %1028 = arith.addf %1026, %1027 : vector<1x128xf32>
    %1029 = arith.mulf %59, %1017 : vector<1x128xf32>
    %1030 = arith.addf %1028, %1029 : vector<1x128xf32>
    %1031 = arith.mulf %60, %1018 : vector<1x128xf32>
    %1032 = arith.addf %1030, %1031 : vector<1x128xf32>
    %1033 = arith.mulf %61, %1015 : vector<1x128xf32>
    %1034 = arith.mulf %62, %1016 : vector<1x128xf32>
    %1035 = arith.addf %1033, %1034 : vector<1x128xf32>
    %1036 = arith.mulf %63, %1017 : vector<1x128xf32>
    %1037 = arith.addf %1035, %1036 : vector<1x128xf32>
    %1038 = arith.mulf %64, %1018 : vector<1x128xf32>
    %1039 = arith.addf %1037, %1038 : vector<1x128xf32>
    %1040 = arith.mulf %65, %1015 : vector<1x128xf32>
    %1041 = arith.mulf %66, %1016 : vector<1x128xf32>
    %1042 = arith.addf %1040, %1041 : vector<1x128xf32>
    %1043 = arith.mulf %67, %1017 : vector<1x128xf32>
    %1044 = arith.addf %1042, %1043 : vector<1x128xf32>
    %1045 = arith.mulf %68, %1018 : vector<1x128xf32>
    %1046 = arith.addf %1044, %1045 : vector<1x128xf32>
    %1047 = arith.mulf %1025, %1025 : vector<1x128xf32>
    %1048 = arith.mulf %1032, %1032 : vector<1x128xf32>
    %1049 = arith.addf %1047, %1048 : vector<1x128xf32>
    %1050 = arith.mulf %1039, %1039 : vector<1x128xf32>
    %1051 = arith.addf %1049, %1050 : vector<1x128xf32>
    %1052 = arith.mulf %1046, %1046 : vector<1x128xf32>
    %1053 = arith.addf %1051, %1052 : vector<1x128xf32>
    %cst_33 = arith.constant 1.000000e-30 : f32
    %1054 = vector.broadcast %cst_33 : f32 to vector<1x128xf32>
    %1055 = arith.maximumf %1053, %1054 : vector<1x128xf32>
    %1056 = math.rsqrt %1055 : vector<1x128xf32>
    %1057 = arith.mulf %1025, %1056 : vector<1x128xf32>
    %1058 = arith.mulf %1032, %1056 : vector<1x128xf32>
    %1059 = arith.mulf %1039, %1056 : vector<1x128xf32>
    %1060 = arith.mulf %1046, %1056 : vector<1x128xf32>
    %1061 = arith.mulf %53, %1057 : vector<1x128xf32>
    %1062 = arith.mulf %54, %1058 : vector<1x128xf32>
    %1063 = arith.addf %1061, %1062 : vector<1x128xf32>
    %1064 = arith.mulf %55, %1059 : vector<1x128xf32>
    %1065 = arith.addf %1063, %1064 : vector<1x128xf32>
    %1066 = arith.mulf %56, %1060 : vector<1x128xf32>
    %1067 = arith.addf %1065, %1066 : vector<1x128xf32>
    %1068 = arith.mulf %57, %1057 : vector<1x128xf32>
    %1069 = arith.mulf %58, %1058 : vector<1x128xf32>
    %1070 = arith.addf %1068, %1069 : vector<1x128xf32>
    %1071 = arith.mulf %59, %1059 : vector<1x128xf32>
    %1072 = arith.addf %1070, %1071 : vector<1x128xf32>
    %1073 = arith.mulf %60, %1060 : vector<1x128xf32>
    %1074 = arith.addf %1072, %1073 : vector<1x128xf32>
    %1075 = arith.mulf %61, %1057 : vector<1x128xf32>
    %1076 = arith.mulf %62, %1058 : vector<1x128xf32>
    %1077 = arith.addf %1075, %1076 : vector<1x128xf32>
    %1078 = arith.mulf %63, %1059 : vector<1x128xf32>
    %1079 = arith.addf %1077, %1078 : vector<1x128xf32>
    %1080 = arith.mulf %64, %1060 : vector<1x128xf32>
    %1081 = arith.addf %1079, %1080 : vector<1x128xf32>
    %1082 = arith.mulf %65, %1057 : vector<1x128xf32>
    %1083 = arith.mulf %66, %1058 : vector<1x128xf32>
    %1084 = arith.addf %1082, %1083 : vector<1x128xf32>
    %1085 = arith.mulf %67, %1059 : vector<1x128xf32>
    %1086 = arith.addf %1084, %1085 : vector<1x128xf32>
    %1087 = arith.mulf %68, %1060 : vector<1x128xf32>
    %1088 = arith.addf %1086, %1087 : vector<1x128xf32>
    %1089 = arith.mulf %1067, %1067 : vector<1x128xf32>
    %1090 = arith.mulf %1074, %1074 : vector<1x128xf32>
    %1091 = arith.addf %1089, %1090 : vector<1x128xf32>
    %1092 = arith.mulf %1081, %1081 : vector<1x128xf32>
    %1093 = arith.addf %1091, %1092 : vector<1x128xf32>
    %1094 = arith.mulf %1088, %1088 : vector<1x128xf32>
    %1095 = arith.addf %1093, %1094 : vector<1x128xf32>
    %cst_34 = arith.constant 1.000000e-30 : f32
    %1096 = vector.broadcast %cst_34 : f32 to vector<1x128xf32>
    %1097 = arith.maximumf %1095, %1096 : vector<1x128xf32>
    %1098 = math.rsqrt %1097 : vector<1x128xf32>
    %1099 = arith.mulf %1067, %1098 : vector<1x128xf32>
    %1100 = arith.mulf %1074, %1098 : vector<1x128xf32>
    %1101 = arith.mulf %1081, %1098 : vector<1x128xf32>
    %1102 = arith.mulf %1088, %1098 : vector<1x128xf32>
    %1103 = arith.mulf %53, %1099 : vector<1x128xf32>
    %1104 = arith.mulf %54, %1100 : vector<1x128xf32>
    %1105 = arith.addf %1103, %1104 : vector<1x128xf32>
    %1106 = arith.mulf %55, %1101 : vector<1x128xf32>
    %1107 = arith.addf %1105, %1106 : vector<1x128xf32>
    %1108 = arith.mulf %56, %1102 : vector<1x128xf32>
    %1109 = arith.addf %1107, %1108 : vector<1x128xf32>
    %1110 = arith.mulf %57, %1099 : vector<1x128xf32>
    %1111 = arith.mulf %58, %1100 : vector<1x128xf32>
    %1112 = arith.addf %1110, %1111 : vector<1x128xf32>
    %1113 = arith.mulf %59, %1101 : vector<1x128xf32>
    %1114 = arith.addf %1112, %1113 : vector<1x128xf32>
    %1115 = arith.mulf %60, %1102 : vector<1x128xf32>
    %1116 = arith.addf %1114, %1115 : vector<1x128xf32>
    %1117 = arith.mulf %61, %1099 : vector<1x128xf32>
    %1118 = arith.mulf %62, %1100 : vector<1x128xf32>
    %1119 = arith.addf %1117, %1118 : vector<1x128xf32>
    %1120 = arith.mulf %63, %1101 : vector<1x128xf32>
    %1121 = arith.addf %1119, %1120 : vector<1x128xf32>
    %1122 = arith.mulf %64, %1102 : vector<1x128xf32>
    %1123 = arith.addf %1121, %1122 : vector<1x128xf32>
    %1124 = arith.mulf %65, %1099 : vector<1x128xf32>
    %1125 = arith.mulf %66, %1100 : vector<1x128xf32>
    %1126 = arith.addf %1124, %1125 : vector<1x128xf32>
    %1127 = arith.mulf %67, %1101 : vector<1x128xf32>
    %1128 = arith.addf %1126, %1127 : vector<1x128xf32>
    %1129 = arith.mulf %68, %1102 : vector<1x128xf32>
    %1130 = arith.addf %1128, %1129 : vector<1x128xf32>
    %1131 = arith.mulf %1109, %1109 : vector<1x128xf32>
    %1132 = arith.mulf %1116, %1116 : vector<1x128xf32>
    %1133 = arith.addf %1131, %1132 : vector<1x128xf32>
    %1134 = arith.mulf %1123, %1123 : vector<1x128xf32>
    %1135 = arith.addf %1133, %1134 : vector<1x128xf32>
    %1136 = arith.mulf %1130, %1130 : vector<1x128xf32>
    %1137 = arith.addf %1135, %1136 : vector<1x128xf32>
    %cst_35 = arith.constant 1.000000e-30 : f32
    %1138 = vector.broadcast %cst_35 : f32 to vector<1x128xf32>
    %1139 = arith.maximumf %1137, %1138 : vector<1x128xf32>
    %1140 = math.rsqrt %1139 : vector<1x128xf32>
    %1141 = arith.mulf %1109, %1140 : vector<1x128xf32>
    %1142 = arith.mulf %1116, %1140 : vector<1x128xf32>
    %1143 = arith.mulf %1123, %1140 : vector<1x128xf32>
    %1144 = arith.mulf %1130, %1140 : vector<1x128xf32>
    %1145 = arith.mulf %53, %1141 : vector<1x128xf32>
    %1146 = arith.mulf %54, %1142 : vector<1x128xf32>
    %1147 = arith.addf %1145, %1146 : vector<1x128xf32>
    %1148 = arith.mulf %55, %1143 : vector<1x128xf32>
    %1149 = arith.addf %1147, %1148 : vector<1x128xf32>
    %1150 = arith.mulf %56, %1144 : vector<1x128xf32>
    %1151 = arith.addf %1149, %1150 : vector<1x128xf32>
    %1152 = arith.mulf %57, %1141 : vector<1x128xf32>
    %1153 = arith.mulf %58, %1142 : vector<1x128xf32>
    %1154 = arith.addf %1152, %1153 : vector<1x128xf32>
    %1155 = arith.mulf %59, %1143 : vector<1x128xf32>
    %1156 = arith.addf %1154, %1155 : vector<1x128xf32>
    %1157 = arith.mulf %60, %1144 : vector<1x128xf32>
    %1158 = arith.addf %1156, %1157 : vector<1x128xf32>
    %1159 = arith.mulf %61, %1141 : vector<1x128xf32>
    %1160 = arith.mulf %62, %1142 : vector<1x128xf32>
    %1161 = arith.addf %1159, %1160 : vector<1x128xf32>
    %1162 = arith.mulf %63, %1143 : vector<1x128xf32>
    %1163 = arith.addf %1161, %1162 : vector<1x128xf32>
    %1164 = arith.mulf %64, %1144 : vector<1x128xf32>
    %1165 = arith.addf %1163, %1164 : vector<1x128xf32>
    %1166 = arith.mulf %65, %1141 : vector<1x128xf32>
    %1167 = arith.mulf %66, %1142 : vector<1x128xf32>
    %1168 = arith.addf %1166, %1167 : vector<1x128xf32>
    %1169 = arith.mulf %67, %1143 : vector<1x128xf32>
    %1170 = arith.addf %1168, %1169 : vector<1x128xf32>
    %1171 = arith.mulf %68, %1144 : vector<1x128xf32>
    %1172 = arith.addf %1170, %1171 : vector<1x128xf32>
    %1173 = arith.mulf %1151, %1151 : vector<1x128xf32>
    %1174 = arith.mulf %1158, %1158 : vector<1x128xf32>
    %1175 = arith.addf %1173, %1174 : vector<1x128xf32>
    %1176 = arith.mulf %1165, %1165 : vector<1x128xf32>
    %1177 = arith.addf %1175, %1176 : vector<1x128xf32>
    %1178 = arith.mulf %1172, %1172 : vector<1x128xf32>
    %1179 = arith.addf %1177, %1178 : vector<1x128xf32>
    %cst_36 = arith.constant 1.000000e-30 : f32
    %1180 = vector.broadcast %cst_36 : f32 to vector<1x128xf32>
    %1181 = arith.maximumf %1179, %1180 : vector<1x128xf32>
    %1182 = math.rsqrt %1181 : vector<1x128xf32>
    %1183 = arith.mulf %1151, %1182 : vector<1x128xf32>
    %1184 = arith.mulf %1158, %1182 : vector<1x128xf32>
    %1185 = arith.mulf %1165, %1182 : vector<1x128xf32>
    %1186 = arith.mulf %1172, %1182 : vector<1x128xf32>
    %1187 = arith.mulf %53, %1183 : vector<1x128xf32>
    %1188 = arith.mulf %54, %1184 : vector<1x128xf32>
    %1189 = arith.addf %1187, %1188 : vector<1x128xf32>
    %1190 = arith.mulf %55, %1185 : vector<1x128xf32>
    %1191 = arith.addf %1189, %1190 : vector<1x128xf32>
    %1192 = arith.mulf %56, %1186 : vector<1x128xf32>
    %1193 = arith.addf %1191, %1192 : vector<1x128xf32>
    %1194 = arith.mulf %57, %1183 : vector<1x128xf32>
    %1195 = arith.mulf %58, %1184 : vector<1x128xf32>
    %1196 = arith.addf %1194, %1195 : vector<1x128xf32>
    %1197 = arith.mulf %59, %1185 : vector<1x128xf32>
    %1198 = arith.addf %1196, %1197 : vector<1x128xf32>
    %1199 = arith.mulf %60, %1186 : vector<1x128xf32>
    %1200 = arith.addf %1198, %1199 : vector<1x128xf32>
    %1201 = arith.mulf %61, %1183 : vector<1x128xf32>
    %1202 = arith.mulf %62, %1184 : vector<1x128xf32>
    %1203 = arith.addf %1201, %1202 : vector<1x128xf32>
    %1204 = arith.mulf %63, %1185 : vector<1x128xf32>
    %1205 = arith.addf %1203, %1204 : vector<1x128xf32>
    %1206 = arith.mulf %64, %1186 : vector<1x128xf32>
    %1207 = arith.addf %1205, %1206 : vector<1x128xf32>
    %1208 = arith.mulf %65, %1183 : vector<1x128xf32>
    %1209 = arith.mulf %66, %1184 : vector<1x128xf32>
    %1210 = arith.addf %1208, %1209 : vector<1x128xf32>
    %1211 = arith.mulf %67, %1185 : vector<1x128xf32>
    %1212 = arith.addf %1210, %1211 : vector<1x128xf32>
    %1213 = arith.mulf %68, %1186 : vector<1x128xf32>
    %1214 = arith.addf %1212, %1213 : vector<1x128xf32>
    %1215 = arith.mulf %1193, %1193 : vector<1x128xf32>
    %1216 = arith.mulf %1200, %1200 : vector<1x128xf32>
    %1217 = arith.addf %1215, %1216 : vector<1x128xf32>
    %1218 = arith.mulf %1207, %1207 : vector<1x128xf32>
    %1219 = arith.addf %1217, %1218 : vector<1x128xf32>
    %1220 = arith.mulf %1214, %1214 : vector<1x128xf32>
    %1221 = arith.addf %1219, %1220 : vector<1x128xf32>
    %cst_37 = arith.constant 1.000000e-30 : f32
    %1222 = vector.broadcast %cst_37 : f32 to vector<1x128xf32>
    %1223 = arith.maximumf %1221, %1222 : vector<1x128xf32>
    %1224 = math.rsqrt %1223 : vector<1x128xf32>
    %1225 = arith.mulf %1193, %1224 : vector<1x128xf32>
    %1226 = arith.mulf %1200, %1224 : vector<1x128xf32>
    %1227 = arith.mulf %1207, %1224 : vector<1x128xf32>
    %1228 = arith.mulf %1214, %1224 : vector<1x128xf32>
    %1229 = vector.broadcast %1225 : vector<1x128xf32> to vector<10x128xf32>
    %1230 = arith.mulf %13, %1229 : vector<10x128xf32>
    %1231 = vector.broadcast %1226 : vector<1x128xf32> to vector<10x128xf32>
    %1232 = arith.mulf %14, %1231 : vector<10x128xf32>
    %1233 = arith.addf %1230, %1232 : vector<10x128xf32>
    %1234 = vector.broadcast %1227 : vector<1x128xf32> to vector<10x128xf32>
    %1235 = arith.mulf %15, %1234 : vector<10x128xf32>
    %1236 = arith.addf %1233, %1235 : vector<10x128xf32>
    %1237 = vector.broadcast %1228 : vector<1x128xf32> to vector<10x128xf32>
    %1238 = arith.mulf %16, %1237 : vector<10x128xf32>
    %1239 = arith.addf %1236, %1238 : vector<10x128xf32>
    %1240 = arith.mulf %1239, %1239 : vector<10x128xf32>
    %cst_38 = arith.constant dense<0.000000e+00> : vector<128xf32>
    %1241 = vector.multi_reduction <add>, %1240, %cst_38 [0] : vector<10x128xf32> to vector<128xf32>
    %1242 = vector.shape_cast %1241 : vector<128xf32> to vector<1x128xf32>
    %cst_39 = arith.constant 1.000000e-30 : f32
    %1243 = vector.broadcast %cst_39 : f32 to vector<1x128xf32>
    %1244 = arith.maximumf %1242, %1243 : vector<1x128xf32>
    %1245 = math.rsqrt %1244 : vector<1x128xf32>
    %1246 = vector.broadcast %1245 : vector<1x128xf32> to vector<10x128xf32>
    %1247 = arith.mulf %1239, %1246 : vector<10x128xf32>
    %c0_40 = arith.constant 0 : index
    %c0_41 = arith.constant 0 : index
    %1248 = vector.load %arg4[%c0_40, %c0_41] : memref<10x128xf32, #tpu.memory_space<vmem>>, vector<10x128xf32>
    tpu.vector_store %arg4[%c0_40, %c0_41], %1247 {strides = array<i32>} : memref<10x128xf32, #tpu.memory_space<vmem>>, vector<10x128xf32>,
    %1249 = arith.truncf %1247 : vector<10x128xf32> to vector<10x128xbf16>
    %cst_42 = arith.constant dense<0.000000e+00> : vector<128x361xf32>
    %1250 = tpu.matmul %1249, %2, %cst_42 {dimension_numbers = #tpu.dot_dimension_numbers<[0], [0], [1], [1], [0, 1, 1, 1], [], []>} : vector<10x128xbf16>, vector<10x361xbf16>, vector<128x361xf32> -> vector<128x361xf32>
    %c0_43 = arith.constant 0 : index
    %c0_44 = arith.constant 0 : index
    %1251 = vector.load %arg3[%c0_43, %c0_44] : memref<128x361xf32, #tpu.memory_space<vmem>>, vector<128x361xf32>
    tpu.vector_store %arg3[%c0_43, %c0_44], %1250 {strides = array<i32>} : memref<128x361xf32, #tpu.memory_space<vmem>>, vector<128x361xf32>,
    return
  }
  func.func @transform_0(%arg0: i32) -> (i32, i32, i32) {
    %c0_i32 = arith.constant 0 : i32
    %c0_i32_0 = arith.constant 0 : i32
    %c0_i32_1 = arith.constant 0 : i32
    return %c0_i32, %arg0, %c0_i32_0 : i32, i32, i32
  }
  func.func @transform_1(%arg0: i32) -> (i32, i32) {
    %c0_i32 = arith.constant 0 : i32
    %c0_i32_0 = arith.constant 0 : i32
    %c0_i32_1 = arith.constant 0 : i32
    return %c0_i32, %c0_i32_0 : i32, i32
  }
  func.func @transform_2(%arg0: i32) -> (i32, i32) {
    %c0_i32 = arith.constant 0 : i32
    %c0_i32_0 = arith.constant 0 : i32
    return %arg0, %c0_i32 : i32, i32
  }
  func.func @transform_3(%arg0: i32) -> (i32, i32) {
    %c0_i32 = arith.constant 0 : i32
    %c0_i32_0 = arith.constant 0 : i32
    return %c0_i32, %arg0 : i32, i32
  }
}

</mosaic_0001>

<bundles_post_ra>
// kernel: pca_template_map.1
= control target key start
LH: loop header
LB: loop body
LE: loop exit
PB: predicated region body
PF: predicated region fallthrough
CT: control target
= control target key end

     0   :  { %vm641_vm0 = vcmask 859136   ;;  %vm927_vm1 = vcmask 1041408   ;;  %s4537_s0 = inlined_call_operand.vmem [shape: bf16[4,128,361], index: 0, kind: input, shape index: {}]   ;;  %s4538_s1 = inlined_call_operand.vmem [shape: bf16[10,361], index: 1, kind: input, shape index: {}]   ;;  %s4539_s3 = inlined_call_operand.vmem [shape: f32[10,128], index: 3, kind: output, shape index: {1}]   ;;  %s4540_s2 = inlined_call_operand.vmem [shape: f32[128,361], index: 2, kind: output, shape index: {0}]  }
   0x1   :  { %v2548_v0 = vld [vmem:[%s4537_s0 + $0xa8] sm:$0xf]  ;;  %v2896_v1 = vld [vmem:[%s4537_s0 + $0xb0] sm:$0xf0]  ;;  %v2895_v3 = vld [vmem:[%s4537_s0 + $0xac] sm:$0xf] }
   0x2   :  { %v2549_v2 = vor.u32 %v2896_v1, %v2548_v0  ;;  %v2550_v4 = vld [vmem:[%s4537_s0 + $0xb4] sm:$0xf0]  ;;  %v2536_v6 = vld [vmem:[%s4537_s0 + $0x90] sm:$0xf]  ;;  %v2893_v7 = vld [vmem:[%s4537_s0 + $0x98] sm:$0xf0] }
   0x3   :  { %v2553_v5 = vor.u32 %v2895_v3, %v2550_v4  ;;  %v2892_v8 = vld [vmem:[%s4537_s0 + $0x94] sm:$0xf]  ;;  %v2538_v9 = vld [vmem:[%s4537_s0 + $0x9c] sm:$0xf0]  ;;  %v2537_v10 = vor.u32 %v2893_v7, %v2536_v6  ;;  %v2556_v12 = vld [vmem:[%s4537_s0 + $0xb0] sm:$0xf] }
   0x4   :  { %741 = vmatpush.bf16.xpose.msra.mxu3 %v2549_v2  ;;  %v2541_v11 = vor.u32 %v2892_v8, %v2538_v9  ;;  %v2897_v13 = vld [vmem:[%s4537_s0 + $0xb8] sm:$0xf0]  ;;  %v2524_v14 = vld [vmem:[%s4537_s0 + $0x78] sm:$0xf]  ;;  %v2890_v15 = vld [vmem:[%s4537_s0 + $0x80] sm:$0xf0] }
   0x5   :  { %755 = vmatpush.bf16.xpose.msra.mxu1 %v2553_v5  ;;  %v2557_v16 = vor.u32 %v2897_v13, %v2556_v12  ;;  %v2889_v17 = vld [vmem:[%s4537_s0 + $0x7c] sm:$0xf]  ;;  %v2526_v18 = vld [vmem:[%s4537_s0 + $0x84] sm:$0xf0]  ;;  %v2525_v20 = vor.u32 %v2890_v15, %v2524_v14  ;;  %v2544_v22 = vld [vmem:[%s4537_s0 + $0x98] sm:$0xf] }
   0x6   :  { %v2529_v21 = vor.u32 %v2889_v17, %v2526_v18  ;;  %v2894_v23 = vld [vmem:[%s4537_s0 + $0xa0] sm:$0xf0]  ;;  %v2512_v24 = vld [vmem:[%s4537_s0 + $0x60] sm:$0xf]  ;;  %v2887_v25 = vld [vmem:[%s4537_s0 + $0x68] sm:$0xf0] }
   0x7   :  { %v667_v19 = vsel %vm641_vm0, %v2557_v16, 0  ;;  %v2545_v26 = vor.u32 %v2894_v23, %v2544_v22  ;;  %v2886_v27 = vld [vmem:[%s4537_s0 + $0x64] sm:$0xf]  ;;  %v2514_v28 = vld [vmem:[%s4537_s0 + $0x6c] sm:$0xf0]  ;;  %v2513_v30 = vor.u32 %v2887_v25, %v2512_v24 }
   0x8   :  { %769 = vmatpush.bf16.xpose.msra.mxu2 %v667_v19  ;;  %v2517_v31 = vor.u32 %v2886_v27, %v2514_v28  ;;  %v2500_v32 = vld [vmem:[%s4537_s0 + $0x48] sm:$0xf]  ;;  %v2884_v33 = vld [vmem:[%s4537_s0 + $0x50] sm:$0xf0]  ;;  %v2532_v34 = vld [vmem:[%s4537_s0 + $0x80] sm:$0xf] }
   0x9   :  { %v664_v29 = vsel %vm641_vm0, %v2545_v26, 0  ;;  %v2891_v35 = vld [vmem:[%s4537_s0 + $0x88] sm:$0xf0]  ;;  %v2502_v38 = vld [vmem:[%s4537_s0 + $0x54] sm:$0xf0]  ;;  %v2501_v42 = vor.u32 %v2884_v33, %v2500_v32 }
   0xa   :  { %v2919_v36 = vld [vmem:[%s4537_s0 + $0x16c] sm:$0xf]  ;;  %v2533_v39 = vor.u32 %v2891_v35, %v2532_v34  ;;  %v2646_v40 = vld [vmem:[%s4537_s0 + $0x174] sm:$0xf0]  ;;  %v2488_v45 = vld [vmem:[%s4537_s0 + $0x30] sm:$0xf] }
   0xb   :  { %v2883_v37 = vld [vmem:[%s4537_s0 + $0x4c] sm:$0xf]  ;;  %v2649_v41 = vor.u32 %v2919_v36, %v2646_v40  ;;  %v2881_v46 = vld [vmem:[%s4537_s0 + $0x38] sm:$0xf0]  ;;  %v2520_v47 = vld [vmem:[%s4537_s0 + $0x68] sm:$0xf] }
   0xc   :  { %742 = vmatpush.bf16.xpose.msra.mxu3 %v2537_v10  ;;  %v661_v43 = vsel %vm641_vm0, %v2533_v39, 0  ;;  %v2505_v44 = vor.u32 %v2883_v37, %v2502_v38  ;;  %v2888_v48 = vld [vmem:[%s4537_s0 + $0x70] sm:$0xf0]  ;;  %v2490_v51 = vld [vmem:[%s4537_s0 + $0x3c] sm:$0xf0]  ;;  %v2489_v55 = vor.u32 %v2881_v46, %v2488_v45 }
   0xd   :  { %756 = vmatpush.bf16.xpose.msra.mxu1 %v2541_v11  ;;  %797 = vmatpush.bf16.xpose.msra.mxu0 %v2649_v41  ;;  %v2916_v49 = vld [vmem:[%s4537_s0 + $0x154] sm:$0xf]  ;;  %v2521_v52 = vor.u32 %v2888_v48, %v2520_v47  ;;  %v2634_v53 = vld [vmem:[%s4537_s0 + $0x15c] sm:$0xf0]  ;;  %v2476_v58 = vld [vmem:[%s4537_s0 + $0x18] sm:$0xf] }
   0xe   :  { %v2880_v50 = vld [vmem:[%s4537_s0 + $0x34] sm:$0xf]  ;;  %v2637_v54 = vor.u32 %v2916_v49, %v2634_v53  ;;  %v2878_v59 = vld [vmem:[%s4537_s0 + $0x20] sm:$0xf0]  ;;  %v2508_v60 = vld [vmem:[%s4537_s0 + $0x50] sm:$0xf] }
   0xf   :  { %v658_v56 = vsel %vm641_vm0, %v2521_v52, 0  ;;  %v2493_v57 = vor.u32 %v2880_v50, %v2490_v51  ;;  %v2885_v61 = vld [vmem:[%s4537_s0 + $0x58] sm:$0xf0]  ;;  %v2478_v0 = vld [vmem:[%s4537_s0 + $0x24] sm:$0xf0]  ;;  %v2477_v4 = vor.u32 %v2878_v59, %v2476_v58 }
  0x10   :  { %770 = vmatpush.bf16.xpose.msra.mxu2 %v664_v29  ;;  %v2913_v62 = vld [vmem:[%s4537_s0 + $0x13c] sm:$0xf]  ;;  %v2509_v1 = vor.u32 %v2885_v61, %v2508_v60  ;;  %v2622_v2 = vld [vmem:[%s4537_s0 + $0x144] sm:$0xf0]  ;;  %v2464_v7 = vld [vmem:[%s4537_s0] sm:$0xf] }
  0x11   :  { %v2877_v63 = vld [vmem:[%s4537_s0 + $0x1c] sm:$0xf]  ;;  %v2625_v3 = vor.u32 %v2913_v62, %v2622_v2  ;;  %v2875_v8 = vld [vmem:[%s4537_s0 + $0x8] sm:$0xf0]  ;;  %v2644_v9 = vld [vmem:[%s4537_s0 + $0x168] sm:$0xf] }
  0x12   :  { %v655_v5 = vsel %vm641_vm0, %v2509_v1, 0  ;;  %v2481_v6 = vor.u32 %v2877_v63, %v2478_v0  ;;  %v2920_v10 = vld [vmem:[%s4537_s0 + $0x170] sm:$0xf0]  ;;  %v2652_v11 = vld [vmem:[%s4537_s0 + $0x170] sm:$0xf]  ;;  %v2465_v22 = vor.u32 %v2875_v8, %v2464_v7 }
  0x13   :  { %v2921_v12 = vld [vmem:[%s4537_s0 + $0x178] sm:$0xf0]  ;;  %v2496_v13 = vld [vmem:[%s4537_s0 + $0x38] sm:$0xf]  ;;  %v2882_v14 = vld [vmem:[%s4537_s0 + $0x40] sm:$0xf0]  ;;  %v2645_v24 = vor.u32 %v2920_v10, %v2644_v9 }
  0x14   :  { %743 = vmatpush.bf16.xpose.msra.mxu3 %v2525_v20  ;;  %v2910_v15 = vld [vmem:[%s4537_s0 + $0x124] sm:$0xf]  ;;  %v2466_v17 = vld [vmem:[%s4537_s0 + $0xc] sm:$0xf0]  ;;  %v2497_v18 = vor.u32 %v2882_v14, %v2496_v13  ;;  %v2653_v20 = vor.u32 %v2921_v12, %v2652_v11  ;;  %v2640_v27 = vld [vmem:[%s4537_s0 + $0x158] sm:$0xf] }
  0x15   :  { %757 = vmatpush.bf16.xpose.msra.mxu1 %v2529_v21  ;;  %798 = vmatpush.bf16.xpose.msra.mxu0 %v2637_v54  ;;  %v2874_v16 = vld [vmem:[%s4537_s0 + $0x4] sm:$0xf]  ;;  %v2610_v19 = vld [vmem:[%s4537_s0 + $0x12c] sm:$0xf0]  ;;  %v2484_v29 = vld [vmem:[%s4537_s0 + $0x20] sm:$0xf] }
  0x16   :  { %v2613_v21 = vor.u32 %v2910_v15, %v2610_v19  ;;  %v652_v23 = vsel %vm641_vm0, %v2497_v18, 0  ;;  %v2469_v25 = vor.u32 %v2874_v16, %v2466_v17  ;;  %v691_v26 = vsel %vm641_vm0, %v2653_v20, 0  ;;  %v2918_v28 = vld [vmem:[%s4537_s0 + $0x160] sm:$0xf0]  ;;  %v2632_v32 = vld [vmem:[%s4537_s0 + $0x150] sm:$0xf] }
  0x17   :  { %v2917_v33 = vld [vmem:[%s4537_s0 + $0x158] sm:$0xf0]  ;;  %v2598_v35 = vld [vmem:[%s4537_s0 + $0x114] sm:$0xf0]  ;;  %v2641_v36 = vor.u32 %v2918_v28, %v2640_v27  ;;  %v2472_v45 = vld [vmem:[%s4537_s0 + $0x8] sm:$0xf] }
  0x18   :  { %771 = vmatpush.bf16.xpose.msra.mxu2 %v661_v43  ;;  %v2633_v39 = vor.u32 %v2917_v33, %v2632_v32  ;;  %v2620_v41 = vld [vmem:[%s4537_s0 + $0x138] sm:$0xf]  ;;  %v2628_v43 = vld [vmem:[%s4537_s0 + $0x140] sm:$0xf]  ;;  %v2876_v46 = vld [vmem:[%s4537_s0 + $0x10] sm:$0xf0] }
  0x19   :  { %v688_v40 = vsel %vm641_vm0, %v2641_v36, 0  ;;  %v2904_v47 = vld [vmem:[%s4537_s0 + $0xf4] sm:$0xf]  ;;  %v2473_v48 = vor.u32 %v2876_v46, %v2472_v45  ;;  %v2586_v49 = vld [vmem:[%s4537_s0 + $0xfc] sm:$0xf0] }
  0x1a   :  { %v2452_v50 = vld [vmem:[%s4538_s1] sm:$0xf]  ;;  %v2971_v51 = vld [vmem:[%s4538_s1 + $0x8] sm:$0x10]  ;;  %v2589_v53 = vor.u32 %v2904_v47, %v2586_v49  ;;  %v2616_v63 = vld [vmem:[%s4537_s0 + $0x128] sm:$0xf] }
  0x1b   :  { %v3267_v54 = vor.u32 %v2971_v51, %v2452_v50  ;;  %v2608_v61 = vld [vmem:[%s4537_s0 + $0x120] sm:$0xf]  ;;  %v2911_v62 = vld [vmem:[%s4537_s0 + $0x128] sm:$0xf0]  ;;  %v2912_v0 = vld [vmem:[%s4537_s0 + $0x130] sm:$0xf0] }
  0x1c   :  { %744 = vmatpush.bf16.xpose.msra.mxu3 %v2513_v30  ;;  %v2879_v30 = vld [vmem:[%s4537_s0 + $0x28] sm:$0xf0]  ;;  %v2460_v1 = vld [vmem:[%s4538_s1 + $0x8] sm:$0xf]  ;;  %v2972_v2 = vld [vmem:[%s4538_s1 + $0x10] sm:$0x10]  ;;  %v2617_v8 = vor.u32 %v2912_v0, %v2616_v63  ;;  %v2609_v14 = vor.u32 %v2911_v62, %v2608_v61 }
  0x1d   :  { %758 = vmatpush.bf16.xpose.msra.mxu1 %v2517_v31  ;;  %799 = vmatpush.bf16.xpose.msra.mxu0 %v2625_v3  ;;  %v2907_v31 = vld [vmem:[%s4537_s0 + $0x10c] sm:$0xf]  ;;  %v2485_v34 = vor.u32 %v2879_v30, %v2484_v29  ;;  %v2901_v3 = vld [vmem:[%s4537_s0 + $0xdc] sm:$0xf]  ;;  %v2454_v7 = vld [vmem:[%s4538_s1 + $0xc] sm:$0x10] }
  0x1e   :  { %v2601_v37 = vor.u32 %v2907_v31, %v2598_v35  ;;  %v2728_v11 = vld [vmem:[%s4537_s0 + $0x210] sm:$0xf]  ;;  %v2941_v12 = vld [vmem:[%s4537_s0 + $0x218] sm:$0xf0]  ;;  %v682_v15 = vsel %vm641_vm0, %v2617_v8, 0 }
  0x1f   :  { %v649_v38 = vsel %vm641_vm0, %v2485_v34, 0  ;;  %v2729_v13 = vor.u32 %v2941_v12, %v2728_v11  ;;  %v2604_v16 = vld [vmem:[%s4537_s0 + $0x110] sm:$0xf]  ;;  %v2909_v17 = vld [vmem:[%s4537_s0 + $0x118] sm:$0xf0] }
  0x20   :  { %772 = vmatpush.bf16.xpose.msra.mxu2 %v658_v56  ;;  %v2944_v56 = vld [vmem:[%s4537_s0 + $0x230] sm:$0xf0]  ;;  %v2596_v18 = vld [vmem:[%s4537_s0 + $0x108] sm:$0xf]  ;;  %v2898_v20 = vld [vmem:[%s4537_s0 + $0xc4] sm:$0xf] }
  0x21   :  { %v2908_v19 = vld [vmem:[%s4537_s0 + $0x110] sm:$0xf0]  ;;  %v2748_v28 = vld [vmem:[%s4537_s0 + $0x230] sm:$0xf]  ;;  %v2945_v29 = vld [vmem:[%s4537_s0 + $0x238] sm:$0xf0] }
  0x22   :  { %v2749_v31 = vor.u32 %v2945_v29, %v2748_v28  ;;  %v2592_v32 = vld [vmem:[%s4537_s0 + $0xf8] sm:$0xf]  ;;  %v2906_v33 = vld [vmem:[%s4537_s0 + $0x100] sm:$0xf0]  ;;  %v2584_v34 = vld [vmem:[%s4537_s0 + $0xf0] sm:$0xf] }
  0x23   :  { %v2905_v36 = vld [vmem:[%s4537_s0 + $0xf8] sm:$0xf0]  ;;  %v2580_v46 = vld [vmem:[%s4537_s0 + $0xe0] sm:$0xf]  ;;  %v2903_v47 = vld [vmem:[%s4537_s0 + $0xe8] sm:$0xf0] }
  0x24   :  { %745 = vmatpush.bf16.xpose.msra.mxu3 %v2501_v42  ;;  %v2914_v42 = vld [vmem:[%s4537_s0 + $0x140] sm:$0xf0]  ;;  %v715_v35 = vsel %vm641_vm0, %v2749_v31, 0  ;;  %v2692_v51 = vld [vmem:[%s4537_s0 + $0x1c8] sm:$0xf] }
  0x25   :  { %759 = vmatpush.bf16.xpose.msra.mxu1 %v2505_v44  ;;  %800 = vmatpush.bf16.xpose.msra.mxu0 %v2613_v21  ;;  %v2915_v44 = vld [vmem:[%s4537_s0 + $0x148] sm:$0xf0]  ;;  %v2621_v59 = vor.u32 %v2914_v42, %v2620_v41  ;;  %v2562_v21 = vld [vmem:[%s4537_s0 + $0xcc] sm:$0xf0]  ;;  %v2585_v41 = vor.u32 %v2905_v36, %v2584_v34  ;;  %v2736_v42 = vld [vmem:[%s4537_s0 + $0x218] sm:$0xf] }
  0x26   :  { %v2629_v52 = vor.u32 %v2915_v44, %v2628_v43  ;;  %v2942_v43 = vld [vmem:[%s4537_s0 + $0x220] sm:$0xf0]  ;;  %v2568_v61 = vld [vmem:[%s4537_s0 + $0xc8] sm:$0xf]  ;;  %v2900_v62 = vld [vmem:[%s4537_s0 + $0xd0] sm:$0xf0] }
  0x27   :  { %v2737_v45 = vor.u32 %v2942_v43, %v2736_v42  ;;  %v2902_v50 = vld [vmem:[%s4537_s0 + $0xe0] sm:$0xf0]  ;;  %v2560_v63 = vld [vmem:[%s4537_s0 + $0xc0] sm:$0xf]  ;;  %v2712_v12 = vld [vmem:[%s4537_s0 + $0x1e8] sm:$0xf] }
  0x28   :  { %773 = vmatpush.bf16.xpose.msra.mxu2 %v655_v5  ;;  %v685_v60 = vsel %vm641_vm0, %v2629_v52, 0  ;;  %v2574_v5 = vld [vmem:[%s4537_s0 + $0xe4] sm:$0xf0]  ;;  %v2932_v52 = vld [vmem:[%s4537_s0 + $0x1d0] sm:$0xf0] }
  0x29   :  { %v2577_v9 = vor.u32 %v2901_v3, %v2574_v5  ;;  %v712_v49 = vsel %vm641_vm0, %v2737_v45, 0  ;;  %v2929_v3 = vld [vmem:[%s4537_s0 + $0x1b8] sm:$0xf0]  ;;  %v2943_v5 = vld [vmem:[%s4537_s0 + $0x22c] sm:$0xf] }
  0x2a   :  { %v2923_v28 = vld [vmem:[%s4537_s0 + $0x188] sm:$0xf0]  ;;  %v2718_v31 = vld [vmem:[%s4537_s0 + $0x204] sm:$0xf0]  ;;  %v2688_v36 = vld [vmem:[%s4537_s0 + $0x1b8] sm:$0xf] }
  0x2b   :  { %v2967_v29 = vld [vmem:[%s4537_s0 + $0x2ec] sm:$0xf]  ;;  %v2964_v42 = vld [vmem:[%s4537_s0 + $0x2d4] sm:$0xf]  ;;  %v2934_v43 = vld [vmem:[%s4537_s0 + $0x1e4] sm:$0xf] }
  0x2c   :  { %746 = vmatpush.bf16.xpose.msra.mxu3 %v2489_v55  ;;  %v2740_v55 = vld [vmem:[%s4537_s0 + $0x228] sm:$0xf] }
  0x2d   :  { %760 = vmatpush.bf16.xpose.msra.mxu1 %v2493_v57  ;;  %801 = vmatpush.bf16.xpose.msra.mxu0 %v2601_v37  ;;  %v646_v57 = vsel %vm641_vm0, %v2473_v48, 0  ;;  %v2741_v58 = vor.u32 %v2944_v56, %v2740_v55  ;;  %v2704_v37 = vld [vmem:[%s4537_s0 + $0x1e0] sm:$0xf]  ;;  %v2572_v48 = vld [vmem:[%s4537_s0 + $0xd8] sm:$0xf]  ;;  %v2693_v55 = vor.u32 %v2932_v52, %v2692_v51 }
  0x2e   :  { %v2573_v56 = vor.u32 %v2902_v50, %v2572_v48  ;;  %v2927_v50 = vld [vmem:[%s4537_s0 + $0x1a8] sm:$0xf0] }
  0x30   :  { %774 = vmatpush.bf16.xpose.msra.mxu2 %v652_v23  ;;  %v2565_v23 = vor.u32 %v2898_v20, %v2562_v21  ;;  %v2730_v20 = vld [vmem:[%s4537_s0 + $0x21c] sm:$0xf0] }
  0x34   :  { %747 = vmatpush.bf16.xpose.msra.mxu3 %v2477_v4  ;;  %v3299_v4 = vor.u32 %v2972_v2, %v2460_v1  ;;  %v2899_v1 = vld [vmem:[%s4537_s0 + $0xc8] sm:$0xf0]  ;;  %v2680_v2 = vld [vmem:[%s4537_s0 + $0x1b0] sm:$0xf] }
  0x35   :  { %761 = vmatpush.bf16.xpose.msra.mxu1 %v2481_v6  ;;  %802 = vmatpush.bf16.xpose.msra.mxu0 %v2589_v53  ;;  %v2970_v6 = vld [vmem:[%s4538_s1 + $0x4] sm:$0xf]  ;;  %v2581_v53 = vor.u32 %v2903_v47, %v2580_v46  ;;  %v2681_v8 = vor.u32 %v2929_v3, %v2680_v2  ;;  %v2826_v46 = vld [vmem:[%s4537_s0 + $0x2dc] sm:$0xf0]  ;;  %v2928_v2 = vld [vmem:[%s4537_s0 + $0x1b4] sm:$0xf] }
  0x36   :  { %v3310_v10 = vor.u32 %v2970_v6, %v2454_v7  ;;  %v2742_v6 = vld [vmem:[%s4537_s0 + $0x234] sm:$0xf0]  ;;  %v2569_v7 = vor.u32 %v2900_v62, %v2568_v61  ;;  %v2829_v47 = vor.u32 %v2964_v42, %v2826_v46  ;;  %v2814_v61 = vld [vmem:[%s4537_s0 + $0x2c4] sm:$0xf0]  ;;  %v2682_v3 = vld [vmem:[%s4537_s0 + $0x1bc] sm:$0xf0] }
  0x37   :  { %v2745_v11 = vor.u32 %v2943_v5, %v2742_v6  ;;  %v2664_v62 = vld [vmem:[%s4537_s0 + $0x188] sm:$0xf]  ;;  %v2812_v6 = vld [vmem:[%s4537_s0 + $0x2b8] sm:$0xf]  ;;  %v2820_v46 = vld [vmem:[%s4537_s0 + $0x2c0] sm:$0xf] }
  0x38   :  { %775 = vmatpush.bf16.xpose.msra.mxu2 %v649_v38  ;;  %v2935_v38 = vld [vmem:[%s4537_s0 + $0x1e8] sm:$0xf0] }
  0x3c   :  { %748 = vmatpush.bf16.xpose.msra.mxu3 %v2465_v22  ;;  %v2605_v22 = vor.u32 %v2909_v17, %v2604_v16  ;;  %v2668_v17 = vld [vmem:[%s4537_s0 + $0x198] sm:$0xf] }
  0x3d   :  { %762 = vmatpush.bf16.xpose.msra.mxu1 %v2469_v25  ;;  %803 = vmatpush.bf16.xpose.msra.mxu0 %v2577_v9  ;;  %v2716_v25 = vld [vmem:[%s4537_s0 + $0x1f8] sm:$0xf]  ;;  %v2561_v9 = vor.u32 %v2899_v1, %v2560_v63 }
  0x3e   :  { %v679_v30 = vsel %vm641_vm0, %v2605_v22, 0 }
  0x40   :  { %776 = vmatpush.bf16.xpose.msra.mxu2 %v646_v57  ;;  %v2724_v57 = vld [vmem:[%s4537_s0 + $0x200] sm:$0xf] }
  0x43   :  { %749 = vmatmul.bf16.vlgmr.msra.gmra.mxu3 %v3267_v54 }
  0x44   :  { %783 = vmatpush.bf16.xpose.msrb.mxu3 %v2645_v24  ;;  %763 = vmatmul.bf16.vlgmr.msra.gmra.mxu1 %v3310_v10  ;;  %v2597_v24 = vor.u32 %v2908_v19, %v2596_v18  ;;  %v2926_v18 = vld [vmem:[%s4537_s0 + $0x1a0] sm:$0xf0]  ;;  %v2940_v19 = vld [vmem:[%s4537_s0 + $0x214] sm:$0xf] }
  0x45   :  { %811 = vmatpush.bf16.xpose.msrb.mxu1 %v691_v26  ;;  %804 = vmatpush.bf16.xpose.msra.mxu0 %v2565_v23  ;;  %v2938_v26 = vld [vmem:[%s4537_s0 + $0x200] sm:$0xf0]  ;;  %v2669_v21 = vor.u32 %v2926_v18, %v2668_v17  ;;  %v2733_v22 = vor.u32 %v2940_v19, %v2730_v20  ;;  %v2700_v23 = vld [vmem:[%s4537_s0 + $0x1d0] sm:$0xf]  ;;  %v2959_v17 = vld [vmem:[%s4537_s0 + $0x2a8] sm:$0xf0] }
  0x46   :  { %v2717_v27 = vor.u32 %v2938_v26, %v2716_v25  ;;  %v2955_v18 = vld [vmem:[%s4537_s0 + $0x28c] sm:$0xf]  ;;  %v2790_v20 = vld [vmem:[%s4537_s0 + $0x294] sm:$0xf0] }
  0x47   :  { %2846 = vmatmul.msk.bf16.vlgmr.msra.gmra.mxu2 %vm641_vm0, %v3299_v4 }
  0x48   :  { %825 = vmatpush.bf16.xpose.msrb.mxu2 %v2741_v58  ;;  %v2939_v58 = vld [vmem:[%s4537_s0 + $0x208] sm:$0xf0] }
  0x4c   :  { %784 = vmatpush.bf16.xpose.msrb.mxu3 %v2633_v39  ;;  %v2593_v39 = vor.u32 %v2906_v33, %v2592_v32  ;;  %805 = vmatmul.bf16.vlgmr.msra.gmra.mxu0 %v3310_v10  ;;  %v2838_v32 = vld [vmem:[%s4537_s0 + $0x2f4] sm:$0xf0] }
  0x4d   :  { %812 = vmatpush.bf16.xpose.msrb.mxu1 %v688_v40  ;;  %853 = vmatpush.bf16.xpose.msrb.mxu0 %v715_v35  ;;  %v2705_v40 = vor.u32 %v2935_v38, %v2704_v37  ;;  %v2841_v34 = vor.u32 %v2967_v29, %v2838_v32  ;;  %v2930_v37 = vld [vmem:[%s4537_s0 + $0x1c0] sm:$0xf0]  ;;  %v2952_v29 = vld [vmem:[%s4537_s0 + $0x274] sm:$0xf]  ;;  %v2778_v32 = vld [vmem:[%s4537_s0 + $0x27c] sm:$0xf0] }
  0x4e   :  { %v676_v44 = vsel %vm641_vm0, %v2593_v39, 0  ;;  %v2689_v38 = vor.u32 %v2930_v37, %v2688_v36  ;;  %v2832_v36 = vld [vmem:[%s4537_s0 + $0x2d8] sm:$0xf]  ;;  %v2966_v37 = vld [vmem:[%s4537_s0 + $0x2e0] sm:$0xf0] }
  0x50   :  { %826 = vmatpush.bf16.xpose.msrb.mxu2 %v2729_v13  ;;  %v2936_v13 = vld [vmem:[%s4537_s0 + $0x1f0] sm:$0xf0]  ;;  %v700_v39 = vsel %vm641_vm0, %v2689_v38, 0  ;;  %v2776_v38 = vld [vmem:[%s4537_s0 + $0x270] sm:$0xf] }
  0x54   :  { %785 = vmatpush.bf16.xpose.msrb.mxu3 %v2621_v59  ;;  %v673_v59 = vsel %vm641_vm0, %v2581_v53, 0  ;;  %v2931_v53 = vld [vmem:[%s4537_s0 + $0x1cc] sm:$0xf] }
  0x55   :  { %813 = vmatpush.bf16.xpose.msrb.mxu1 %v685_v60  ;;  %854 = vmatpush.bf16.xpose.msrb.mxu0 %v712_v49  ;;  %v2725_v60 = vor.u32 %v2939_v58, %v2724_v57  ;;  %v2676_v49 = vld [vmem:[%s4537_s0 + $0x1a0] sm:$0xf]  ;;  %v2965_v57 = vld [vmem:[%s4537_s0 + $0x2d8] sm:$0xf0] }
  0x56   :  { %v2677_v51 = vor.u32 %v2927_v50, %v2676_v49  ;;  %v2950_v49 = vld [vmem:[%s4537_s0 + $0x260] sm:$0xf0] }
  0x57   :  { %v709_v0 = vsel %vm641_vm0, %v2725_v60, 0  ;;  %v2961_v60 = vld [vmem:[%s4537_s0 + $0x2bc] sm:$0xf]  ;;  %v2946_v50 = vld [vmem:[%s4537_s0 + $0x244] sm:$0xf] }
  0x58   :  { %827 = vmatpush.bf16.xpose.msrb.mxu2 %v2717_v27  ;;  %v2656_v27 = vld [vmem:[%s4537_s0 + $0x180] sm:$0xf]  ;;  %v697_v52 = vsel %vm641_vm0, %v2677_v51, 0  ;;  %v2817_v63 = vor.u32 %v2961_v60, %v2814_v61  ;;  %v2947_v60 = vld [vmem:[%s4537_s0 + $0x248] sm:$0xf0] }
  0x59   :  { %v2657_v33 = vor.u32 %v2923_v28, %v2656_v27  ;;  %v2788_v27 = vld [vmem:[%s4537_s0 + $0x288] sm:$0xf]  ;;  %v2956_v28 = vld [vmem:[%s4537_s0 + $0x290] sm:$0xf0] }
  0x5c   :  { %786 = vmatpush.bf16.xpose.msrb.mxu3 %v2609_v14  ;;  %v670_v14 = vsel %vm641_vm0, %v2569_v7, 0  ;;  %v2962_v7 = vld [vmem:[%s4537_s0 + $0x2c0] sm:$0xf0] }
  0x5d   :  { %814 = vmatpush.bf16.xpose.msrb.mxu1 %v682_v15  ;;  %855 = vmatpush.bf16.xpose.msrb.mxu0 %v709_v0  ;;  %v2713_v15 = vor.u32 %v2936_v13, %v2712_v12  ;;  %v2924_v0 = vld [vmem:[%s4537_s0 + $0x190] sm:$0xf0]  ;;  %v2685_v13 = vor.u32 %v2928_v2, %v2682_v3 }
  0x5e   :  { %v2665_v1 = vor.u32 %v2924_v0, %v2664_v62  ;;  %v2796_v0 = vld [vmem:[%s4537_s0 + $0x290] sm:$0xf] }
  0x5f   :  { %v706_v16 = vsel %vm641_vm0, %v2713_v15, 0  ;;  %v2670_v15 = vld [vmem:[%s4537_s0 + $0x1a4] sm:$0xf0] }
  0x60   :  { %828 = vmatpush.bf16.xpose.msrb.mxu2 %v2705_v40  ;;  %v2836_v40 = vld [vmem:[%s4537_s0 + $0x2e8] sm:$0xf]  ;;  %v694_v5 = vsel %vm641_vm0, %v2665_v1, 0  ;;  %v2957_v1 = vld [vmem:[%s4537_s0 + $0x298] sm:$0xf0] }
  0x61   :  { %v2797_v2 = vor.u32 %v2957_v1, %v2796_v0 }
  0x63   :  { %v727_v3 = vsel %vm641_vm0, %v2797_v2, 0 }
  0x64   :  { %787 = vmatpush.bf16.xpose.msrb.mxu3 %v2597_v24  ;;  %v2933_v24 = vld [vmem:[%s4537_s0 + $0x1d8] sm:$0xf0] }
  0x65   :  { %815 = vmatpush.bf16.xpose.msrb.mxu1 %v679_v30  ;;  %856 = vmatpush.bf16.xpose.msrb.mxu0 %v706_v16  ;;  %v2701_v25 = vor.u32 %v2933_v24, %v2700_v23  ;;  %v2937_v30 = vld [vmem:[%s4537_s0 + $0x1fc] sm:$0xf]  ;;  %v2800_v16 = vld [vmem:[%s4537_s0 + $0x2a0] sm:$0xf]  ;;  %v2844_v23 = vld [vmem:[%s4537_s0 + $0x2f0] sm:$0xf] }
  0x66   :  { %v2721_v35 = vor.u32 %v2937_v30, %v2718_v31  ;;  %v2801_v19 = vor.u32 %v2959_v17, %v2800_v16  ;;  %v2969_v24 = vld [vmem:[%s4537_s0 + $0x2f8] sm:$0xf0]  ;;  %v2789_v31 = vor.u32 %v2956_v28, %v2788_v27 }
  0x67   :  { %v703_v26 = vsel %vm641_vm0, %v2701_v25, 0  ;;  %v2922_v25 = vld [vmem:[%s4537_s0 + $0x184] sm:$0xf]  ;;  %v2845_v30 = vor.u32 %v2969_v24, %v2844_v23 }
  0x68   :  { %829 = vmatpush.bf16.xpose.msrb.mxu2 %v2693_v55  ;;  %v2694_v55 = vld [vmem:[%s4537_s0 + $0x1d4] sm:$0xf0] }
  0x6c   :  { %788 = vmatpush.bf16.xpose.msrb.mxu3 %v2585_v41  ;;  %v2968_v41 = vld [vmem:[%s4537_s0 + $0x2f0] sm:$0xf0] }
  0x6d   :  { %816 = vmatpush.bf16.xpose.msrb.mxu1 %v676_v44  ;;  %857 = vmatpush.bf16.xpose.msrb.mxu0 %v703_v26  ;;  %v2706_v44 = vld [vmem:[%s4537_s0 + $0x1ec] sm:$0xf0]  ;;  %v2837_v45 = vor.u32 %v2968_v41, %v2836_v40  ;;  %v2949_v40 = vld [vmem:[%s4537_s0 + $0x25c] sm:$0xf]  ;;  %v2833_v41 = vor.u32 %v2966_v37, %v2832_v36 }
  0x6e   :  { %v2709_v48 = vor.u32 %v2934_v43, %v2706_v44  ;;  %v2658_v26 = vld [vmem:[%s4537_s0 + $0x18c] sm:$0xf0]  ;;  %v2766_v43 = vld [vmem:[%s4537_s0 + $0x264] sm:$0xf0] }
  0x6f   :  { %v2769_v44 = vor.u32 %v2949_v40, %v2766_v43 }
  0x70   :  { %830 = vmatpush.bf16.xpose.msrb.mxu2 %v2681_v8  ;;  %v2958_v8 = vld [vmem:[%s4537_s0 + $0x2a4] sm:$0xf] }
  0x74   :  { %789 = vmatpush.bf16.xpose.msrb.mxu3 %v2573_v56  ;;  %v2824_v56 = vld [vmem:[%s4537_s0 + $0x2d0] sm:$0xf] }
  0x75   :  { %817 = vmatpush.bf16.xpose.msrb.mxu1 %v673_v59  ;;  %858 = vmatpush.bf16.xpose.msrb.mxu0 %v700_v39  ;;  %v2825_v58 = vor.u32 %v2965_v57, %v2824_v56  ;;  %v2697_v59 = vor.u32 %v2931_v53, %v2694_v55  ;;  %v2953_v39 = vld [vmem:[%s4537_s0 + $0x278] sm:$0xf0]  ;;  %v2754_v53 = vld [vmem:[%s4537_s0 + $0x24c] sm:$0xf0]  ;;  %v2808_v57 = vld [vmem:[%s4537_s0 + $0x2a8] sm:$0xf] }
  0x76   :  { %v2777_v42 = vor.u32 %v2953_v39, %v2776_v38  ;;  %v2757_v55 = vor.u32 %v2946_v50, %v2754_v53 }
  0x78   :  { %831 = vmatpush.bf16.xpose.msrb.mxu2 %v2669_v21  ;;  %v2793_v21 = vor.u32 %v2955_v18, %v2790_v20 }
  0x7c   :  { %790 = vmatpush.bf16.xpose.msrb.mxu3 %v2561_v9  ;;  %v2813_v9 = vor.u32 %v2962_v7, %v2812_v6  ;;  %v2954_v6 = vld [vmem:[%s4537_s0 + $0x280] sm:$0xf0] }
  0x7d   :  { %818 = vmatpush.bf16.xpose.msrb.mxu1 %v670_v14  ;;  %859 = vmatpush.bf16.xpose.msrb.mxu0 %v697_v52  ;;  %v2925_v14 = vld [vmem:[%s4537_s0 + $0x19c] sm:$0xf] }
  0x80   :  { %832 = vmatpush.bf16.xpose.msrb.mxu2 %v2657_v33  ;;  %v2781_v33 = vor.u32 %v2952_v29, %v2778_v32 }
  0x83   :  { %791 = vmatmul.bf16.vlgmr.msrb.gmra.mxu3 %v3267_v54 }
  0x84   :  { %839 = vmatpush.bf16.xpose.msra.mxu3 %v2745_v11  ;;  %2847 = vmatmul.msk.bf16.vlgmr.msrb.gmra.mxu1 %vm641_vm0, %v3299_v4  ;;  %v2802_v11 = vld [vmem:[%s4537_s0 + $0x2ac] sm:$0xf0] }
  0x85   :  { %867 = vmatpush.bf16.xpose.msra.mxu1 %v2837_v45  ;;  %860 = vmatpush.bf16.xpose.msrb.mxu0 %v694_v5  ;;  %v2805_v12 = vor.u32 %v2958_v8, %v2802_v11  ;;  %v736_v45 = vsel %vm641_vm0, %v2833_v41, 0  ;;  %v2784_v5 = vld [vmem:[%s4537_s0 + $0x278] sm:$0xf]  ;;  %v2951_v11 = vld [vmem:[%s4537_s0 + $0x268] sm:$0xf0] }
  0x86   :  { %v2785_v7 = vor.u32 %v2954_v6, %v2784_v5 }
  0x87   :  { %833 = vmatmul.bf16.vlgmr.msrb.gmra.mxu2 %v3267_v54 }
  0x88   :  { %881 = vmatpush.bf16.xpose.msra.mxu2 %v2841_v34  ;;  %v2661_v34 = vor.u32 %v2922_v25, %v2658_v26  ;;  %v724_v8 = vsel %vm641_vm0, %v2785_v7, 0 }
  0x8c   :  { %840 = vmatpush.bf16.xpose.msra.mxu3 %v2733_v22  ;;  %2848 = vmatmul.msk.bf16.vlgmr.msrb.gmra.mxu0 %vm641_vm0, %v3299_v4  ;;  %v2673_v22 = vor.u32 %v2925_v14, %v2670_v15  ;;  %v2760_v14 = vld [vmem:[%s4537_s0 + $0x248] sm:$0xf]  ;;  %v2948_v15 = vld [vmem:[%s4537_s0 + $0x250] sm:$0xf0] }
  0x8d   :  { %868 = vmatpush.bf16.xpose.msra.mxu1 %v2825_v58  ;;  %v2960_v58 = vld [vmem:[%s4537_s0 + $0x2b0] sm:$0xf0]  ;;  %v2761_v16 = vor.u32 %v2948_v15, %v2760_v14 }
  0x8e   :  { %v2809_v61 = vor.u32 %v2960_v58, %v2808_v57 }
  0x8f   :  { %v718_v17 = vsel %vm641_vm0, %v2761_v16, 0 }
  0x90   :  { %882 = vmatpush.bf16.xpose.msra.mxu2 %v2829_v47  ;;  %v2963_v47 = vld [vmem:[%s4537_s0 + $0x2c8] sm:$0xf0] }
  0x91   :  { %v2821_v51 = vor.u32 %v2963_v47, %v2820_v46 }
  0x93   :  { %v733_v56 = vsel %vm641_vm0, %v2821_v51, 0 }
  0x94   :  { %841 = vmatpush.bf16.xpose.msra.mxu3 %v2721_v35  ;;  %v739_v35 = vsel %vm641_vm0, %v2845_v30, 0 }
  0x95   :  { %869 = vmatpush.bf16.xpose.msra.mxu1 %v2813_v9  ;;  %v2772_v9 = vld [vmem:[%s4537_s0 + $0x260] sm:$0xf] }
  0x98   :  { %883 = vmatpush.bf16.xpose.msra.mxu2 %v2817_v63  ;;  %v730_v63 = vsel %vm641_vm0, %v2809_v61, 0 }
  0x9c   :  { %842 = vmatpush.bf16.xpose.msra.mxu3 %v2709_v48  ;;  %v2764_v48 = vld [vmem:[%s4537_s0 + $0x258] sm:$0xf] }
  0x9d   :  { %870 = vmatpush.bf16.xpose.msra.mxu1 %v2801_v19  ;;  %v2765_v52 = vor.u32 %v2950_v49, %v2764_v48 }
  0xa0   :  { %884 = vmatpush.bf16.xpose.msra.mxu2 %v2805_v12  ;;  %v2773_v12 = vor.u32 %v2951_v11, %v2772_v9 }
  0xa4   :  { %843 = vmatpush.bf16.xpose.msra.mxu3 %v2697_v59  ;;  %v2752_v59 = vld [vmem:[%s4537_s0 + $0x240] sm:$0xf] }
  0xa5   :  { %871 = vmatpush.bf16.xpose.msra.mxu1 %v2789_v31  ;;  %v2753_v62 = vor.u32 %v2947_v60, %v2752_v59 }
  0xa8   :  { %885 = vmatpush.bf16.xpose.msra.mxu2 %v2793_v21 }
  0xac   :  { %844 = vmatpush.bf16.xpose.msra.mxu3 %v2685_v13  ;;  %v721_v13 = vsel %vm641_vm0, %v2773_v12, 0 }
  0xad   :  { %872 = vmatpush.bf16.xpose.msra.mxu1 %v2777_v42 }
  0xb0   :  { %886 = vmatpush.bf16.xpose.msra.mxu2 %v2781_v33 }
  0xb4   :  { %845 = vmatpush.bf16.xpose.msra.mxu3 %v2673_v22 }
  0xb5   :  { %873 = vmatpush.bf16.xpose.msra.mxu1 %v2765_v52 }
  0xb8   :  { %887 = vmatpush.bf16.xpose.msra.mxu2 %v2769_v44 }
  0xbc   :  { %846 = vmatpush.bf16.xpose.msra.mxu3 %v2661_v34 }
  0xbd   :  { %874 = vmatpush.bf16.xpose.msra.mxu1 %v2753_v62 }
  0xc0   :  { %888 = vmatpush.bf16.xpose.msra.mxu2 %v2757_v55 }
  0xc1   :  { %v764_v20 = vpop.f32.mrf.mxu1 }
  0xc3   :  { %847 = vmatmul.bf16.vlgmr.msra.gmra.mxu3 %v3310_v10 }
  0xc4   :  { %895 = vmatpush.bf16.xpose.msrb.mxu3 %v739_v35  ;;  %875 = vmatmul.bf16.vlgmr.msra.gmra.mxu1 %v3267_v54 }
  0xc6   :  { %v750_v18 = vpop.f32.mrf.mxu3 }
  0xc7   :  { %889 = vmatmul.bf16.vlgmr.msra.gmra.mxu2 %v3310_v10  ;;  %v765_v38 = vadd.f32 %v764_v20, %v750_v18 }
  0xc9   :  { %v766_v23 = vpop.f32.mrf.mxu1  ;;  %v806_v26 = vpop.f32.mrf.mxu0 }
  0xca   :  { %v778_v21 = vpop.f32.mrf.mxu2 }
  0xcb   :  { %v779_v44 = vadd.f32 %v778_v21, %v765_v38 }
  0xcc   :  { %896 = vmatpush.bf16.xpose.msrb.mxu3 %v736_v45 }
  0xce   :  { %v752_v19 = vpop.f32.mrf.mxu3 }
  0xcf   :  { %v767_v46 = vadd.f32 %v766_v23, %v752_v19 }
  0xd1   :  { %v808_v30 = vpop.f32.mrf.mxu0 }
  0xd2   :  { %v780_v24 = vpop.f32.mrf.mxu2 }
  0xd4   :  { %897 = vmatpush.bf16.xpose.msrb.mxu3 %v733_v56  ;;  %v781_v56 = vadd.f32 %v780_v24, %v767_v46 }
  0xdc   :  { %898 = vmatpush.bf16.xpose.msrb.mxu3 %v730_v63 }
  0xe4   :  { %899 = vmatpush.bf16.xpose.msrb.mxu3 %v727_v3 }
  0xec   :  { %900 = vmatpush.bf16.xpose.msrb.mxu3 %v724_v8 }
  0xf4   :  { %901 = vmatpush.bf16.xpose.msrb.mxu3 %v721_v13 }
  0xfc   :  { %902 = vmatpush.bf16.xpose.msrb.mxu3 %v718_v17 }
 0x101   :  { %v820_v27 = vpop.f32.mrf.mxu1 }
 0x103   :  { %2849 = vmatmul.msk.bf16.vlgmr.msrb.gmra.mxu3 %vm641_vm0, %v3299_v4 }
 0x106   :  { %v792_v22 = vpop.f32.mrf.mxu3 }
 0x107   :  { %v807_v35 = vadd.f32 %v806_v26, %v792_v22 }
 0x109   :  { %v822_v31 = vpop.f32.mrf.mxu1  ;;  %v862_v34 = vpop.f32.mrf.mxu0  ;;  %v821_v40 = vadd.f32 %v820_v27, %v807_v35 }
 0x10a   :  { %v834_v28 = vpop.f32.mrf.mxu2 }
 0x10b   :  { %v909_v48 = vadd.f32 %v821_v40, %v779_v44 }
 0x10e   :  { %v794_v25 = vpop.f32.mrf.mxu3 }
 0x10f   :  { %v809_v43 = vadd.f32 %v808_v30, %v794_v25 }
 0x111   :  { %v864_v49 = vpop.f32.mrf.mxu0  ;;  %v823_v51 = vadd.f32 %v822_v31, %v809_v43 }
 0x112   :  { %v836_v32 = vpop.f32.mrf.mxu2 }
 0x113   :  { %v910_v60 = vadd.f32 %v823_v51, %v781_v56 }
 0x141   :  { %v876_v36 = vpop.f32.mrf.mxu1 }
 0x146   :  { %v848_v29 = vpop.f32.mrf.mxu3 }
 0x147   :  { %v849_v39 = vadd.f32 %v848_v29, %v834_v28 }
 0x149   :  { %v863_v45 = vadd.f32 %v862_v34, %v849_v39  ;;  %v878_v53 = vpop.f32.mrf.mxu1 }
 0x14a   :  { %v890_v37 = vpop.f32.mrf.mxu2 }
 0x14b   :  { %v891_v41 = vadd.f32 %v890_v37, %v876_v36  ;;  %v911_v52 = vadd.f32 %v909_v48, %v863_v45 }
 0x14e   :  { %v850_v33 = vpop.f32.mrf.mxu3 }
 0x14f   :  { %v851_v47 = vadd.f32 %v850_v33, %v836_v32 }
 0x151   :  { %v865_v57 = vadd.f32 %v864_v49, %v851_v47 }
 0x152   :  { %v892_v55 = vpop.f32.mrf.mxu2 }
 0x153   :  { %v893_v61 = vadd.f32 %v892_v55, %v878_v53  ;;  %v912_v62 = vadd.f32 %v910_v60, %v865_v57 }
 0x186   :  { %v904_v42 = vpop.f32.mrf.mxu3 }
 0x187   :  { %v905_v50 = vadd.f32 %v904_v42, %v891_v41 }
 0x189   :  { %v913_v58 = vadd.f32 %v911_v52, %v905_v50 }
 0x18b   :  { %v915_v0 = vmul.f32 0.25, %v913_v58 }
 0x18d   :  { %v3684_v3 = vsub.f32 %v779_v44, %v915_v0  ;;  %v3692_v8 = vsub.f32 %v821_v40, %v915_v0  ;;  %v3694_v9 = vsub.f32 %v863_v45, %v915_v0  ;;  %v3715_v33 = vsub.f32 %v905_v50, %v915_v0 }
 0x18e   :  { %v906_v59 = vpop.f32.mrf.mxu3 }
 0x18f   :  { %v907_v63 = vadd.f32 %v906_v59, %v893_v61  ;;  %v925_v12 = vmul.f32 %v3684_v3, %v3684_v3  ;;  %v966_v17 = vmul.f32 %v3692_v8, %v3692_v8  ;;  %v996_v18 = vmul.f32 %v3694_v9, %v3694_v9 }
 0x190   :  { %v936_v39 = vmul.f32 %v3692_v8, %v3684_v3  ;;  %v1016_v43 = vmul.f32 %v3715_v33, %v3715_v33  ;;  %v946_v47 = vmul.f32 %v3694_v9, %v3684_v3  ;;  %v976_v53 = vmul.f32 %v3694_v9, %v3692_v8 }
 0x191   :  { %v914_v1 = vadd.f32 %v912_v62, %v907_v63  ;;  %v956_v62 = vmul.f32 %v3715_v33, %v3684_v3 }
 0x193   :  { %v916_v2 = vmul.f32 0.25, %v914_v1  ;;  %v986_v1 = vmul.f32 %v3715_v33, %v3692_v8 }
 0x195   :  { %v3686_v5 = vsub.f32 %v781_v56, %v916_v2  ;;  %v3688_v6 = vsub.f32 %v823_v51, %v916_v2  ;;  %v3690_v7 = vsub.f32 %v865_v57, %v916_v2  ;;  %v3713_v32 = vsub.f32 %v907_v63, %v916_v2 }
 0x197   :  { %v926_v11 = vmul.f32 %v3686_v5, %v3686_v5  ;;  %v967_v13 = vmul.f32 %v3688_v6, %v3688_v6  ;;  %v997_v14 = vmul.f32 %v3690_v7, %v3690_v7  ;;  %v937_v29 = vmul.f32 %v3688_v6, %v3686_v5 }
 0x198   :  { %v947_v35 = vmul.f32 %v3690_v7, %v3686_v5  ;;  %v957_v40 = vmul.f32 %v3713_v32, %v3686_v5  ;;  %v977_v41 = vmul.f32 %v3690_v7, %v3688_v6  ;;  %v1017_v42 = vmul.f32 %v3713_v32, %v3713_v32 }
 0x199   :  { %v928_v15 = vsel %vm927_vm1, %v926_v11, 0.0  ;;  %v968_v19 = vsel %vm927_vm1, %v967_v13, 0.0  ;;  %v998_v20 = vsel %vm927_vm1, %v997_v14, 0.0  ;;  %v938_v37 = vsel %vm927_vm1, %v937_v29, 0.0 }
 0x19a   :  { %v929_v16 = vadd.f32 %v928_v15, %v925_v12  ;;  %v969_v22 = vadd.f32 %v968_v19, %v966_v17  ;;  %v999_v23 = vadd.f32 %v998_v20, %v996_v18  ;;  %v948_v45 = vsel %vm927_vm1, %v947_v35, 0.0 }
 0x19b   :  { %v939_v48 = vadd.f32 %v938_v37, %v936_v39  ;;  %v987_v49 = vmul.f32 %v3713_v32, %v3688_v6  ;;  %v1018_v50 = vsel %vm927_vm1, %v1017_v42, 0.0  ;;  %v949_v55 = vadd.f32 %v948_v45, %v946_v47 }
 0x19c   :  { %v930_v21 = vrot.slane %v929_v16, 4  ;;  %v970_v25 = vrot.slane %v969_v22, 4  ;;  %v1000_v26 = vrot.slane %v999_v23, 4  ;;  %v1019_v52 = vadd.f32 %v1018_v50, %v1016_v43 }
 0x19d   :  { %v958_v56 = vsel %vm927_vm1, %v957_v40, 0.0  ;;  %v978_v57 = vsel %vm927_vm1, %v977_v41, 0.0  ;;  %v1007_v60 = vmul.f32 %v3713_v32, %v3690_v7  ;;  %v940_v63 = vrot.slane %v939_v48, 4 }
 0x19e   :  { %v931_v24 = vadd.f32 %v930_v21, %v929_v16  ;;  %v971_v28 = vadd.f32 %v970_v25, %v969_v22  ;;  %v1001_v31 = vadd.f32 %v1000_v26, %v999_v23  ;;  %v1020_v61 = vrot.slane %v1019_v52, 4 }
 0x19f   :  { %v988_v0 = vsel %vm927_vm1, %v987_v49, 0.0  ;;  %v979_v2 = vadd.f32 %v978_v57, %v976_v53  ;;  %v950_v13 = vrot.slane %v949_v55, 4  ;;  %v959_v14 = vadd.f32 %v958_v56, %v956_v62 }
 0x1a0   :  { %v932_v27 = vrot.slane %v931_v24, 2  ;;  %v972_v30 = vrot.slane %v971_v28, 2  ;;  %v1002_v38 = vrot.slane %v1001_v31, 2  ;;  %v1021_v12 = vadd.f32 %v1020_v61, %v1019_v52 }
 0x1a1   :  { %v989_v15 = vadd.f32 %v988_v0, %v986_v1  ;;  %v1008_v16 = vsel %vm927_vm1, %v1007_v60, 0.0  ;;  %v1006_v19 = vmul.f32 %v3715_v33, %v3694_v9  ;;  %v941_v20 = vadd.f32 %v940_v63, %v939_v48 }
 0x1a2   :  { %v933_v34 = vadd.f32 %v932_v27, %v931_v24  ;;  %v973_v36 = vadd.f32 %v972_v30, %v971_v28  ;;  %v1003_v51 = vadd.f32 %v1002_v38, %v1001_v31  ;;  %v1022_v17 = vrot.slane %v1021_v12, 2 }
 0x1a3   :  { %v980_v21 = vrot.slane %v979_v2, 4  ;;  %v960_v24 = vrot.slane %v959_v14, 4  ;;  %v1009_v25 = vadd.f32 %v1008_v16, %v1006_v19  ;;  %v951_v26 = vadd.f32 %v950_v13, %v949_v55 }
 0x1a4   :  { %v934_v44 = vrot.slane %v933_v34, 1  ;;  %v974_v46 = vrot.slane %v973_v36, 1  ;;  %v1004_v11 = vrot.slane %v1003_v51, 1  ;;  %v1023_v23 = vadd.f32 %v1022_v17, %v1021_v12 }
 0x1a5   :  { %v990_v27 = vrot.slane %v989_v15, 4  ;;  %v942_v30 = vrot.slane %v941_v20, 2  ;;  %v981_v31 = vadd.f32 %v980_v21, %v979_v2  ;;  %v1010_v35 = vrot.slane %v1009_v25, 4 }
 0x1a6   :  { %v935_v58 = vadd.f32 %v934_v44, %v933_v34  ;;  %v975_v59 = vadd.f32 %v974_v46, %v973_v36  ;;  %v1005_v22 = vadd.f32 %v1004_v11, %v1003_v51  ;;  %v1024_v28 = vrot.slane %v1023_v23, 1 }
 0x1a7   :  { %v952_v36 = vrot.slane %v951_v26, 2  ;;  %v961_v37 = vadd.f32 %v960_v24, %v959_v14  ;;  %v991_v38 = vadd.f32 %v990_v27, %v989_v15  ;;  %v943_v40 = vadd.f32 %v942_v30, %v941_v20 }
 0x1a8   :  { %v1026_v18 = vadd.f32 %v975_v59, %v935_v58  ;;  %v1025_v34 = vadd.f32 %v1024_v28, %v1023_v23  ;;  %v982_v41 = vrot.slane %v981_v31, 2  ;;  %v1011_v43 = vadd.f32 %v1010_v35, %v1009_v25 }
 0x1a9   :  { %v953_v44 = vadd.f32 %v952_v36, %v951_v26  ;;  %v962_v45 = vrot.slane %v961_v37, 2  ;;  %v992_v46 = vrot.slane %v991_v38, 2  ;;  %v944_v47 = vrot.slane %v943_v40, 1 }
 0x1aa   :  { %v1027_v29 = vadd.f32 %v1026_v18, %v1005_v22  ;;  %v983_v48 = vadd.f32 %v982_v41, %v981_v31  ;;  %v1012_v49 = vrot.slane %v1011_v43, 2 }
 0x1ab   :  { %v954_v50 = vrot.slane %v953_v44, 1  ;;  %v963_v51 = vadd.f32 %v962_v45, %v961_v37  ;;  %v993_v52 = vadd.f32 %v992_v46, %v991_v38  ;;  %v945_v53 = vadd.f32 %v944_v47, %v943_v40 }
 0x1ac   :  { %v1028_v39 = vadd.f32 %v1027_v29, %v1025_v34  ;;  %v984_v56 = vrot.slane %v983_v48, 1  ;;  %v1013_v57 = vadd.f32 %v1012_v49, %v1011_v43 }
 0x1ad   :  { %v955_v62 = vadd.f32 %v954_v50, %v953_v44  ;;  %v964_v63 = vrot.slane %v963_v51, 1  ;;  %v994_v0 = vrot.slane %v993_v52, 1 }
 0x1ae   :  { %v1029_v42 = vmax.f32 %v1028_v39, 1e-30  ;;  %v985_v11 = vadd.f32 %v984_v56, %v983_v48  ;;  %v1014_v14 = vrot.slane %v1013_v57, 1 }
 0x1af   :  { %v965_v15 = vadd.f32 %v964_v63, %v963_v51 }
 0x1b0   :  { %2976 = vrcp.f32 %v1029_v42  ;;  %v1015_v23 = vadd.f32 %v1014_v14, %v1013_v57 }
 0x1b6   :  { %v2977_v55 = vpop.eup %2976 }
 0x1b7   :  { %v3750_v60 = vmul.f32 %v2977_v55, %v935_v58  ;;  %v3752_v61 = vmul.f32 %v2977_v55, %v945_v53  ;;  %v3758_v12 = vmul.f32 %v2977_v55, %v955_v62  ;;  %v3760_v13 = vmul.f32 %v2977_v55, %v975_v59 }
 0x1b8   :  { %v995_v58 = vadd.f32 %v994_v0, %v993_v52  ;;  %v3762_v16 = vmul.f32 %v2977_v55, %v985_v11  ;;  %v3764_v18 = vmul.f32 %v2977_v55, %v965_v15  ;;  %v3772_v24 = vmul.f32 %v2977_v55, %v1005_v22 }
 0x1b9   :  { %v1041_v1 = vmul.f32 %v3750_v60, %v3750_v60  ;;  %v1042_v2 = vmul.f32 %v3752_v61, %v3752_v61  ;;  %v1044_v20 = vmul.f32 %v3758_v12, %v3758_v12  ;;  %v1069_v21 = vmul.f32 %v3760_v13, %v3760_v13 }
 0x1ba   :  { %v3766_v19 = vmul.f32 %v2977_v55, %v995_v58  ;;  %v1071_v26 = vmul.f32 %v3762_v16, %v3762_v16  ;;  %v3776_v27 = vmul.f32 %v2977_v55, %v1015_v23  ;;  %v1046_v28 = vmul.f32 %v3764_v18, %v3764_v18 }
 0x1bb   :  { %v1043_v17 = vadd.f32 %v1042_v2, %v1041_v1  ;;  %v1070_v25 = vadd.f32 %v1069_v21, %v1042_v2  ;;  %v1090_v22 = vmul.f32 %v3772_v24, %v3772_v24  ;;  %v3784_v37 = vmul.f32 %v2977_v55, %v1025_v34 }
 0x1bc   :  { %v1073_v30 = vmul.f32 %v3766_v19, %v3766_v19  ;;  %v1089_v36 = vadd.f32 %v1071_v26, %v1044_v20  ;;  %v1092_v39 = vmul.f32 %v3776_v27, %v3776_v27  ;;  %v1048_v45 = vmul.f32 %v3752_v61, %v3750_v60 }
 0x1bd   :  { %v1045_v59 = vadd.f32 %v1044_v20, %v1043_v17  ;;  %v1072_v29 = vadd.f32 %v1071_v26, %v1070_v25  ;;  %v1103_v44 = vmul.f32 %v3784_v37, %v3784_v37  ;;  %v1049_v46 = vmul.f32 %v3760_v13, %v3752_v61 }
 0x1be   :  { %v1091_v38 = vadd.f32 %v1090_v22, %v1089_v36  ;;  %v1101_v40 = vadd.f32 %v1073_v30, %v1046_v28  ;;  %v1055_v48 = vmul.f32 %v3758_v12, %v3750_v60  ;;  %v1056_v49 = vmul.f32 %v3762_v16, %v3752_v61 }
 0x1bf   :  { %v1047_v31 = vadd.f32 %v1046_v28, %v1045_v59  ;;  %v1074_v35 = vadd.f32 %v1073_v30, %v1072_v29  ;;  %v1050_v51 = vadd.f32 %v1049_v46, %v1048_v45  ;;  %v1075_v52 = vmul.f32 %v3758_v12, %v3752_v61 }
 0x1c0   :  { %v3788_v41 = vadd.f32 %v1092_v39, %v1091_v38  ;;  %v1102_v43 = vadd.f32 %v1101_v40, %v1092_v39  ;;  %v1076_v53 = vmul.f32 %v3762_v16, %v3760_v13  ;;  %v1051_v56 = vmul.f32 %v3762_v16, %v3758_v12 }
 0x1c1   :  { %v1105_v42 = vadd.f32 %v1074_v35, %v1047_v31  ;;  %v1062_v57 = vmul.f32 %v3764_v18, %v3750_v60  ;;  %v1063_v62 = vmul.f32 %v3766_v19, %v3752_v61  ;;  %v1057_v63 = vadd.f32 %v1056_v49, %v1055_v48 }
 0x1c2   :  { %v3797_v47 = vadd.f32 %v1103_v44, %v1102_v43  ;;  %v1082_v0 = vmul.f32 %v3764_v18, %v3752_v61  ;;  %v1083_v1 = vmul.f32 %v3766_v19, %v3760_v13  ;;  %v1052_v2 = vadd.f32 %v1051_v56, %v1050_v51 }
 0x1c3   :  { %v1106_v34 = vadd.f32 %v1105_v42, %v3788_v41  ;;  %v1058_v11 = vmul.f32 %v3772_v24, %v3758_v12  ;;  %v1077_v14 = vadd.f32 %v1076_v53, %v1075_v52  ;;  %v1053_v15 = vmul.f32 %v3766_v19, %v3764_v18 }
 0x1c4   :  { %v1094_v58 = vmul.f32 %v3764_v18, %v3758_v12  ;;  %v1095_v17 = vmul.f32 %v3766_v19, %v3762_v16  ;;  %v1064_v21 = vadd.f32 %v1063_v62, %v1062_v57  ;;  %v1078_v23 = vmul.f32 %v3772_v24, %v3762_v16 }
 0x1c5   :  { %v1107_v50 = vadd.f32 %v1106_v34, %v3797_v47  ;;  %v1059_v20 = vadd.f32 %v1058_v11, %v1057_v63  ;;  %v1084_v59 = vadd.f32 %v1083_v1, %v1082_v0  ;;  %v1054_v25 = vadd.f32 %v1053_v15, %v1052_v2 }
 0x1c6   :  { %v1060_v28 = vmul.f32 %v3776_v27, %v3764_v18  ;;  %v1065_v29 = vmul.f32 %v3776_v27, %v3758_v12  ;;  %v1079_v30 = vadd.f32 %v1078_v23, %v1077_v14  ;;  %v1085_v36 = vmul.f32 %v3776_v27, %v3762_v16 }
 0x1c7   :  { %v1108_v55 = vmax.f32 %v1107_v50, 1e-30  ;;  %v1096_v22 = vadd.f32 %v1095_v17, %v1094_v58  ;;  %v1080_v43 = vmul.f32 %v3776_v27, %v3766_v19  ;;  %v1067_v45 = vmul.f32 %v3784_v37, %v3764_v18 }
 0x1c8   :  { %v1061_v40 = vadd.f32 %v1060_v28, %v1059_v20  ;;  %v1066_v42 = vadd.f32 %v1065_v29, %v1064_v21  ;;  %v1086_v44 = vadd.f32 %v1085_v36, %v1084_v59  ;;  %v1097_v46 = vmul.f32 %v3776_v27, %v3772_v24 }
 0x1c9   :  { %2978 = vrcp.f32 %v1108_v55  ;;  %v1081_v49 = vadd.f32 %v1080_v43, %v1079_v30  ;;  %v1087_v50 = vmul.f32 %v3784_v37, %v3766_v19  ;;  %v1099_v62 = vmul.f32 %v3784_v37, %v3776_v27 }
 0x1ca   :  { %v1098_v52 = vadd.f32 %v1097_v46, %v1096_v22  ;;  %v1068_v53 = vadd.f32 %v1067_v45, %v1066_v42 }
 0x1cb   :  { %v1088_v55 = vadd.f32 %v1087_v50, %v1086_v44 }
 0x1cc   :  { %v1100_v11 = vadd.f32 %v1099_v62, %v1098_v52 }
 0x1cf   :  { %v2979_v26 = vpop.eup %2978 }
 0x1d0   :  { %v1110_v38 = vmul.f32 %v2979_v26, %v1047_v31  ;;  %v1111_v39 = vmul.f32 %v2979_v26, %v1054_v25  ;;  %v3842_v31 = vmul.f32 %v2979_v26, %v1061_v40  ;;  %v1114_v51 = vmul.f32 %v2979_v26, %v1074_v35 }
 0x1d1   :  { %v1115_v56 = vmul.f32 %v2979_v26, %v1081_v49  ;;  %v3846_v63 = vmul.f32 %v2979_v26, %v1068_v53  ;;  %v3848_v0 = vmul.f32 %v2979_v26, %v1088_v55  ;;  %v1117_v14 = vmul.f32 %v2979_v26, %v3788_v41 }
 0x1d2   :  { %v1120_v34 = vmul.f32 %v1110_v38, %v1110_v38  ;;  %v1121_v48 = vmul.f32 %v1111_v39, %v1111_v39  ;;  %v1123_v1 = vmul.f32 %v3842_v31, %v3842_v31  ;;  %v1148_v2 = vmul.f32 %v1114_v51, %v1114_v51 }
 0x1d3   :  { %v1150_v58 = vmul.f32 %v1115_v56, %v1115_v56  ;;  %v3853_v17 = vmul.f32 %v2979_v26, %v1100_v11  ;;  %v1125_v20 = vmul.f32 %v3846_v63, %v3846_v63  ;;  %v1152_v23 = vmul.f32 %v3848_v0, %v3848_v0 }
 0x1d4   :  { %v1122_v57 = vadd.f32 %v1121_v48, %v1120_v34  ;;  %v1149_v15 = vadd.f32 %v1148_v2, %v1121_v48  ;;  %v1169_v29 = vmul.f32 %v1117_v14, %v1117_v14  ;;  %v1119_v30 = vmul.f32 %v2979_v26, %v3797_v47 }
 0x1d5   :  { %v1168_v28 = vadd.f32 %v1150_v58, %v1123_v1  ;;  %v1171_v41 = vmul.f32 %v3853_v17, %v3853_v17  ;;  %v1180_v22 = vadd.f32 %v1152_v23, %v1125_v20  ;;  %v1127_v45 = vmul.f32 %v1111_v39, %v1110_v38 }
 0x1d6   :  { %v1124_v35 = vadd.f32 %v1123_v1, %v1122_v57  ;;  %v1151_v21 = vadd.f32 %v1150_v58, %v1149_v15  ;;  %v1182_v44 = vmul.f32 %v1119_v30, %v1119_v30  ;;  %v1128_v46 = vmul.f32 %v1114_v51, %v1111_v39 }
 0x1d7   :  { %v1170_v36 = vadd.f32 %v1169_v29, %v1168_v28  ;;  %v1181_v43 = vadd.f32 %v1180_v22, %v1171_v41  ;;  %v1134_v49 = vmul.f32 %v3842_v31, %v1110_v38  ;;  %v1135_v50 = vmul.f32 %v1115_v56, %v1111_v39 }
 0x1d8   :  { %v1126_v59 = vadd.f32 %v1125_v20, %v1124_v35  ;;  %v1153_v25 = vadd.f32 %v1152_v23, %v1151_v21  ;;  %v1129_v26 = vadd.f32 %v1128_v46, %v1127_v45  ;;  %v1154_v52 = vmul.f32 %v3842_v31, %v1111_v39 }
 0x1d9   :  { %v3862_v40 = vadd.f32 %v1171_v41, %v1170_v36  ;;  %v3865_v48 = vadd.f32 %v1182_v44, %v1181_v43  ;;  %v1155_v53 = vmul.f32 %v1115_v56, %v1114_v51  ;;  %v1130_v57 = vmul.f32 %v1115_v56, %v3842_v31 }
 0x1da   :  { %v1184_v42 = vadd.f32 %v1153_v25, %v1126_v59  ;;  %v1141_v62 = vmul.f32 %v3846_v63, %v1110_v38  ;;  %v1142_v1 = vmul.f32 %v3848_v0, %v1111_v39  ;;  %v1136_v2 = vadd.f32 %v1135_v50, %v1134_v49 }
 0x1db   :  { %v1161_v11 = vmul.f32 %v3846_v63, %v1111_v39  ;;  %v1162_v35 = vmul.f32 %v3848_v0, %v1114_v51  ;;  %v1131_v15 = vadd.f32 %v1130_v57, %v1129_v26  ;;  %v1137_v58 = vmul.f32 %v1117_v14, %v3842_v31 }
 0x1dc   :  { %v1185_v34 = vadd.f32 %v1184_v42, %v3862_v40  ;;  %v1156_v20 = vadd.f32 %v1155_v53, %v1154_v52  ;;  %v1132_v21 = vmul.f32 %v3848_v0, %v3846_v63  ;;  %v1173_v23 = vmul.f32 %v3846_v63, %v3842_v31 }
 0x1dd   :  { %v1174_v38 = vmul.f32 %v3848_v0, %v1115_v56  ;;  %v1138_v28 = vadd.f32 %v1137_v58, %v1136_v2  ;;  %v1143_v29 = vadd.f32 %v1142_v1, %v1141_v62  ;;  %v1157_v36 = vmul.f32 %v1117_v14, %v1115_v56 }
 0x1de   :  { %v1186_v47 = vadd.f32 %v1185_v34, %v3865_v48  ;;  %v1163_v41 = vadd.f32 %v1162_v35, %v1161_v11  ;;  %v1133_v39 = vadd.f32 %v1132_v21, %v1131_v15  ;;  %v1139_v51 = vmul.f32 %v3853_v17, %v3846_v63 }
 0x1df   :  { %v1144_v42 = vmul.f32 %v3853_v17, %v3842_v31  ;;  %v1158_v43 = vadd.f32 %v1157_v36, %v1156_v20  ;;  %v1164_v44 = vmul.f32 %v3853_v17, %v1115_v56  ;;  %v1175_v45 = vadd.f32 %v1174_v38, %v1173_v23 }
 0x1e0   :  { %v1187_v55 = vmax.f32 %v1186_v47, 1e-30  ;;  %v1140_v49 = vadd.f32 %v1139_v51, %v1138_v28  ;;  %v1159_v47 = vmul.f32 %v3853_v17, %v3848_v0  ;;  %v1146_v52 = vmul.f32 %v1119_v30, %v3846_v63 }
 0x1e1   :  { %v1145_v50 = vadd.f32 %v1144_v42, %v1143_v29  ;;  %v1165_v26 = vadd.f32 %v1164_v44, %v1163_v41  ;;  %v1176_v53 = vmul.f32 %v3853_v17, %v1117_v14  ;;  %v1166_v31 = vmul.f32 %v1119_v30, %v3848_v0 }
 0x1e2   :  { %2980 = vrcp.f32 %v1187_v55  ;;  %v1160_v62 = vadd.f32 %v1159_v47, %v1158_v43  ;;  %v1178_v58 = vmul.f32 %v1119_v30, %v3853_v17 }
 0x1e3   :  { %v1147_v2 = vadd.f32 %v1146_v52, %v1145_v50  ;;  %v1167_v11 = vadd.f32 %v1166_v31, %v1165_v26 }
 0x1e8   :  { %v2981_v22 = vpop.eup %2980 }
 0x1e9   :  { %v1189_v46 = vmul.f32 %v2981_v22, %v1126_v59  ;;  %v1190_v34 = vmul.f32 %v2981_v22, %v1133_v39  ;;  %v3891_v1 = vmul.f32 %v2981_v22, %v1140_v49  ;;  %v1193_v56 = vmul.f32 %v2981_v22, %v1153_v25 }
 0x1ea   :  { %v1177_v59 = vadd.f32 %v1176_v53, %v1175_v45  ;;  %v1194_v35 = vmul.f32 %v2981_v22, %v1160_v62  ;;  %v3894_v20 = vmul.f32 %v2981_v22, %v1147_v2  ;;  %v3896_v63 = vmul.f32 %v2981_v22, %v1167_v11 }
 0x1eb   :  { %v1199_v55 = vmul.f32 %v1189_v46, %v1189_v46  ;;  %v1200_v57 = vmul.f32 %v1190_v34, %v1190_v34  ;;  %v1202_v14 = vmul.f32 %v3891_v1, %v3891_v1  ;;  %v1227_v21 = vmul.f32 %v1193_v56, %v1193_v56 }
 0x1ec   :  { %v1179_v23 = vadd.f32 %v1178_v58, %v1177_v59  ;;  %v1196_v0 = vmul.f32 %v2981_v22, %v3862_v40  ;;  %v1229_v28 = vmul.f32 %v1194_v35, %v1194_v35  ;;  %v1204_v36 = vmul.f32 %v3894_v20, %v3894_v20 }
 0x1ed   :  { %v1201_v15 = vadd.f32 %v1200_v57, %v1199_v55  ;;  %v1228_v25 = vadd.f32 %v1227_v21, %v1200_v57  ;;  %v1231_v30 = vmul.f32 %v3896_v63, %v3896_v63  ;;  %v1198_v43 = vmul.f32 %v2981_v22, %v3865_v48 }
 0x1ee   :  { %v3901_v29 = vmul.f32 %v2981_v22, %v1179_v23  ;;  %v1247_v51 = vadd.f32 %v1229_v28, %v1202_v14  ;;  %v1248_v42 = vmul.f32 %v1196_v0, %v1196_v0  ;;  %v1206_v52 = vmul.f32 %v1190_v34, %v1189_v46 }
 0x1ef   :  { %v1203_v38 = vadd.f32 %v1202_v14, %v1201_v15  ;;  %v1230_v17 = vadd.f32 %v1229_v28, %v1228_v25  ;;  %v1259_v45 = vadd.f32 %v1231_v30, %v1204_v36  ;;  %v1261_v26 = vmul.f32 %v1198_v43, %v1198_v43 }
 0x1f0   :  { %v1249_v44 = vadd.f32 %v1248_v42, %v1247_v51  ;;  %v1250_v40 = vmul.f32 %v3901_v29, %v3901_v29  ;;  %v1207_v53 = vmul.f32 %v1193_v56, %v1190_v34  ;;  %v1213_v62 = vmul.f32 %v3891_v1, %v1189_v46 }
 0x1f1   :  { %v1205_v41 = vadd.f32 %v1204_v36, %v1203_v38  ;;  %v1232_v39 = vadd.f32 %v1231_v30, %v1230_v17  ;;  %v1214_v31 = vmul.f32 %v1194_v35, %v1190_v34  ;;  %v1233_v59 = vmul.f32 %v3891_v1, %v1190_v34 }
 0x1f2   :  { %v3910_v49 = vadd.f32 %v1250_v40, %v1249_v44  ;;  %v1260_v47 = vadd.f32 %v1259_v45, %v1250_v40  ;;  %v1208_v22 = vadd.f32 %v1207_v53, %v1206_v52  ;;  %v1234_v2 = vmul.f32 %v1194_v35, %v1193_v56 }
 0x1f3   :  { %v1263_v50 = vadd.f32 %v1232_v39, %v1205_v41  ;;  %v1209_v15 = vmul.f32 %v1194_v35, %v3891_v1  ;;  %v1220_v58 = vmul.f32 %v3894_v20, %v1189_v46  ;;  %v1221_v14 = vmul.f32 %v3896_v63, %v1190_v34 }
 0x1f4   :  { %v3913_v57 = vadd.f32 %v1261_v26, %v1260_v47  ;;  %v1215_v21 = vadd.f32 %v1214_v31, %v1213_v62  ;;  %v1240_v23 = vmul.f32 %v3894_v20, %v1190_v34  ;;  %v1241_v38 = vmul.f32 %v3896_v63, %v1193_v56 }
 0x1f5   :  { %v1264_v55 = vadd.f32 %v1263_v50, %v3910_v49  ;;  %v1210_v25 = vadd.f32 %v1209_v15, %v1208_v22  ;;  %v1216_v28 = vmul.f32 %v1196_v0, %v3891_v1  ;;  %v1235_v36 = vadd.f32 %v1234_v2, %v1233_v59 }
 0x1f6   :  { %v1211_v17 = vmul.f32 %v3896_v63, %v3894_v20  ;;  %v1252_v30 = vmul.f32 %v3894_v20, %v3891_v1  ;;  %v1253_v46 = vmul.f32 %v3896_v63, %v1194_v35  ;;  %v1222_v42 = vadd.f32 %v1221_v14, %v1220_v58 }
 0x1f7   :  { %v1265_v48 = vadd.f32 %v1264_v55, %v3913_v57  ;;  %v1217_v51 = vadd.f32 %v1216_v28, %v1215_v21  ;;  %v1236_v44 = vmul.f32 %v1196_v0, %v1194_v35  ;;  %v1242_v40 = vadd.f32 %v1241_v38, %v1240_v23 }
 0x1f8   :  { %v1212_v34 = vadd.f32 %v1211_v17, %v1210_v25  ;;  %v1218_v56 = vmul.f32 %v3901_v29, %v3894_v20  ;;  %v1223_v50 = vmul.f32 %v3901_v29, %v3891_v1  ;;  %v1243_v26 = vmul.f32 %v3901_v29, %v1194_v35 }
 0x1f9   :  { %v1266_v11 = vmax.f32 %v1265_v48, 1e-30  ;;  %v1237_v47 = vadd.f32 %v1236_v44, %v1235_v36  ;;  %v1254_v52 = vadd.f32 %v1253_v46, %v1252_v30  ;;  %v1238_v48 = vmul.f32 %v3901_v29, %v3896_v63 }
 0x1fa   :  { %v1219_v62 = vadd.f32 %v1218_v56, %v1217_v51  ;;  %v1224_v31 = vadd.f32 %v1223_v50, %v1222_v42  ;;  %v1244_v22 = vadd.f32 %v1243_v26, %v1242_v40  ;;  %v1225_v59 = vmul.f32 %v1198_v43, %v3894_v20 }
 0x1fb   :  { %2982 = vrcp.f32 %v1266_v11  ;;  %v1255_v2 = vmul.f32 %v3901_v29, %v1196_v0  ;;  %v1239_v58 = vadd.f32 %v1238_v48, %v1237_v47  ;;  %v1245_v1 = vmul.f32 %v1198_v43, %v3896_v63 }
 0x1fc   :  { %v1226_v21 = vadd.f32 %v1225_v59, %v1224_v31  ;;  %v1257_v28 = vmul.f32 %v1198_v43, %v3901_v29 }
 0x1fd   :  { %v1246_v23 = vadd.f32 %v1245_v1, %v1244_v22 }
 0x201   :  { %v2983_v45 = vpop.eup %2982 }
 0x202   :  { %v1268_v53 = vmul.f32 %v2983_v45, %v1205_v41  ;;  %v1269_v55 = vmul.f32 %v2983_v45, %v1212_v34  ;;  %v3939_v14 = vmul.f32 %v2983_v45, %v1219_v62  ;;  %v1272_v35 = vmul.f32 %v2983_v45, %v1232_v39 }
 0x203   :  { %v1256_v41 = vadd.f32 %v1255_v2, %v1254_v52  ;;  %v1273_v38 = vmul.f32 %v2983_v45, %v1239_v58  ;;  %v3942_v36 = vmul.f32 %v2983_v45, %v1226_v21  ;;  %v3944_v20 = vmul.f32 %v2983_v45, %v1246_v23 }
 0x204   :  { %v1278_v11 = vmul.f32 %v1268_v53, %v1268_v53  ;;  %v1279_v15 = vmul.f32 %v1269_v55, %v1269_v55  ;;  %v1281_v0 = vmul.f32 %v3939_v14, %v3939_v14  ;;  %v1306_v17 = vmul.f32 %v1272_v35, %v1272_v35 }
 0x205   :  { %v1258_v30 = vadd.f32 %v1257_v28, %v1256_v41  ;;  %v1275_v63 = vmul.f32 %v2983_v45, %v3910_v49  ;;  %v1308_v51 = vmul.f32 %v1273_v38, %v1273_v38  ;;  %v1283_v44 = vmul.f32 %v3942_v36, %v3942_v36 }
 0x206   :  { %v1280_v25 = vadd.f32 %v1279_v15, %v1278_v11  ;;  %v1307_v39 = vadd.f32 %v1306_v17, %v1279_v15  ;;  %v1310_v43 = vmul.f32 %v3944_v20, %v3944_v20  ;;  %v1277_v47 = vmul.f32 %v2983_v45, %v3913_v57 }
 0x207   :  { %v3949_v42 = vmul.f32 %v2983_v45, %v1258_v30  ;;  %v1326_v56 = vadd.f32 %v1308_v51, %v1281_v0  ;;  %v1327_v50 = vmul.f32 %v1275_v63, %v1275_v63  ;;  %v1285_v59 = vmul.f32 %v1269_v55, %v1268_v53 }
 0x208   :  { %v1282_v46 = vadd.f32 %v1281_v0, %v1280_v25  ;;  %v1309_v29 = vadd.f32 %v1308_v51, %v1307_v39  ;;  %v1338_v52 = vadd.f32 %v1310_v43, %v1283_v44  ;;  %v1340_v22 = vmul.f32 %v1277_v47, %v1277_v47 }
 0x209   :  { %v1328_v26 = vadd.f32 %v1327_v50, %v1326_v56  ;;  %v1329_v49 = vmul.f32 %v3949_v42, %v3949_v42  ;;  %v1286_v2 = vmul.f32 %v1272_v35, %v1269_v55  ;;  %v1292_v58 = vmul.f32 %v3939_v14, %v1268_v53 }
 0x20a   :  { %v1284_v40 = vadd.f32 %v1283_v44, %v1282_v46  ;;  %v1311_v34 = vadd.f32 %v1310_v43, %v1309_v29  ;;  %v1293_v1 = vmul.f32 %v1273_v38, %v1269_v55  ;;  %v1312_v41 = vmul.f32 %v3939_v14, %v1269_v55 }
 0x20b   :  { %v3958_v62 = vadd.f32 %v1329_v49, %v1328_v26  ;;  %v1339_v48 = vadd.f32 %v1338_v52, %v1329_v49  ;;  %v1287_v45 = vadd.f32 %v1286_v2, %v1285_v59  ;;  %v1313_v21 = vmul.f32 %v1273_v38, %v1272_v35 }
 0x20c   :  { %v1342_v31 = vadd.f32 %v1311_v34, %v1284_v40  ;;  %v1288_v25 = vmul.f32 %v1273_v38, %v3939_v14  ;;  %v1299_v28 = vmul.f32 %v3942_v36, %v1268_v53  ;;  %v1300_v0 = vmul.f32 %v3944_v20, %v1269_v55 }
 0x20d   :  { %v3961_v15 = vadd.f32 %v1340_v22, %v1339_v48  ;;  %v1294_v17 = vadd.f32 %v1293_v1, %v1292_v58  ;;  %v1319_v30 = vmul.f32 %v3942_v36, %v1269_v55  ;;  %v1320_v46 = vmul.f32 %v3944_v20, %v1272_v35 }
 0x20e   :  { %v1343_v11 = vadd.f32 %v1342_v31, %v3958_v62  ;;  %v1289_v39 = vadd.f32 %v1288_v25, %v1287_v45  ;;  %v1295_v51 = vmul.f32 %v1275_v63, %v3939_v14  ;;  %v1314_v44 = vadd.f32 %v1313_v21, %v1312_v41 }
 0x20f   :  { %v1290_v29 = vmul.f32 %v3944_v20, %v3942_v36  ;;  %v1331_v43 = vmul.f32 %v3942_v36, %v3939_v14  ;;  %v1332_v53 = vmul.f32 %v3944_v20, %v1273_v38  ;;  %v1301_v50 = vadd.f32 %v1300_v0, %v1299_v28 }
 0x210   :  { %v1344_v57 = vadd.f32 %v1343_v11, %v3961_v15  ;;  %v1296_v56 = vadd.f32 %v1295_v51, %v1294_v17  ;;  %v1315_v26 = vmul.f32 %v1275_v63, %v1273_v38  ;;  %v1321_v49 = vadd.f32 %v1320_v46, %v1319_v30 }
 0x211   :  { %v1291_v55 = vadd.f32 %v1290_v29, %v1289_v39  ;;  %v1297_v35 = vmul.f32 %v3949_v42, %v3942_v36  ;;  %v1302_v31 = vmul.f32 %v3949_v42, %v3939_v14  ;;  %v1322_v22 = vmul.f32 %v3949_v42, %v1273_v38 }
 0x212   :  { %v1345_v23 = vmax.f32 %v1344_v57, 1e-30  ;;  %v1316_v48 = vadd.f32 %v1315_v26, %v1314_v44  ;;  %v1333_v59 = vadd.f32 %v1332_v53, %v1331_v43  ;;  %v1317_v57 = vmul.f32 %v3949_v42, %v3944_v20 }
 0x213   :  { %v1298_v58 = vadd.f32 %v1297_v35, %v1296_v56  ;;  %v1303_v1 = vadd.f32 %v1302_v31, %v1301_v50  ;;  %v1323_v45 = vadd.f32 %v1322_v22, %v1321_v49  ;;  %v1304_v41 = vmul.f32 %v1277_v47, %v3942_v36 }
 0x214   :  { %2984 = vrcp.f32 %v1345_v23  ;;  %v1334_v21 = vmul.f32 %v3949_v42, %v1275_v63  ;;  %v1318_v28 = vadd.f32 %v1317_v57, %v1316_v48  ;;  %v1324_v14 = vmul.f32 %v1277_v47, %v3944_v20 }
 0x215   :  { %v1305_v17 = vadd.f32 %v1304_v41, %v1303_v1  ;;  %v1336_v51 = vmul.f32 %v1277_v47, %v3949_v42 }
 0x216   :  { %v1325_v30 = vadd.f32 %v1324_v14, %v1323_v45 }
 0x21a   :  { %v2985_v52 = vpop.eup %2984 }
 0x21b   :  { %v1347_v2 = vmul.f32 %v2985_v52, %v1284_v40  ;;  %v1348_v11 = vmul.f32 %v2985_v52, %v1291_v55  ;;  %v3987_v0 = vmul.f32 %v2985_v52, %v1298_v58  ;;  %v1351_v38 = vmul.f32 %v2985_v52, %v1311_v34 }
 0x21c   :  { %v1335_v40 = vadd.f32 %v1334_v21, %v1333_v59  ;;  %v1352_v46 = vmul.f32 %v2985_v52, %v1318_v28  ;;  %v3990_v44 = vmul.f32 %v2985_v52, %v1305_v17  ;;  %v3992_v36 = vmul.f32 %v2985_v52, %v1325_v30 }
 0x21d   :  { %v1357_v23 = vmul.f32 %v1347_v2, %v1347_v2  ;;  %v1358_v25 = vmul.f32 %v1348_v11, %v1348_v11  ;;  %v1360_v63 = vmul.f32 %v3987_v0, %v3987_v0  ;;  %v1385_v29 = vmul.f32 %v1351_v38, %v1351_v38 }
 0x21e   :  { %v1337_v43 = vadd.f32 %v1336_v51, %v1335_v40  ;;  %v1354_v20 = vmul.f32 %v2985_v52, %v3958_v62  ;;  %v1387_v56 = vmul.f32 %v1352_v46, %v1352_v46  ;;  %v1362_v26 = vmul.f32 %v3990_v44, %v3990_v44 }
 0x21f   :  { %v1359_v39 = vadd.f32 %v1358_v25, %v1357_v23  ;;  %v1386_v34 = vadd.f32 %v1385_v29, %v1358_v25  ;;  %v1389_v47 = vmul.f32 %v3992_v36, %v3992_v36  ;;  %v1356_v48 = vmul.f32 %v2985_v52, %v3961_v15 }
 0x220   :  { %v3997_v50 = vmul.f32 %v2985_v52, %v1337_v43  ;;  %v1405_v35 = vadd.f32 %v1387_v56, %v1360_v63  ;;  %v1406_v31 = vmul.f32 %v1354_v20, %v1354_v20  ;;  %v1364_v21 = vmul.f32 %v1348_v11, %v1347_v2 }
 0x221   :  { %v1361_v53 = vadd.f32 %v1360_v63, %v1359_v39  ;;  %v1388_v42 = vadd.f32 %v1387_v56, %v1386_v34  ;;  %v1417_v59 = vadd.f32 %v1389_v47, %v1362_v26  ;;  %v1419_v45 = vmul.f32 %v1356_v48, %v1356_v48 }
 0x222   :  { %v1407_v22 = vadd.f32 %v1406_v31, %v1405_v35  ;;  %v1408_v62 = vmul.f32 %v3997_v50, %v3997_v50  ;;  %v1365_v23 = vmul.f32 %v1351_v38, %v1348_v11  ;;  %v1371_v28 = vmul.f32 %v3987_v0, %v1347_v2 }
 0x223   :  { %v1363_v49 = vadd.f32 %v1362_v26, %v1361_v53  ;;  %v1390_v55 = vadd.f32 %v1389_v47, %v1388_v42  ;;  %v1372_v14 = vmul.f32 %v1352_v46, %v1348_v11  ;;  %v1367_v17 = vmul.f32 %v1352_v46, %v3987_v0 }
 0x224   :  { %v4006_v58 = vadd.f32 %v1408_v62, %v1407_v22  ;;  %v1418_v57 = vadd.f32 %v1417_v59, %v1408_v62  ;;  %v1366_v52 = vadd.f32 %v1365_v23, %v1364_v21  ;;  %v1391_v30 = vmul.f32 %v3987_v0, %v1348_v11 }
 0x225   :  { %v1421_v1 = vadd.f32 %v1390_v55, %v1363_v49  ;;  %v1392_v39 = vmul.f32 %v1352_v46, %v1351_v38  ;;  %v1373_v51 = vadd.f32 %v1372_v14, %v1371_v28  ;;  %v1378_v63 = vmul.f32 %v3990_v44, %v1347_v2 }
 0x226   :  { %v4009_v25 = vadd.f32 %v1419_v45, %v1418_v57  ;;  %v1379_v29 = vmul.f32 %v3992_v36, %v1348_v11  ;;  %v1398_v43 = vmul.f32 %v3990_v44, %v1348_v11  ;;  %v1399_v53 = vmul.f32 %v3992_v36, %v1351_v38 }
 0x227   :  { %v1422_v41 = vadd.f32 %v1421_v1, %v4006_v58  ;;  %v1368_v34 = vadd.f32 %v1367_v17, %v1366_v52  ;;  %v1374_v56 = vmul.f32 %v1354_v20, %v3987_v0  ;;  %v1369_v26 = vmul.f32 %v3992_v36, %v3990_v44 }
 0x228   :  { %v1393_v42 = vadd.f32 %v1392_v39, %v1391_v30  ;;  %v1380_v35 = vadd.f32 %v1379_v29, %v1378_v63  ;;  %v1410_v31 = vmul.f32 %v3990_v44, %v3987_v0  ;;  %v1411_v2 = vmul.f32 %v3992_v36, %v1352_v46 }
 0x229   :  { %v1423_v15 = vadd.f32 %v1422_v41, %v4009_v25  ;;  %v1375_v47 = vadd.f32 %v1374_v56, %v1373_v51  ;;  %v1394_v22 = vmul.f32 %v1354_v20, %v1352_v46  ;;  %v1400_v62 = vadd.f32 %v1399_v53, %v1398_v43 }
 0x22a   :  { %v1370_v11 = vadd.f32 %v1369_v26, %v1368_v34  ;;  %v1376_v38 = vmul.f32 %v3997_v50, %v3990_v44  ;;  %v1381_v1 = vmul.f32 %v3997_v50, %v3987_v0  ;;  %v1401_v45 = vmul.f32 %v3997_v50, %v1352_v46 }
 0x22b   :  { %v1424_v40 = vmax.f32 %v1423_v15, 1e-30  ;;  %v1395_v57 = vadd.f32 %v1394_v22, %v1393_v42  ;;  %v1412_v28 = vadd.f32 %v1411_v2, %v1410_v31  ;;  %v1396_v15 = vmul.f32 %v3997_v50, %v3992_v36 }
 0x22c   :  { %v1377_v21 = vadd.f32 %v1376_v38, %v1375_v47  ;;  %v1382_v23 = vadd.f32 %v1381_v1, %v1380_v35  ;;  %v1402_v52 = vadd.f32 %v1401_v45, %v1400_v62  ;;  %v1413_v17 = vmul.f32 %v3997_v50, %v1354_v20 }
 0x22d   :  { %2986 = vrcp.f32 %v1424_v40  ;;  %v1383_v40 = vmul.f32 %v1356_v48, %v3990_v44  ;;  %v1397_v39 = vadd.f32 %v1396_v15, %v1395_v57  ;;  %v1403_v0 = vmul.f32 %v1356_v48, %v3992_v36 }
 0x22e   :  { %v1415_v34 = vmul.f32 %v1356_v48, %v3997_v50 }
 0x22f   :  { %v1384_v46 = vadd.f32 %v1383_v40, %v1382_v23  ;;  %v1404_v43 = vadd.f32 %v1403_v0, %v1402_v52 }
 0x233   :  { %v2987_v59 = vpop.eup %2986 }
 0x234   :  { %v1426_v41 = vmul.f32 %v2987_v59, %v1363_v49  ;;  %v1427_v14 = vmul.f32 %v2987_v59, %v1370_v11  ;;  %v4034_v30 = vmul.f32 %v2987_v59, %v1377_v21  ;;  %v1414_v49 = vadd.f32 %v1413_v17, %v1412_v28 }
 0x235   :  { %v1430_v63 = vmul.f32 %v2987_v59, %v1390_v55  ;;  %v1431_v53 = vmul.f32 %v2987_v59, %v1397_v39  ;;  %v4038_v56 = vmul.f32 %v2987_v59, %v1384_v46  ;;  %v4042_v20 = vmul.f32 %v2987_v59, %v1404_v43 }
 0x236   :  { %v1436_v51 = vmul.f32 %v1426_v41, %v1426_v41  ;;  %v1437_v29 = vmul.f32 %v1427_v14, %v1427_v14  ;;  %v1439_v44 = vmul.f32 %v4034_v30, %v4034_v30  ;;  %v1416_v42 = vadd.f32 %v1415_v34, %v1414_v49 }
 0x237   :  { %v4045_v36 = vmul.f32 %v2987_v59, %v4006_v58  ;;  %v1464_v35 = vmul.f32 %v1430_v63, %v1430_v63  ;;  %v1466_v55 = vmul.f32 %v1431_v53, %v1431_v53  ;;  %v1441_v50 = vmul.f32 %v4038_v56, %v4038_v56 }
 0x238   :  { %v1438_v26 = vadd.f32 %v1437_v29, %v1436_v51  ;;  %v4047_v31 = vmul.f32 %v2987_v59, %v1416_v42  ;;  %v1468_v2 = vmul.f32 %v4042_v20, %v4042_v20  ;;  %v4056_v58 = vmul.f32 %v2987_v59, %v4009_v25 }
 0x239   :  { %v1465_v48 = vadd.f32 %v1464_v35, %v1437_v29  ;;  %v1484_v11 = vadd.f32 %v1466_v55, %v1439_v44  ;;  %v1485_v38 = vmul.f32 %v4045_v36, %v4045_v36  ;;  %v1443_v40 = vmul.f32 %v1427_v14, %v1426_v41 }
 0x23a   :  { %v1440_v47 = vadd.f32 %v1439_v44, %v1438_v26  ;;  %v1487_v45 = vmul.f32 %v4047_v31, %v4047_v31  ;;  %v1496_v21 = vadd.f32 %v1468_v2, %v1441_v50  ;;  %v1498_v52 = vmul.f32 %v4056_v58, %v4056_v58 }
 0x23b   :  { %v1467_v62 = vadd.f32 %v1466_v55, %v1465_v48  ;;  %v1486_v57 = vadd.f32 %v1485_v38, %v1484_v11  ;;  %v1444_v17 = vmul.f32 %v1430_v63, %v1427_v14  ;;  %v1450_v25 = vmul.f32 %v4034_v30, %v1426_v41 }
 0x23c   :  { %v1442_v22 = vadd.f32 %v1441_v50, %v1440_v47  ;;  %v1497_v15 = vadd.f32 %v1496_v21, %v1487_v45  ;;  %v1451_v59 = vmul.f32 %v1431_v53, %v1427_v14  ;;  %v1470_v49 = vmul.f32 %v4034_v30, %v1427_v14 }
 0x23d   :  { %v1469_v1 = vadd.f32 %v1468_v2, %v1467_v62  ;;  %v4060_v23 = vadd.f32 %v1487_v45, %v1486_v57  ;;  %v1445_v46 = vadd.f32 %v1444_v17, %v1443_v40  ;;  %v1471_v29 = vmul.f32 %v1431_v53, %v1430_v63 }
 0x23e   :  { %v4065_v0 = vadd.f32 %v1498_v52, %v1497_v15  ;;  %v1446_v34 = vmul.f32 %v1431_v53, %v4034_v30  ;;  %v1452_v26 = vadd.f32 %v1451_v59, %v1450_v25  ;;  %v1457_v44 = vmul.f32 %v4038_v56, %v1426_v41 }
 0x23f   :  { %v1500_v28 = vadd.f32 %v1469_v1, %v1442_v22  ;;  %v1458_v42 = vmul.f32 %v4042_v20, %v1427_v14  ;;  %v1477_v47 = vmul.f32 %v4038_v56, %v1427_v14  ;;  %v1478_v35 = vmul.f32 %v4042_v20, %v1430_v63 }
 0x240   :  { %v1447_v55 = vadd.f32 %v1446_v34, %v1445_v46  ;;  %v1453_v50 = vmul.f32 %v4045_v36, %v4034_v30  ;;  %v1472_v48 = vadd.f32 %v1471_v29, %v1470_v49  ;;  %v1448_v2 = vmul.f32 %v4042_v20, %v4038_v56 }
 0x241   :  { %v1501_v39 = vadd.f32 %v1500_v28, %v4060_v23  ;;  %v1489_v62 = vmul.f32 %v4038_v56, %v4034_v30  ;;  %v1490_v41 = vmul.f32 %v4042_v20, %v1431_v53  ;;  %v1473_v38 = vmul.f32 %v4045_v36, %v1431_v53 }
 0x242   :  { %v1454_v11 = vadd.f32 %v1453_v50, %v1452_v26  ;;  %v1459_v14 = vadd.f32 %v1458_v42, %v1457_v44  ;;  %v1479_v57 = vadd.f32 %v1478_v35, %v1477_v47  ;;  %v1449_v63 = vadd.f32 %v1448_v2, %v1447_v55 }
 0x243   :  { %v1502_v51 = vadd.f32 %v1501_v39, %v4065_v0  ;;  %v1474_v21 = vadd.f32 %v1473_v38, %v1472_v48  ;;  %v1455_v28 = vmul.f32 %v4047_v31, %v4038_v56  ;;  %v1460_v15 = vmul.f32 %v4047_v31, %v4034_v30 }
 0x244   :  { %v1480_v52 = vmul.f32 %v4047_v31, %v1431_v53  ;;  %v1491_v40 = vadd.f32 %v1490_v41, %v1489_v62  ;;  %v1462_v49 = vmul.f32 %v4056_v58, %v4038_v56  ;;  %v1492_v29 = vmul.f32 %v4047_v31, %v4045_v36 }
 0x245   :  { %v1503_v43 = vmax.f32 %v1502_v51, 1e-30  ;;  %v1456_v25 = vadd.f32 %v1455_v28, %v1454_v11  ;;  %v1461_v59 = vadd.f32 %v1460_v15, %v1459_v14  ;;  %v1475_v51 = vmul.f32 %v4047_v31, %v4042_v20 }
 0x246   :  { %v1481_v46 = vadd.f32 %v1480_v52, %v1479_v57  ;;  %v1482_v53 = vmul.f32 %v4056_v58, %v4042_v20  ;;  %v1493_v44 = vadd.f32 %v1492_v29, %v1491_v40  ;;  %v1494_v56 = vmul.f32 %v4056_v58, %v4047_v31 }
 0x247   :  { %2988 = vrcp.f32 %v1503_v43  ;;  %v1476_v30 = vadd.f32 %v1475_v51, %v1474_v21  ;;  %v1463_v42 = vadd.f32 %v1462_v49, %v1461_v59 }
 0x248   :  { %v1483_v47 = vadd.f32 %v1482_v53, %v1481_v46  ;;  %v1495_v20 = vadd.f32 %v1494_v56, %v1493_v44 }
 0x24d   :  { %v2989_v45 = vpop.eup %2988 }
 0x24e   :  { %v1505_v17 = vmul.f32 %v2989_v45, %v1442_v22  ;;  %v1506_v39 = vmul.f32 %v2989_v45, %v1449_v63  ;;  %v4096_v22 = vmul.f32 %v2989_v45, %v1456_v25  ;;  %v1509_v26 = vmul.f32 %v2989_v45, %v1469_v1 }
 0x24f   :  { %v1510_v35 = vmul.f32 %v2989_v45, %v1476_v30  ;;  %v4100_v50 = vmul.f32 %v2989_v45, %v1463_v42  ;;  %v4102_v36 = vmul.f32 %v2989_v45, %v1483_v47  ;;  %v1512_v62 = vmul.f32 %v2989_v45, %v4060_v23 }
 0x250   :  { %v1515_v43 = vmul.f32 %v1505_v17, %v1505_v17  ;;  %v1516_v34 = vmul.f32 %v1506_v39, %v1506_v39  ;;  %v1518_v48 = vmul.f32 %v4096_v22, %v4096_v22  ;;  %v1543_v2 = vmul.f32 %v1509_v26, %v1509_v26 }
 0x251   :  { %v1545_v11 = vmul.f32 %v1510_v35, %v1510_v35  ;;  %v4107_v38 = vmul.f32 %v2989_v45, %v1495_v20  ;;  %v1520_v14 = vmul.f32 %v4100_v50, %v4100_v50  ;;  %v1547_v58 = vmul.f32 %v4102_v36, %v4102_v36 }
 0x252   :  { %v1517_v55 = vadd.f32 %v1516_v34, %v1515_v43  ;;  %v1544_v41 = vadd.f32 %v1543_v2, %v1516_v34  ;;  %v1564_v28 = vmul.f32 %v1512_v62, %v1512_v62  ;;  %v1514_v15 = vmul.f32 %v2989_v45, %v4065_v0 }
 0x253   :  { %v1563_v21 = vadd.f32 %v1545_v11, %v1518_v48  ;;  %v1566_v23 = vmul.f32 %v4107_v38, %v4107_v38  ;;  %v1575_v40 = vadd.f32 %v1547_v58, %v1520_v14  ;;  %v1522_v49 = vmul.f32 %v1506_v39, %v1505_v17 }
 0x254   :  { %v1519_v1 = vadd.f32 %v1518_v48, %v1517_v55  ;;  %v1546_v31 = vadd.f32 %v1545_v11, %v1544_v41  ;;  %v1577_v46 = vmul.f32 %v1514_v15, %v1514_v15  ;;  %v1523_v29 = vmul.f32 %v1509_v26, %v1506_v39 }
 0x255   :  { %v1565_v52 = vadd.f32 %v1564_v28, %v1563_v21  ;;  %v1576_v51 = vadd.f32 %v1575_v40, %v1566_v23  ;;  %v1529_v30 = vmul.f32 %v4096_v22, %v1505_v17  ;;  %v1530_v53 = vmul.f32 %v1510_v35, %v1506_v39 }
 0x256   :  { %v1521_v57 = vadd.f32 %v1520_v14, %v1519_v1  ;;  %v1548_v63 = vadd.f32 %v1547_v58, %v1546_v31  ;;  %v1524_v45 = vadd.f32 %v1523_v29, %v1522_v49  ;;  %v1549_v44 = vmul.f32 %v4096_v22, %v1506_v39 }
 0x257   :  { %v4116_v25 = vadd.f32 %v1566_v23, %v1565_v52  ;;  %v4119_v34 = vadd.f32 %v1577_v46, %v1576_v51  ;;  %v1550_v42 = vmul.f32 %v1510_v35, %v1509_v26  ;;  %v1525_v55 = vmul.f32 %v1510_v35, %v4096_v22 }
 0x258   :  { %v1579_v59 = vadd.f32 %v1548_v63, %v1521_v57  ;;  %v1536_v56 = vmul.f32 %v4100_v50, %v1505_v17  ;;  %v1537_v48 = vmul.f32 %v4102_v36, %v1506_v39  ;;  %v1531_v2 = vadd.f32 %v1530_v53, %v1529_v30 }
 0x259   :  { %v1556_v20 = vmul.f32 %v4100_v50, %v1506_v39  ;;  %v1557_v1 = vmul.f32 %v4102_v36, %v1509_v26  ;;  %v1526_v41 = vadd.f32 %v1525_v55, %v1524_v45  ;;  %v1532_v11 = vmul.f32 %v1512_v62, %v4096_v22 }
 0x25a   :  { %v1580_v43 = vadd.f32 %v1579_v59, %v4116_v25  ;;  %v1551_v14 = vadd.f32 %v1550_v42, %v1549_v44  ;;  %v1527_v31 = vmul.f32 %v4102_v36, %v4100_v50  ;;  %v1568_v58 = vmul.f32 %v4100_v50, %v4096_v22 }
 0x25b   :  { %v1569_v17 = vmul.f32 %v4102_v36, %v1510_v35  ;;  %v1533_v21 = vadd.f32 %v1532_v11, %v1531_v2  ;;  %v1538_v28 = vadd.f32 %v1537_v48, %v1536_v56  ;;  %v1552_v52 = vmul.f32 %v1512_v62, %v1510_v35 }
 0x25c   :  { %v1581_v0 = vadd.f32 %v1580_v43, %v4119_v34  ;;  %v1558_v23 = vadd.f32 %v1557_v1, %v1556_v20  ;;  %v1528_v39 = vadd.f32 %v1527_v31, %v1526_v41  ;;  %v1534_v26 = vmul.f32 %v4107_v38, %v4100_v50 }
 0x25d   :  { %v1539_v59 = vmul.f32 %v4107_v38, %v4096_v22  ;;  %v1553_v51 = vadd.f32 %v1552_v52, %v1551_v14  ;;  %v1559_v46 = vmul.f32 %v4107_v38, %v1510_v35  ;;  %v1570_v49 = vadd.f32 %v1569_v17, %v1568_v58 }
 0x25e   :  { %v1582_v47 = vmax.f32 %v1581_v0, 1e-30  ;;  %v1535_v30 = vadd.f32 %v1534_v26, %v1533_v21  ;;  %v1554_v0 = vmul.f32 %v4107_v38, %v4102_v36  ;;  %v1541_v44 = vmul.f32 %v1514_v15, %v4100_v50 }
 0x25f   :  { %v1540_v53 = vadd.f32 %v1539_v59, %v1538_v28  ;;  %v1560_v45 = vadd.f32 %v1559_v46, %v1558_v23  ;;  %v1571_v42 = vmul.f32 %v4107_v38, %v1512_v62  ;;  %v1561_v22 = vmul.f32 %v1514_v15, %v4102_v36 }
 0x260   :  { %2990 = vrcp.f32 %v1582_v47  ;;  %v1555_v56 = vadd.f32 %v1554_v0, %v1553_v51  ;;  %v1573_v11 = vmul.f32 %v1514_v15, %v4107_v38 }
 0x261   :  { %v1572_v2 = vadd.f32 %v1571_v42, %v1570_v49  ;;  %v1562_v20 = vadd.f32 %v1561_v22, %v1560_v45 }
 0x263   :  { %v1574_v17 = vadd.f32 %v1573_v11, %v1572_v2 }
 0x266   :  { %v2991_v40 = vpop.eup %2990 }
 0x267   :  { %v1584_v29 = vmul.f32 %v2991_v40, %v1521_v57  ;;  %v1585_v43 = vmul.f32 %v2991_v40, %v1528_v39  ;;  %v1586_v48 = vmul.f32 %v2991_v40, %v1535_v30  ;;  %v1588_v35 = vmul.f32 %v2991_v40, %v1548_v63 }
 0x268   :  { %v1542_v57 = vadd.f32 %v1541_v44, %v1540_v53  ;;  %v1589_v1 = vmul.f32 %v2991_v40, %v1555_v56  ;;  %v1590_v31 = vmul.f32 %v2991_v40, %v1562_v20  ;;  %v1591_v62 = vmul.f32 %v2991_v40, %v4116_v25 }
 0x269   :  { %v1594_v47 = vmul.f32 %v1584_v29, %v1584_v29  ;;  %v1595_v55 = vmul.f32 %v1585_v43, %v1585_v43  ;;  %v1597_v58 = vmul.f32 %v1586_v48, %v1586_v48  ;;  %v1622_v50 = vmul.f32 %v1588_v35, %v1588_v35 }
 0x26a   :  { %v1587_v14 = vmul.f32 %v2991_v40, %v1542_v57  ;;  %v1624_v52 = vmul.f32 %v1589_v1, %v1589_v1  ;;  %v1592_v36 = vmul.f32 %v2991_v40, %v1574_v17  ;;  %v1626_v39 = vmul.f32 %v1590_v31, %v1590_v31 }
 0x26b   :  { %v1596_v41 = vadd.f32 %v1595_v55, %v1594_v47  ;;  %v1623_v28 = vadd.f32 %v1622_v50, %v1595_v55  ;;  %v1643_v46 = vmul.f32 %v1591_v62, %v1591_v62  ;;  %v1593_v38 = vmul.f32 %v2991_v40, %v4119_v34 }
 0x26c   :  { %v1599_v23 = vmul.f32 %v1587_v14, %v1587_v14  ;;  %v1642_v51 = vadd.f32 %v1624_v52, %v1597_v58  ;;  %v1645_v49 = vmul.f32 %v1592_v36, %v1592_v36  ;;  %v1601_v53 = vmul.f32 %v1585_v43, %v1584_v29 }
 0x26d   :  { %v1598_v21 = vadd.f32 %v1597_v58, %v1596_v41  ;;  %v1625_v63 = vadd.f32 %v1624_v52, %v1623_v28  ;;  %v1602_v0 = vmul.f32 %v1588_v35, %v1585_v43  ;;  %v1608_v44 = vmul.f32 %v1586_v48, %v1584_v29 }
 0x26e   :  { %v1644_v15 = vadd.f32 %v1643_v46, %v1642_v51  ;;  %v1654_v30 = vadd.f32 %v1626_v39, %v1599_v23  ;;  %v1609_v42 = vmul.f32 %v1589_v1, %v1585_v43  ;;  %v1656_v55 = vmul.f32 %v1593_v38, %v1593_v38 }
 0x26f   :  { %v1600_v26 = vadd.f32 %v1599_v23, %v1598_v21  ;;  %v4147_v59 = vadd.f32 %v1626_v39, %v1625_v63  ;;  %v1615_v56 = vmul.f32 %v1587_v14, %v1584_v29  ;;  %v1616_v22 = vmul.f32 %v1590_v31, %v1585_v43 }
 0x270   :  { %v1646_v25 = vadd.f32 %v1645_v49, %v1644_v15  ;;  %v1655_v47 = vadd.f32 %v1654_v30, %v1645_v49  ;;  %v1628_v2 = vmul.f32 %v1586_v48, %v1585_v43  ;;  %v1629_v20 = vmul.f32 %v1589_v1, %v1588_v35 }
 0x271   :  { %v1658_v45 = vadd.f32 %v4147_v59, %v1600_v26  ;;  %v1635_v41 = vmul.f32 %v1587_v14, %v1585_v43  ;;  %v1636_v11 = vmul.f32 %v1590_v31, %v1588_v35  ;;  %v1647_v40 = vmul.f32 %v1587_v14, %v1586_v48 }
 0x272   :  { %v1657_v34 = vadd.f32 %v1656_v55, %v1655_v47  ;;  %v1648_v58 = vmul.f32 %v1590_v31, %v1589_v1  ;;  %v1603_v17 = vadd.f32 %v1602_v0, %v1601_v53  ;;  %v1610_v21 = vadd.f32 %v1609_v42, %v1608_v44 }
 0x273   :  { %v1659_v57 = vadd.f32 %v1658_v45, %v1646_v25  ;;  %v1617_v28 = vadd.f32 %v1616_v22, %v1615_v56  ;;  %v1630_v52 = vadd.f32 %v1629_v20, %v1628_v2  ;;  %v1637_v23 = vadd.f32 %v1636_v11, %v1635_v41 }
 0x274   :  { %v1604_v39 = vmul.f32 %v1589_v1, %v1586_v48  ;;  %v1611_v51 = vmul.f32 %v1591_v62, %v1586_v48  ;;  %v1618_v46 = vmul.f32 %v1592_v36, %v1586_v48  ;;  %v1631_v29 = vmul.f32 %v1591_v62, %v1589_v1 }
 0x275   :  { %v1660_v50 = vadd.f32 %v1659_v57, %v1657_v34  ;;  %v1638_v15 = vmul.f32 %v1592_v36, %v1589_v1  ;;  %v1649_v49 = vadd.f32 %v1648_v58, %v1647_v40  ;;  %v1650_v55 = vmul.f32 %v1592_v36, %v1591_v62 }
 0x276   :  { %v1605_v30 = vadd.f32 %v1604_v39, %v1603_v17  ;;  %v1612_v43 = vadd.f32 %v1611_v51, %v1610_v21  ;;  %v1619_v35 = vadd.f32 %v1618_v46, %v1617_v28  ;;  %v1632_v45 = vadd.f32 %v1631_v29, %v1630_v52 }
 0x277   :  { %v1661_v63 = vmax.f32 %v1660_v50, 1e-30  ;;  %v1639_v47 = vadd.f32 %v1638_v15, %v1637_v23  ;;  %v1606_v57 = vmul.f32 %v1590_v31, %v1587_v14  ;;  %v1613_v53 = vmul.f32 %v1592_v36, %v1587_v14 }
 0x278   :  { %v1620_v0 = vmul.f32 %v1593_v38, %v1587_v14  ;;  %v1633_v44 = vmul.f32 %v1592_v36, %v1590_v31  ;;  %v1640_v42 = vmul.f32 %v1593_v38, %v1590_v31  ;;  %v1651_v56 = vadd.f32 %v1650_v55, %v1649_v49 }
 0x279   :  { %2992 = vrcp.f32 %v1661_v63  ;;  %v1607_v22 = vadd.f32 %v1606_v57, %v1605_v30  ;;  %v1614_v2 = vadd.f32 %v1613_v53, %v1612_v43  ;;  %v1652_v11 = vmul.f32 %v1593_v38, %v1592_v36 }
 0x27a   :  { %v1621_v20 = vadd.f32 %v1620_v0, %v1619_v35  ;;  %v1634_v41 = vadd.f32 %v1633_v44, %v1632_v45  ;;  %v1641_v1 = vadd.f32 %v1640_v42, %v1639_v47 }
 0x27b   :  { %v1653_v17 = vadd.f32 %v1652_v11, %v1651_v56 }
 0x27f   :  { %v2993_v48 = vpop.eup %2992 }
 0x280   :  { %v4151_v40 = vmul.f32 %v2993_v48, %v1600_v26  ;;  %v4153_v58 = vmul.f32 %v2993_v48, %v1607_v22  ;;  %v4155_v50 = vmul.f32 %v2993_v48, %v1614_v2  ;;  %v4157_v62 = vmul.f32 %v2993_v48, %v1621_v20 }
 0x281   :  { %v4160_v14 = vmul.f32 %v2993_v48, %v4147_v59  ;;  %v4162_v31 = vmul.f32 %v2993_v48, %v1634_v41  ;;  %v4164_v21 = vmul.f32 %v2993_v48, %v1641_v1  ;;  %v4166_v28 = vmul.f32 %v2993_v48, %v1646_v25 }
 0x282   :  { %v1673_v36 = vadd.f32 %v4153_v58, %v4151_v40  ;;  %v4170_v26 = vmul.f32 %v2993_v48, %v1653_v17  ;;  %v4183_v46 = vmul.f32 %v2993_v48, %v1657_v34 }
 0x283   :  { %v1676_v38 = vadd.f32 %v4160_v14, %v4153_v58  ;;  %v1679_v52 = vadd.f32 %v4162_v31, %v4155_v50  ;;  %v1682_v59 = vadd.f32 %v4164_v21, %v4157_v62 }
 0x284   :  { %v1674_v23 = vadd.f32 %v1673_v36, %v4155_v50 }
 0x285   :  { %v1677_v63 = vadd.f32 %v1676_v38, %v4162_v31  ;;  %v1680_v25 = vadd.f32 %v1679_v52, %v4166_v28  ;;  %v1683_v39 = vadd.f32 %v1682_v59, %v4170_v26 }
 0x286   :  { %v1675_v51 = vadd.f32 %v1674_v23, %v4157_v62 }
 0x287   :  { %v1678_v29 = vadd.f32 %v1677_v63, %v4164_v21  ;;  %v1681_v15 = vadd.f32 %v1680_v25, %v4170_v26  ;;  %v1684_v30 = vadd.f32 %v1683_v39, %v4183_v46 }
 0x288   :  { %v1685_v49 = vmul.f32 %v1675_v51, %v1675_v51 }
 0x289   :  { %v1686_v43 = vmul.f32 %v1678_v29, %v1678_v29  ;;  %v1688_v45 = vmul.f32 %v1681_v15, %v1681_v15  ;;  %v1690_v55 = vmul.f32 %v1684_v30, %v1684_v30 }
 0x28b   :  { %v1687_v35 = vadd.f32 %v1686_v43, %v1685_v49 }
 0x28d   :  { %v1689_v47 = vadd.f32 %v1688_v45, %v1687_v35 }
 0x28f   :  { %v1691_v57 = vadd.f32 %v1690_v55, %v1689_v47 }
 0x291   :  { %v1692_v53 = vmax.f32 %v1691_v57, 1e-30 }
 0x293   :  { %2994 = vrsqrt.f32 %v1692_v53  ;;  %vm1699_vm3 = vweird.f32 %v1692_v53 }
 0x299   :  { %v2995_v0 = vpop.eup %2994 }
 0x29a   :  { %v1694_v44 = vmul.f32 %v2995_v0, %v1692_v53  ;;  %vm1700_vm2 = vweird.f32 %v2995_v0 }
 0x29b   :  { %vm1701_vm4 = vmor %vm1699_vm3, %vm1700_vm2 }
 0x29c   :  { %v1695_v42 = vmul.f32 %v2995_v0, %v1694_v44 }
 0x29e   :  { %v1696_v34 = vmul.f32 0.5, %v1695_v42 }
 0x2a0   :  { %v1697_v56 = vsub.f32 1.5, %v1696_v34 }
 0x2a2   :  { %v1698_v22 = vmul.f32 %v2995_v0, %v1697_v56 }
 0x2a4   :  { %v1702_v2 = vsel %vm1701_vm4, %v2995_v0, %v1698_v22 }
 0x2a5   :  { %v1703_v20 = vmul.f32 %v1702_v2, %v1675_v51  ;;  %v1704_v48 = vmul.f32 %v1702_v2, %v1678_v29  ;;  %v1705_v41 = vmul.f32 %v1702_v2, %v1681_v15  ;;  %v1706_v1 = vmul.f32 %v1702_v2, %v1684_v30 }
 0x2a7   :  { %v1707_v11 = vmul.f32 %v1703_v20, %v4151_v40  ;;  %v1708_v17 = vmul.f32 %v1704_v48, %v4153_v58  ;;  %v1714_v36 = vmul.f32 %v1703_v20, %v4153_v58  ;;  %v1715_v38 = vmul.f32 %v1704_v48, %v4160_v14 }
 0x2a8   :  { %v1710_v59 = vmul.f32 %v1705_v41, %v4155_v50  ;;  %v1721_v23 = vmul.f32 %v1703_v20, %v4155_v50  ;;  %v1722_v63 = vmul.f32 %v1704_v48, %v4162_v31  ;;  %v1717_v39 = vmul.f32 %v1705_v41, %v4162_v31 }
 0x2a9   :  { %v1709_v52 = vadd.f32 %v1708_v17, %v1707_v11  ;;  %v1716_v25 = vadd.f32 %v1715_v38, %v1714_v36  ;;  %v1728_v51 = vmul.f32 %v1703_v20, %v4157_v62  ;;  %v1729_v29 = vmul.f32 %v1704_v48, %v4164_v21 }
 0x2aa   :  { %v1712_v49 = vmul.f32 %v1706_v1, %v4157_v62  ;;  %v1723_v30 = vadd.f32 %v1722_v63, %v1721_v23  ;;  %v1724_v43 = vmul.f32 %v1705_v41, %v4166_v28  ;;  %v1719_v45 = vmul.f32 %v1706_v1, %v4164_v21 }
 0x2ab   :  { %v1711_v15 = vadd.f32 %v1710_v59, %v1709_v52  ;;  %v1718_v35 = vadd.f32 %v1717_v39, %v1716_v25  ;;  %v1730_v47 = vadd.f32 %v1729_v29, %v1728_v51  ;;  %v1731_v55 = vmul.f32 %v1705_v41, %v4170_v26 }
 0x2ac   :  { %v1725_v53 = vadd.f32 %v1724_v43, %v1723_v30  ;;  %v1726_v0 = vmul.f32 %v1706_v1, %v4170_v26  ;;  %v1733_v34 = vmul.f32 %v1706_v1, %v4183_v46 }
 0x2ad   :  { %v1713_v57 = vadd.f32 %v1712_v49, %v1711_v15  ;;  %v1720_v44 = vadd.f32 %v1719_v45, %v1718_v35  ;;  %v1732_v42 = vadd.f32 %v1731_v55, %v1730_v47 }
 0x2ae   :  { %v1727_v56 = vadd.f32 %v1726_v0, %v1725_v53 }
 0x2af   :  { %v1735_v22 = vmul.f32 %v1713_v57, %v1713_v57  ;;  %v1734_v2 = vadd.f32 %v1733_v34, %v1732_v42  ;;  %v1736_v20 = vmul.f32 %v1720_v44, %v1720_v44 }
 0x2b0   :  { %v1738_v11 = vmul.f32 %v1727_v56, %v1727_v56 }
 0x2b1   :  { %v1737_v48 = vadd.f32 %v1736_v20, %v1735_v22  ;;  %v1740_v36 = vmul.f32 %v1734_v2, %v1734_v2 }
 0x2b3   :  { %v1739_v17 = vadd.f32 %v1738_v11, %v1737_v48 }
 0x2b5   :  { %v1741_v38 = vadd.f32 %v1740_v36, %v1739_v17 }
 0x2b7   :  { %v1742_v52 = vmax.f32 %v1741_v38, 1e-30 }
 0x2b9   :  { %2996 = vrsqrt.f32 %v1742_v52  ;;  %vm1749_vm6 = vweird.f32 %v1742_v52 }
 0x2bf   :  { %v2997_v41 = vpop.eup %2996 }
 0x2c0   :  { %v1744_v59 = vmul.f32 %v2997_v41, %v1742_v52  ;;  %vm1750_vm5 = vweird.f32 %v2997_v41 }
 0x2c1   :  { %vm1751_vm7 = vmor %vm1749_vm6, %vm1750_vm5 }
 0x2c2   :  { %v1745_v23 = vmul.f32 %v2997_v41, %v1744_v59 }
 0x2c4   :  { %v1746_v63 = vmul.f32 0.5, %v1745_v23 }
 0x2c6   :  { %v1747_v25 = vsub.f32 1.5, %v1746_v63 }
 0x2c8   :  { %v1748_v39 = vmul.f32 %v2997_v41, %v1747_v25 }
 0x2ca   :  { %v1752_v1 = vsel %vm1751_vm7, %v2997_v41, %v1748_v39 }
 0x2cb   :  { %v1753_v51 = vmul.f32 %v1752_v1, %v1713_v57  ;;  %v1754_v29 = vmul.f32 %v1752_v1, %v1720_v44  ;;  %v1755_v15 = vmul.f32 %v1752_v1, %v1727_v56  ;;  %v1756_v49 = vmul.f32 %v1752_v1, %v1734_v2 }
 0x2cd   :  { %v1757_v30 = vmul.f32 %v1753_v51, %v4151_v40  ;;  %v1758_v43 = vmul.f32 %v1754_v29, %v4153_v58  ;;  %v1764_v35 = vmul.f32 %v1753_v51, %v4153_v58  ;;  %v1765_v45 = vmul.f32 %v1754_v29, %v4160_v14 }
 0x2ce   :  { %v1760_v55 = vmul.f32 %v1755_v15, %v4155_v50  ;;  %v1771_v53 = vmul.f32 %v1753_v51, %v4155_v50  ;;  %v1772_v0 = vmul.f32 %v1754_v29, %v4162_v31  ;;  %v1767_v57 = vmul.f32 %v1755_v15, %v4162_v31 }
 0x2cf   :  { %v1759_v47 = vadd.f32 %v1758_v43, %v1757_v30  ;;  %v1766_v42 = vadd.f32 %v1765_v45, %v1764_v35  ;;  %v1778_v44 = vmul.f32 %v1753_v51, %v4157_v62  ;;  %v1779_v34 = vmul.f32 %v1754_v29, %v4164_v21 }
 0x2d0   :  { %v1762_v22 = vmul.f32 %v1756_v49, %v4157_v62  ;;  %v1773_v2 = vadd.f32 %v1772_v0, %v1771_v53  ;;  %v1774_v20 = vmul.f32 %v1755_v15, %v4166_v28  ;;  %v1769_v11 = vmul.f32 %v1756_v49, %v4164_v21 }
 0x2d1   :  { %v1761_v56 = vadd.f32 %v1760_v55, %v1759_v47  ;;  %v1768_v48 = vadd.f32 %v1767_v57, %v1766_v42  ;;  %v1780_v17 = vadd.f32 %v1779_v34, %v1778_v44  ;;  %v1781_v36 = vmul.f32 %v1755_v15, %v4170_v26 }
 0x2d2   :  { %v1775_v52 = vadd.f32 %v1774_v20, %v1773_v2  ;;  %v1776_v41 = vmul.f32 %v1756_v49, %v4170_v26  ;;  %v1783_v63 = vmul.f32 %v1756_v49, %v4183_v46 }
 0x2d3   :  { %v1763_v38 = vadd.f32 %v1762_v22, %v1761_v56  ;;  %v1770_v59 = vadd.f32 %v1769_v11, %v1768_v48  ;;  %v1782_v23 = vadd.f32 %v1781_v36, %v1780_v17 }
 0x2d4   :  { %v1777_v25 = vadd.f32 %v1776_v41, %v1775_v52 }
 0x2d5   :  { %v1785_v39 = vmul.f32 %v1763_v38, %v1763_v38  ;;  %v1784_v1 = vadd.f32 %v1783_v63, %v1782_v23  ;;  %v1786_v51 = vmul.f32 %v1770_v59, %v1770_v59 }
 0x2d6   :  { %v1788_v30 = vmul.f32 %v1777_v25, %v1777_v25 }
 0x2d7   :  { %v1787_v29 = vadd.f32 %v1786_v51, %v1785_v39  ;;  %v1790_v35 = vmul.f32 %v1784_v1, %v1784_v1 }
 0x2d9   :  { %v1789_v43 = vadd.f32 %v1788_v30, %v1787_v29 }
 0x2db   :  { %v1791_v45 = vadd.f32 %v1790_v35, %v1789_v43 }
 0x2dd   :  { %v1792_v47 = vmax.f32 %v1791_v45, 1e-30 }
 0x2df   :  { %2998 = vrsqrt.f32 %v1792_v47  ;;  %vm1799_vm9 = vweird.f32 %v1792_v47 }
 0x2e5   :  { %v2999_v15 = vpop.eup %2998 }
 0x2e6   :  { %v1794_v55 = vmul.f32 %v2999_v15, %v1792_v47  ;;  %vm1800_vm8 = vweird.f32 %v2999_v15 }
 0x2e7   :  { %vm1801_vm10 = vmor %vm1799_vm9, %vm1800_vm8 }
 0x2e8   :  { %v1795_v53 = vmul.f32 %v2999_v15, %v1794_v55 }
 0x2ea   :  { %v1796_v0 = vmul.f32 0.5, %v1795_v53 }
 0x2ec   :  { %v1797_v42 = vsub.f32 1.5, %v1796_v0 }
 0x2ee   :  { %v1798_v57 = vmul.f32 %v2999_v15, %v1797_v42 }
 0x2f0   :  { %v1802_v49 = vsel %vm1801_vm10, %v2999_v15, %v1798_v57 }
 0x2f1   :  { %v1803_v44 = vmul.f32 %v1802_v49, %v1763_v38  ;;  %v1804_v34 = vmul.f32 %v1802_v49, %v1770_v59  ;;  %v1805_v56 = vmul.f32 %v1802_v49, %v1777_v25  ;;  %v1806_v22 = vmul.f32 %v1802_v49, %v1784_v1 }
 0x2f3   :  { %v1807_v2 = vmul.f32 %v1803_v44, %v4151_v40  ;;  %v1808_v20 = vmul.f32 %v1804_v34, %v4153_v58  ;;  %v1814_v48 = vmul.f32 %v1803_v44, %v4153_v58  ;;  %v1815_v11 = vmul.f32 %v1804_v34, %v4160_v14 }
 0x2f4   :  { %v1810_v36 = vmul.f32 %v1805_v56, %v4155_v50  ;;  %v1821_v52 = vmul.f32 %v1803_v44, %v4155_v50  ;;  %v1822_v41 = vmul.f32 %v1804_v34, %v4162_v31  ;;  %v1817_v38 = vmul.f32 %v1805_v56, %v4162_v31 }
 0x2f5   :  { %v1809_v17 = vadd.f32 %v1808_v20, %v1807_v2  ;;  %v1816_v23 = vadd.f32 %v1815_v11, %v1814_v48  ;;  %v1828_v59 = vmul.f32 %v1803_v44, %v4157_v62  ;;  %v1829_v40 = vmul.f32 %v1804_v34, %v4164_v21 }
 0x2f6   :  { %v1812_v25 = vmul.f32 %v1806_v22, %v4157_v62  ;;  %v1823_v58 = vadd.f32 %v1822_v41, %v1821_v52  ;;  %v1824_v14 = vmul.f32 %v1805_v56, %v4166_v28  ;;  %v1819_v1 = vmul.f32 %v1806_v22, %v4164_v21 }
 0x2f7   :  { %v1811_v63 = vadd.f32 %v1810_v36, %v1809_v17  ;;  %v1818_v39 = vadd.f32 %v1817_v38, %v1816_v23  ;;  %v1830_v51 = vadd.f32 %v1829_v40, %v1828_v59  ;;  %v1831_v50 = vmul.f32 %v1805_v56, %v4170_v26 }
 0x2f8   :  { %v1825_v30 = vadd.f32 %v1824_v14, %v1823_v58  ;;  %v1826_v31 = vmul.f32 %v1806_v22, %v4170_v26  ;;  %v1833_v45 = vmul.f32 %v1806_v22, %v4183_v46 }
 0x2f9   :  { %v1813_v29 = vadd.f32 %v1812_v25, %v1811_v63  ;;  %v1820_v43 = vadd.f32 %v1819_v1, %v1818_v39  ;;  %v1832_v35 = vadd.f32 %v1831_v50, %v1830_v51 }
 0x2fa   :  { %v1827_v47 = vadd.f32 %v1826_v31, %v1825_v30 }
 0x2fb   :  { %v1835_v15 = vmul.f32 %v1813_v29, %v1813_v29  ;;  %v1834_v62 = vadd.f32 %v1833_v45, %v1832_v35  ;;  %v1836_v55 = vmul.f32 %v1820_v43, %v1820_v43 }
 0x2fc   :  { %v1838_v28 = vmul.f32 %v1827_v47, %v1827_v47 }
 0x2fd   :  { %v1837_v53 = vadd.f32 %v1836_v55, %v1835_v15  ;;  %v1840_v42 = vmul.f32 %v1834_v62, %v1834_v62 }
 0x2ff   :  { %v1839_v0 = vadd.f32 %v1838_v28, %v1837_v53 }
 0x301   :  { %v1841_v21 = vadd.f32 %v1840_v42, %v1839_v0 }
 0x303   :  { %v1842_v57 = vmax.f32 %v1841_v21, 1e-30 }
 0x305   :  { %3000 = vrsqrt.f32 %v1842_v57  ;;  %vm1849_vm12 = vweird.f32 %v1842_v57 }
 0x30b   :  { %v3001_v49 = vpop.eup %3000 }
 0x30c   :  { %v1844_v44 = vmul.f32 %v3001_v49, %v1842_v57  ;;  %vm1850_vm11 = vweird.f32 %v3001_v49 }
 0x30d   :  { %vm1851_vm13 = vmor %vm1849_vm12, %vm1850_vm11 }
 0x30e   :  { %v1845_v34 = vmul.f32 %v3001_v49, %v1844_v44 }
 0x310   :  { %v1846_v56 = vmul.f32 0.5, %v1845_v34 }
 0x312   :  { %v1847_v26 = vsub.f32 1.5, %v1846_v56 }
 0x314   :  { %v1848_v2 = vmul.f32 %v3001_v49, %v1847_v26 }
 0x316   :  { %v1852_v46 = vsel %vm1851_vm13, %v3001_v49, %v1848_v2 }
 0x317   :  { %v1853_v22 = vmul.f32 %v1852_v46, %v1813_v29  ;;  %v1854_v20 = vmul.f32 %v1852_v46, %v1820_v43  ;;  %v1855_v48 = vmul.f32 %v1852_v46, %v1827_v47  ;;  %v1856_v11 = vmul.f32 %v1852_v46, %v1834_v62 }
 0x319   :  { %v1857_v17 = vmul.f32 %v1853_v22, %v3750_v60  ;;  %v1858_v36 = vmul.f32 %v1854_v20, %v3752_v61  ;;  %v1864_v52 = vmul.f32 %v1853_v22, %v3752_v61  ;;  %v1865_v41 = vmul.f32 %v1854_v20, %v3760_v13 }
 0x31a   :  { %v1860_v38 = vmul.f32 %v1855_v48, %v3758_v12  ;;  %v1871_v59 = vmul.f32 %v1853_v22, %v3758_v12  ;;  %v1872_v40 = vmul.f32 %v1854_v20, %v3762_v16  ;;  %v1867_v25 = vmul.f32 %v1855_v48, %v3762_v16 }
 0x31b   :  { %v1859_v23 = vadd.f32 %v1858_v36, %v1857_v17  ;;  %v1866_v63 = vadd.f32 %v1865_v41, %v1864_v52  ;;  %v1878_v58 = vmul.f32 %v1853_v22, %v3764_v18  ;;  %v1879_v14 = vmul.f32 %v1854_v20, %v3766_v19 }
 0x31c   :  { %v1862_v1 = vmul.f32 %v1856_v11, %v3764_v18  ;;  %v1873_v51 = vadd.f32 %v1872_v40, %v1871_v59  ;;  %v1874_v50 = vmul.f32 %v1855_v48, %v3772_v24  ;;  %v1869_v30 = vmul.f32 %v1856_v11, %v3766_v19 }
 0x31d   :  { %v1861_v39 = vadd.f32 %v1860_v38, %v1859_v23  ;;  %v1868_v29 = vadd.f32 %v1867_v25, %v1866_v63  ;;  %v1880_v31 = vadd.f32 %v1879_v14, %v1878_v58  ;;  %v1881_v43 = vmul.f32 %v1855_v48, %v3776_v27 }
 0x31e   :  { %v1875_v45 = vadd.f32 %v1874_v50, %v1873_v51  ;;  %v1876_v47 = vmul.f32 %v1856_v11, %v3776_v27  ;;  %v1883_v55 = vmul.f32 %v1856_v11, %v3784_v37 }
 0x31f   :  { %v1863_v35 = vadd.f32 %v1862_v1, %v1861_v39  ;;  %v1870_v15 = vadd.f32 %v1869_v30, %v1868_v29  ;;  %v1882_v62 = vadd.f32 %v1881_v43, %v1880_v31 }
 0x320   :  { %v1877_v53 = vadd.f32 %v1876_v47, %v1875_v45 }
 0x321   :  { %v1885_v28 = vmul.f32 %v1863_v35, %v1863_v35  ;;  %v1884_v0 = vadd.f32 %v1883_v55, %v1882_v62  ;;  %v1886_v42 = vmul.f32 %v1870_v15, %v1870_v15 }
 0x322   :  { %v1888_v57 = vmul.f32 %v1877_v53, %v1877_v53 }
 0x323   :  { %v1887_v21 = vadd.f32 %v1886_v42, %v1885_v28  ;;  %v1890_v44 = vmul.f32 %v1884_v0, %v1884_v0 }
 0x325   :  { %v1889_v49 = vadd.f32 %v1888_v57, %v1887_v21 }
 0x327   :  { %v1891_v34 = vadd.f32 %v1890_v44, %v1889_v49 }
 0x329   :  { %v1892_v56 = vmax.f32 %v1891_v34, 1e-30 }
 0x32b   :  { %3002 = vrsqrt.f32 %v1892_v56  ;;  %vm1899_vm15 = vweird.f32 %v1892_v56 }
 0x331   :  { %v3003_v26 = vpop.eup %3002 }
 0x332   :  { %v1894_v2 = vmul.f32 %v3003_v26, %v1892_v56  ;;  %vm1900_vm14 = vweird.f32 %v3003_v26 }
 0x333   :  { %vm1901_vm2 = vmor %vm1899_vm15, %vm1900_vm14 }
 0x334   :  { %v1895_v46 = vmul.f32 %v3003_v26, %v1894_v2 }
 0x336   :  { %v1896_v22 = vmul.f32 0.5, %v1895_v46 }
 0x338   :  { %v1897_v20 = vsub.f32 1.5, %v1896_v22 }
 0x33a   :  { %v1898_v48 = vmul.f32 %v3003_v26, %v1897_v20 }
 0x33c   :  { %v1902_v11 = vsel %vm1901_vm2, %v3003_v26, %v1898_v48 }
 0x33d   :  { %v1903_v17 = vmul.f32 %v1902_v11, %v1863_v35  ;;  %v1904_v36 = vmul.f32 %v1902_v11, %v1870_v15  ;;  %v1905_v52 = vmul.f32 %v1902_v11, %v1877_v53  ;;  %v1906_v41 = vmul.f32 %v1902_v11, %v1884_v0 }
 0x33f   :  { %v1907_v23 = vmul.f32 %v1903_v17, %v3750_v60  ;;  %v1908_v38 = vmul.f32 %v1904_v36, %v3752_v61  ;;  %v1914_v59 = vmul.f32 %v1903_v17, %v3752_v61  ;;  %v1915_v40 = vmul.f32 %v1904_v36, %v3760_v13 }
 0x340   :  { %v1910_v25 = vmul.f32 %v1905_v52, %v3758_v12  ;;  %v1921_v58 = vmul.f32 %v1903_v17, %v3758_v12  ;;  %v1922_v14 = vmul.f32 %v1904_v36, %v3762_v16  ;;  %v1917_v1 = vmul.f32 %v1905_v52, %v3762_v16 }
 0x341   :  { %v1909_v63 = vadd.f32 %v1908_v38, %v1907_v23  ;;  %v1916_v39 = vadd.f32 %v1915_v40, %v1914_v59  ;;  %v1928_v51 = vmul.f32 %v1903_v17, %v3764_v18  ;;  %v1929_v50 = vmul.f32 %v1904_v36, %v3766_v19 }
 0x342   :  { %v1912_v30 = vmul.f32 %v1906_v41, %v3764_v18  ;;  %v1923_v31 = vadd.f32 %v1922_v14, %v1921_v58  ;;  %v1924_v43 = vmul.f32 %v1905_v52, %v3772_v24  ;;  %v1919_v45 = vmul.f32 %v1906_v41, %v3766_v19 }
 0x343   :  { %v1911_v29 = vadd.f32 %v1910_v25, %v1909_v63  ;;  %v1918_v35 = vadd.f32 %v1917_v1, %v1916_v39  ;;  %v1930_v47 = vadd.f32 %v1929_v50, %v1928_v51  ;;  %v1931_v15 = vmul.f32 %v1905_v52, %v3776_v27 }
 0x344   :  { %v1925_v55 = vadd.f32 %v1924_v43, %v1923_v31  ;;  %v1926_v53 = vmul.f32 %v1906_v41, %v3776_v27  ;;  %v1933_v42 = vmul.f32 %v1906_v41, %v3784_v37 }
 0x345   :  { %v1913_v62 = vadd.f32 %v1912_v30, %v1911_v29  ;;  %v1920_v28 = vadd.f32 %v1919_v45, %v1918_v35  ;;  %v1932_v0 = vadd.f32 %v1931_v15, %v1930_v47 }
 0x346   :  { %v1927_v21 = vadd.f32 %v1926_v53, %v1925_v55 }
 0x347   :  { %v1935_v57 = vmul.f32 %v1913_v62, %v1913_v62  ;;  %v1934_v49 = vadd.f32 %v1933_v42, %v1932_v0  ;;  %v1936_v44 = vmul.f32 %v1920_v28, %v1920_v28 }
 0x348   :  { %v1938_v56 = vmul.f32 %v1927_v21, %v1927_v21 }
 0x349   :  { %v1937_v34 = vadd.f32 %v1936_v44, %v1935_v57  ;;  %v1940_v2 = vmul.f32 %v1934_v49, %v1934_v49 }
 0x34b   :  { %v1939_v26 = vadd.f32 %v1938_v56, %v1937_v34 }
 0x34d   :  { %v1941_v46 = vadd.f32 %v1940_v2, %v1939_v26 }
 0x34f   :  { %v1942_v22 = vmax.f32 %v1941_v46, 1e-30 }
 0x351   :  { %3004 = vrsqrt.f32 %v1942_v22  ;;  %vm1949_vm4 = vweird.f32 %v1942_v22 }
 0x357   :  { %v3005_v20 = vpop.eup %3004 }
 0x358   :  { %v1944_v48 = vmul.f32 %v3005_v20, %v1942_v22  ;;  %vm1950_vm3 = vweird.f32 %v3005_v20 }
 0x359   :  { %vm1951_vm5 = vmor %vm1949_vm4, %vm1950_vm3  ;;  %vm2238_vm4 = vcmask 1044480  }
 0x35a   :  { %v1945_v11 = vmul.f32 %v3005_v20, %v1944_v48 }
 0x35c   :  { %v1946_v17 = vmul.f32 0.5, %v1945_v11 }
 0x35e   :  { %v1947_v36 = vsub.f32 1.5, %v1946_v17 }
 0x360   :  { %v1948_v52 = vmul.f32 %v3005_v20, %v1947_v36 }
 0x362   :  { %v1952_v41 = vsel %vm1951_vm5, %v3005_v20, %v1948_v52 }
 0x363   :  { %v1953_v23 = vmul.f32 %v1952_v41, %v1913_v62  ;;  %v1954_v38 = vmul.f32 %v1952_v41, %v1920_v28  ;;  %v1955_v59 = vmul.f32 %v1952_v41, %v1927_v21  ;;  %v1956_v40 = vmul.f32 %v1952_v41, %v1934_v49 }
 0x365   :  { %v1957_v63 = vmul.f32 %v1953_v23, %v3750_v60  ;;  %v1958_v25 = vmul.f32 %v1954_v38, %v3752_v61  ;;  %v1964_v58 = vmul.f32 %v1953_v23, %v3752_v61  ;;  %v1965_v14 = vmul.f32 %v1954_v38, %v3760_v13 }
 0x366   :  { %v1960_v1 = vmul.f32 %v1955_v59, %v3758_v12  ;;  %v1971_v51 = vmul.f32 %v1953_v23, %v3758_v12  ;;  %v1972_v50 = vmul.f32 %v1954_v38, %v3762_v16  ;;  %v1967_v30 = vmul.f32 %v1955_v59, %v3762_v16 }
 0x367   :  { %v1959_v39 = vadd.f32 %v1958_v25, %v1957_v63  ;;  %v1966_v29 = vadd.f32 %v1965_v14, %v1964_v58  ;;  %v1978_v31 = vmul.f32 %v1953_v23, %v3764_v18  ;;  %v1979_v43 = vmul.f32 %v1954_v38, %v3766_v19 }
 0x368   :  { %v1962_v45 = vmul.f32 %v1956_v40, %v3764_v18  ;;  %v1973_v47 = vadd.f32 %v1972_v50, %v1971_v51  ;;  %v1974_v15 = vmul.f32 %v1955_v59, %v3772_v24  ;;  %v1969_v55 = vmul.f32 %v1956_v40, %v3766_v19 }
 0x369   :  { %v1961_v35 = vadd.f32 %v1960_v1, %v1959_v39  ;;  %v1968_v62 = vadd.f32 %v1967_v30, %v1966_v29  ;;  %v1980_v53 = vadd.f32 %v1979_v43, %v1978_v31  ;;  %v1981_v28 = vmul.f32 %v1955_v59, %v3776_v27 }
 0x36a   :  { %v1975_v42 = vadd.f32 %v1974_v15, %v1973_v47  ;;  %v1976_v21 = vmul.f32 %v1956_v40, %v3776_v27  ;;  %v1983_v44 = vmul.f32 %v1956_v40, %v3784_v37 }
 0x36b   :  { %v1963_v0 = vadd.f32 %v1962_v45, %v1961_v35  ;;  %v1970_v57 = vadd.f32 %v1969_v55, %v1968_v62  ;;  %v1982_v49 = vadd.f32 %v1981_v28, %v1980_v53 }
 0x36c   :  { %v1977_v34 = vadd.f32 %v1976_v21, %v1975_v42 }
 0x36d   :  { %v1985_v56 = vmul.f32 %v1963_v0, %v1963_v0  ;;  %v1984_v26 = vadd.f32 %v1983_v44, %v1982_v49  ;;  %v1986_v2 = vmul.f32 %v1970_v57, %v1970_v57 }
 0x36e   :  { %v1988_v22 = vmul.f32 %v1977_v34, %v1977_v34 }
 0x36f   :  { %v1987_v46 = vadd.f32 %v1986_v2, %v1985_v56  ;;  %v1990_v48 = vmul.f32 %v1984_v26, %v1984_v26 }
 0x371   :  { %v1989_v20 = vadd.f32 %v1988_v22, %v1987_v46 }
 0x373   :  { %v1991_v11 = vadd.f32 %v1990_v48, %v1989_v20 }
 0x375   :  { %v1992_v17 = vmax.f32 %v1991_v11, 1e-30 }
 0x377   :  { %3006 = vrsqrt.f32 %v1992_v17  ;;  %vm1999_vm7 = vweird.f32 %v1992_v17 }
 0x37d   :  { %v3007_v36 = vpop.eup %3006 }
 0x37e   :  { %v1994_v52 = vmul.f32 %v3007_v36, %v1992_v17  ;;  %vm2000_vm6 = vweird.f32 %v3007_v36 }
 0x37f   :  { %vm2001_vm8 = vmor %vm1999_vm7, %vm2000_vm6  ;;  %vm2213_vm7 = vcmask 80896  }
 0x380   :  { %v1995_v41 = vmul.f32 %v3007_v36, %v1994_v52 }
 0x382   :  { %v1996_v23 = vmul.f32 0.5, %v1995_v41 }
 0x384   :  { %v1997_v38 = vsub.f32 1.5, %v1996_v23 }
 0x386   :  { %v1998_v59 = vmul.f32 %v3007_v36, %v1997_v38 }
 0x388   :  { %v2002_v40 = vsel %vm2001_vm8, %v3007_v36, %v1998_v59 }
 0x389   :  { %v2003_v63 = vmul.f32 %v2002_v40, %v1963_v0  ;;  %v2004_v25 = vmul.f32 %v2002_v40, %v1970_v57  ;;  %v2005_v58 = vmul.f32 %v2002_v40, %v1977_v34  ;;  %v2006_v14 = vmul.f32 %v2002_v40, %v1984_v26 }
 0x38b   :  { %v2007_v39 = vmul.f32 %v2003_v63, %v3750_v60  ;;  %v2008_v1 = vmul.f32 %v2004_v25, %v3752_v61  ;;  %v2014_v51 = vmul.f32 %v2003_v63, %v3752_v61  ;;  %v2015_v50 = vmul.f32 %v2004_v25, %v3760_v13 }
 0x38c   :  { %v2010_v30 = vmul.f32 %v2005_v58, %v3758_v12  ;;  %v2021_v31 = vmul.f32 %v2003_v63, %v3758_v12  ;;  %v2022_v43 = vmul.f32 %v2004_v25, %v3762_v16  ;;  %v2017_v45 = vmul.f32 %v2005_v58, %v3762_v16 }
 0x38d   :  { %v2009_v29 = vadd.f32 %v2008_v1, %v2007_v39  ;;  %v2016_v35 = vadd.f32 %v2015_v50, %v2014_v51  ;;  %v2028_v47 = vmul.f32 %v2003_v63, %v3764_v18  ;;  %v2029_v15 = vmul.f32 %v2004_v25, %v3766_v19 }
 0x38e   :  { %v2012_v55 = vmul.f32 %v2006_v14, %v3764_v18  ;;  %v2023_v53 = vadd.f32 %v2022_v43, %v2021_v31  ;;  %v2024_v28 = vmul.f32 %v2005_v58, %v3772_v24  ;;  %v2019_v42 = vmul.f32 %v2006_v14, %v3766_v19 }
 0x38f   :  { %v2011_v62 = vadd.f32 %v2010_v30, %v2009_v29  ;;  %v2018_v0 = vadd.f32 %v2017_v45, %v2016_v35  ;;  %v2030_v21 = vadd.f32 %v2029_v15, %v2028_v47  ;;  %v2031_v57 = vmul.f32 %v2005_v58, %v3776_v27 }
 0x390   :  { %v2025_v44 = vadd.f32 %v2024_v28, %v2023_v53  ;;  %v2026_v34 = vmul.f32 %v2006_v14, %v3776_v27  ;;  %v2033_v2 = vmul.f32 %v2006_v14, %v3784_v37 }
 0x391   :  { %v2013_v49 = vadd.f32 %v2012_v55, %v2011_v62  ;;  %v2020_v56 = vadd.f32 %v2019_v42, %v2018_v0  ;;  %v2032_v26 = vadd.f32 %v2031_v57, %v2030_v21 }
 0x392   :  { %v2027_v46 = vadd.f32 %v2026_v34, %v2025_v44 }
 0x393   :  { %v2035_v22 = vmul.f32 %v2013_v49, %v2013_v49  ;;  %v2034_v20 = vadd.f32 %v2033_v2, %v2032_v26  ;;  %v2036_v48 = vmul.f32 %v2020_v56, %v2020_v56 }
 0x394   :  { %v2038_v17 = vmul.f32 %v2027_v46, %v2027_v46 }
 0x395   :  { %v2037_v11 = vadd.f32 %v2036_v48, %v2035_v22  ;;  %v2040_v52 = vmul.f32 %v2034_v20, %v2034_v20 }
 0x397   :  { %v2039_v36 = vadd.f32 %v2038_v17, %v2037_v11 }
 0x399   :  { %v2041_v41 = vadd.f32 %v2040_v52, %v2039_v36 }
 0x39b   :  { %v2042_v23 = vmax.f32 %v2041_v41, 1e-30 }
 0x39d   :  { %3008 = vrsqrt.f32 %v2042_v23  ;;  %vm2049_vm10 = vweird.f32 %v2042_v23 }
 0x3a3   :  { %v3009_v38 = vpop.eup %3008 }
 0x3a4   :  { %v2044_v59 = vmul.f32 %v3009_v38, %v2042_v23  ;;  %vm2050_vm9 = vweird.f32 %v3009_v38 }
 0x3a5   :  { %vm2051_vm11 = vmor %vm2049_vm10, %vm2050_vm9 }
 0x3a6   :  { %v2045_v40 = vmul.f32 %v3009_v38, %v2044_v59 }
 0x3a8   :  { %v2046_v63 = vmul.f32 0.5, %v2045_v40 }
 0x3aa   :  { %v2047_v25 = vsub.f32 1.5, %v2046_v63 }
 0x3ac   :  { %v2048_v58 = vmul.f32 %v3009_v38, %v2047_v25 }
 0x3ae   :  { %v2052_v14 = vsel %vm2051_vm11, %v3009_v38, %v2048_v58 }
 0x3af   :  { %v2053_v39 = vmul.f32 %v2052_v14, %v2013_v49  ;;  %v2054_v1 = vmul.f32 %v2052_v14, %v2020_v56  ;;  %v2055_v51 = vmul.f32 %v2052_v14, %v2027_v46  ;;  %v2056_v50 = vmul.f32 %v2052_v14, %v2034_v20 }
 0x3b1   :  { %v2057_v29 = vmul.f32 %v2053_v39, %v3750_v60  ;;  %v2058_v30 = vmul.f32 %v2054_v1, %v3752_v61  ;;  %v2064_v31 = vmul.f32 %v2053_v39, %v3752_v61  ;;  %v2065_v43 = vmul.f32 %v2054_v1, %v3760_v13 }
 0x3b2   :  { %v2060_v45 = vmul.f32 %v2055_v51, %v3758_v12  ;;  %v2071_v47 = vmul.f32 %v2053_v39, %v3758_v12  ;;  %v2072_v15 = vmul.f32 %v2054_v1, %v3762_v16  ;;  %v2067_v55 = vmul.f32 %v2055_v51, %v3762_v16 }
 0x3b3   :  { %v2059_v35 = vadd.f32 %v2058_v30, %v2057_v29  ;;  %v2066_v62 = vadd.f32 %v2065_v43, %v2064_v31  ;;  %v2078_v53 = vmul.f32 %v2053_v39, %v3764_v18  ;;  %v2079_v28 = vmul.f32 %v2054_v1, %v3766_v19 }
 0x3b4   :  { %v2062_v42 = vmul.f32 %v2056_v50, %v3764_v18  ;;  %v2073_v21 = vadd.f32 %v2072_v15, %v2071_v47  ;;  %v2074_v57 = vmul.f32 %v2055_v51, %v3772_v24  ;;  %v2069_v44 = vmul.f32 %v2056_v50, %v3766_v19 }
 0x3b5   :  { %v2061_v0 = vadd.f32 %v2060_v45, %v2059_v35  ;;  %v2068_v49 = vadd.f32 %v2067_v55, %v2066_v62  ;;  %v2080_v34 = vadd.f32 %v2079_v28, %v2078_v53  ;;  %v2081_v56 = vmul.f32 %v2055_v51, %v3776_v27 }
 0x3b6   :  { %v2075_v2 = vadd.f32 %v2074_v57, %v2073_v21  ;;  %v2076_v46 = vmul.f32 %v2056_v50, %v3776_v27  ;;  %v2083_v48 = vmul.f32 %v2056_v50, %v3784_v37 }
 0x3b7   :  { %v2063_v26 = vadd.f32 %v2062_v42, %v2061_v0  ;;  %v2070_v22 = vadd.f32 %v2069_v44, %v2068_v49  ;;  %v2082_v20 = vadd.f32 %v2081_v56, %v2080_v34 }
 0x3b8   :  { %v2077_v11 = vadd.f32 %v2076_v46, %v2075_v2 }
 0x3b9   :  { %v2085_v17 = vmul.f32 %v2063_v26, %v2063_v26  ;;  %v2084_v36 = vadd.f32 %v2083_v48, %v2082_v20  ;;  %v2086_v52 = vmul.f32 %v2070_v22, %v2070_v22 }
 0x3ba   :  { %v2088_v23 = vmul.f32 %v2077_v11, %v2077_v11 }
 0x3bb   :  { %v2087_v41 = vadd.f32 %v2086_v52, %v2085_v17  ;;  %v2090_v59 = vmul.f32 %v2084_v36, %v2084_v36 }
 0x3bd   :  { %v2089_v38 = vadd.f32 %v2088_v23, %v2087_v41 }
 0x3bf   :  { %v2091_v40 = vadd.f32 %v2090_v59, %v2089_v38 }
 0x3c1   :  { %v2092_v63 = vmax.f32 %v2091_v40, 1e-30 }
 0x3c3   :  { %3010 = vrsqrt.f32 %v2092_v63  ;;  %vm2099_vm13 = vweird.f32 %v2092_v63 }
 0x3c9   :  { %v3011_v25 = vpop.eup %3010 }
 0x3ca   :  { %v2094_v58 = vmul.f32 %v3011_v25, %v2092_v63  ;;  %vm2100_vm12 = vweird.f32 %v3011_v25 }
 0x3cb   :  { %vm2101_vm14 = vmor %vm2099_vm13, %vm2100_vm12 }
 0x3cc   :  { %v2095_v14 = vmul.f32 %v3011_v25, %v2094_v58 }
 0x3ce   :  { %v2096_v39 = vmul.f32 0.5, %v2095_v14 }
 0x3d0   :  { %v2097_v1 = vsub.f32 1.5, %v2096_v39 }
 0x3d2   :  { %v2098_v51 = vmul.f32 %v3011_v25, %v2097_v1 }
 0x3d4   :  { %v2102_v50 = vsel %vm2101_vm14, %v3011_v25, %v2098_v51 }
 0x3d5   :  { %v2103_v29 = vmul.f32 %v2102_v50, %v2063_v26  ;;  %v2104_v30 = vmul.f32 %v2102_v50, %v2070_v22  ;;  %v2105_v31 = vmul.f32 %v2102_v50, %v2077_v11  ;;  %v2106_v43 = vmul.f32 %v2102_v50, %v2084_v36 }
 0x3d7   :  { %v2107_v35 = vmul.f32 %v2103_v29, %v3750_v60  ;;  %v2108_v45 = vmul.f32 %v2104_v30, %v3752_v61  ;;  %v2114_v47 = vmul.f32 %v2103_v29, %v3752_v61  ;;  %v2115_v15 = vmul.f32 %v2104_v30, %v3760_v13 }
 0x3d8   :  { %v2110_v55 = vmul.f32 %v2105_v31, %v3758_v12  ;;  %v2121_v53 = vmul.f32 %v2103_v29, %v3758_v12  ;;  %v2122_v28 = vmul.f32 %v2104_v30, %v3762_v16  ;;  %v2117_v42 = vmul.f32 %v2105_v31, %v3762_v16 }
 0x3d9   :  { %v2109_v62 = vadd.f32 %v2108_v45, %v2107_v35  ;;  %v2116_v0 = vadd.f32 %v2115_v15, %v2114_v47  ;;  %v2128_v21 = vmul.f32 %v2103_v29, %v3764_v18  ;;  %v2129_v60 = vmul.f32 %v2104_v30, %v3766_v19 }
 0x3da   :  { %v2112_v49 = vmul.f32 %v2106_v43, %v3764_v18  ;;  %v2123_v61 = vadd.f32 %v2122_v28, %v2121_v53  ;;  %v2124_v13 = vmul.f32 %v2105_v31, %v3772_v24  ;;  %v2119_v34 = vmul.f32 %v2106_v43, %v3766_v19 }
 0x3db   :  { %v2111_v57 = vadd.f32 %v2110_v55, %v2109_v62  ;;  %v2118_v44 = vadd.f32 %v2117_v42, %v2116_v0  ;;  %v2130_v56 = vadd.f32 %v2129_v60, %v2128_v21  ;;  %v2131_v12 = vmul.f32 %v2105_v31, %v3776_v27 }
 0x3dc   :  { %v2125_v2 = vadd.f32 %v2124_v13, %v2123_v61  ;;  %v2126_v16 = vmul.f32 %v2106_v43, %v3776_v27  ;;  %v2133_v20 = vmul.f32 %v2106_v43, %v3784_v37 }
 0x3dd   :  { %v2113_v26 = vadd.f32 %v2112_v49, %v2111_v57  ;;  %v2120_v46 = vadd.f32 %v2119_v34, %v2118_v44  ;;  %v2132_v22 = vadd.f32 %v2131_v12, %v2130_v56 }
 0x3de   :  { %v2127_v48 = vadd.f32 %v2126_v16, %v2125_v2  ;;  %v2243_v2 = vsel %vm2238_vm4, %v3310_v10, 0 }
 0x3df   :  { %v2135_v11 = vmul.f32 %v2113_v26, %v2113_v26  ;;  %v2134_v18 = vadd.f32 %v2133_v20, %v2132_v22  ;;  %v2136_v17 = vmul.f32 %v2120_v46, %v2120_v46  ;;  %2973 = vmatpush.bf16.msrb.mxu1 %v2243_v2 }
 0x3e0   :  { %v2138_v24 = vmul.f32 %v2127_v48, %v2127_v48 }
 0x3e1   :  { %v2137_v36 = vadd.f32 %v2136_v17, %v2135_v11  ;;  %v2140_v41 = vmul.f32 %v2134_v18, %v2134_v18 }
 0x3e3   :  { %v2139_v52 = vadd.f32 %v2138_v24, %v2137_v36 }
 0x3e5   :  { %v2141_v19 = vadd.f32 %v2140_v41, %v2139_v52 }
 0x3e7   :  { %v2142_v23 = vmax.f32 %v2141_v19, 1e-30 }
 0x3e9   :  { %3012 = vrsqrt.f32 %v2142_v23  ;;  %vm2149_vm2 = vweird.f32 %v2142_v23 }
 0x3ef   :  { %v3013_v38 = vpop.eup %3012 }
 0x3f0   :  { %v2144_v59 = vmul.f32 %v3013_v38, %v2142_v23  ;;  %vm2150_vm15 = vweird.f32 %v3013_v38 }
 0x3f1   :  { %vm2151_vm3 = vmor %vm2149_vm2, %vm2150_vm15 }
 0x3f2   :  { %v2145_v40 = vmul.f32 %v3013_v38, %v2144_v59 }
 0x3f4   :  { %v2146_v63 = vmul.f32 0.5, %v2145_v40 }
 0x3f6   :  { %v2147_v27 = vsub.f32 1.5, %v2146_v63 }
 0x3f8   :  { %v2148_v25 = vmul.f32 %v3013_v38, %v2147_v27 }
 0x3fa   :  { %v2152_v37 = vsel %vm2151_vm3, %v3013_v38, %v2148_v25 }
 0x3fb   :  { %v2153_v58 = vmul.f32 %v2152_v37, %v2113_v26  ;;  %v2154_v14 = vmul.f32 %v2152_v37, %v2120_v46  ;;  %v2155_v39 = vmul.f32 %v2152_v37, %v2127_v48  ;;  %v2156_v1 = vmul.f32 %v2152_v37, %v2134_v18 }
 0x3fd   :  { %v2157_v51 = vmul.f32 %v2153_v58, %v3684_v3  ;;  %v2158_v50 = vmul.f32 %v2153_v58, %v3686_v5  ;;  %v2159_v29 = vmul.f32 %v2154_v14, %v3692_v8  ;;  %v2160_v30 = vmul.f32 %v2154_v14, %v3688_v6 }
 0x3fe   :  { %v2163_v35 = vmul.f32 %v2155_v39, %v3694_v9  ;;  %v2164_v45 = vmul.f32 %v2155_v39, %v3690_v7  ;;  %v2167_v62 = vmul.f32 %v2156_v1, %v3715_v33  ;;  %v2168_v55 = vmul.f32 %v2156_v1, %v3713_v32 }
 0x3ff   :  { %v2161_v31 = vadd.f32 %v2159_v29, %v2157_v51  ;;  %v2162_v43 = vadd.f32 %v2160_v30, %v2158_v50  ;;  %v2240_v7 = vsel %vm2238_vm4, %v3267_v54, 0  ;;  %v2245_v9 = vsel %vm2238_vm4, %v3299_v4, 0 }
 0x400   :  { %2254 = vmatpush.bf16.msra.mxu0 %v2240_v7  ;;  %2352 = vmatpush.bf16.msrb.mxu2 %v2245_v9 }
 0x401   :  { %v2165_v47 = vadd.f32 %v2163_v35, %v2161_v31  ;;  %v2166_v15 = vadd.f32 %v2164_v45, %v2162_v43  ;;  %2974 = vmatpush.bf16.msra.mxu3 %v2245_v9 }
 0x403   :  { %v2169_v53 = vadd.f32 %v2167_v62, %v2165_v47  ;;  %v2170_v3 = vadd.f32 %v2168_v55, %v2166_v15 }
 0x404   :  { %2303 = vmatpush.bf16.msrb.mxu0 %v2243_v2 }
 0x405   :  { %v2171_v28 = vmul.f32 %v2169_v53, %v2169_v53  ;;  %v2172_v5 = vmul.f32 %v2170_v3, %v2170_v3 }
 0x407   :  { %v2173_v8 = vsel %vm927_vm1, %v2172_v5, 0.0 }
 0x408   :  { %v2174_v0 = vadd.f32 %v2173_v8, %v2171_v28 }
 0x40a   :  { %v2175_v6 = vrot.slane %v2174_v0, 4 }
 0x40c   :  { %v2176_v42 = vadd.f32 %v2175_v6, %v2174_v0 }
 0x40e   :  { %v2177_v21 = vrot.slane %v2176_v42, 2 }
 0x410   :  { %v2178_v33 = vadd.f32 %v2177_v21, %v2176_v42 }
 0x412   :  { %v2179_v32 = vrot.slane %v2178_v33, 1 }
 0x414   :  { %v2180_v60 = vadd.f32 %v2179_v32, %v2178_v33 }
 0x416   :  { %v2181_v57 = vmax.f32 %v2180_v60, 1e-30 }
 0x418   :  { %3014 = vrsqrt.f32 %v2181_v57  ;;  %vm2188_vm5 = vweird.f32 %v2181_v57 }
 0x41e   :  { %v3015_v49 = vpop.eup %3014 }
 0x41f   :  { %v2183_v61 = vmul.f32 %v3015_v49, %v2181_v57  ;;  %vm2189_vm1 = vweird.f32 %v3015_v49 }
 0x420   :  { %vm2190_vm6 = vmor %vm2188_vm5, %vm2189_vm1 }
 0x421   :  { %v2184_v13 = vmul.f32 %v3015_v49, %v2183_v61 }
 0x423   :  { %v2185_v44 = vmul.f32 0.5, %v2184_v13 }
 0x425   :  { %v2186_v34 = vsub.f32 1.5, %v2185_v44 }
 0x427   :  { %v2187_v56 = vmul.f32 %v3015_v49, %v2186_v34 }
 0x429   :  { %v2191_v54 = vsel %vm2190_vm6, %v3015_v49, %v2187_v56 }
 0x42a   :  { %v2192_v12 = vmul.f32 %v2191_v54, %v2169_v53  ;;  %v2193_v4 = vmul.f32 %v2191_v54, %v2170_v3 }
 0x42c   :  { %2195 = vst [vmem:[%s4539_s3 + $0x8] sm:$0x3] %v2193_v4  ;;  %v2196_v26 = vpack.c.bf16 %v2193_v4, %v2192_v12 }
 0x42d   :  { %2194 = vst [vmem:[%s4539_s3] sm:$0xff] %v2192_v12 }
 0x42e   :  { %2197 = vxpose.xlu0.c.b16.start.end [1/1] (short) %v2196_v26, 128 }
 0x4da   :  { %v2205_v16 = vpop.trf.xlu0 }
 0x4db   :  { %2850 = vmatmul.msk.bf16.vlgmr.msra.gmra.mxu0 %vm2213_vm7, %v2205_v16  ;;  %2866 = vmatmul.msk.bf16.vlgmr.msrb.gmra.mxu2 %vm2213_vm7, %v2205_v16 }
 0x4ea   :  { %v2206_v46 = vpop.trf.xlu0 }
 0x4eb   :  { %2851 = vmatmul.msk.bf16.gmra.mxu0 %vm2213_vm7, %v2206_v46  ;;  %2867 = vmatmul.msk.bf16.gmra.mxu2 %vm2213_vm7, %v2206_v46 }
 0x4fa   :  { %v2207_v22 = vpop.trf.xlu0 }
 0x4fb   :  { %2852 = vmatmul.msk.bf16.gmra.mxu0 %vm2213_vm7, %v2207_v22  ;;  %2860 = vmatmul.msk.bf16.vlgmr.msrb.gmra.mxu1 %vm2213_vm7, %v2207_v22 }
 0x4fc   :  { %2868 = vmatmul.msk.bf16.gmra.mxu2 %vm2213_vm7, %v2207_v22 }
 0x50a   :  { %v2208_v10 = vpop.trf.xlu0 }
 0x50b   :  { %2853 = vmatmul.msk.bf16.gmra.mxu0 %vm2213_vm7, %v2208_v10  ;;  %2861 = vmatmul.msk.bf16.gmra.mxu1 %vm2213_vm7, %v2208_v10 }
 0x50c   :  { %2869 = vmatmul.msk.bf16.gmra.mxu2 %vm2213_vm7, %v2208_v10 }
 0x51a   :  { %v2209_v20 = vpop.trf.xlu0 }
 0x51b   :  { %2854 = vmatmul.msk.bf16.gmra.mxu0 %vm2213_vm7, %v2209_v20  ;;  %2862 = vmatmul.msk.bf16.gmra.mxu1 %vm2213_vm7, %v2209_v20 }
 0x51c   :  { %2870 = vmatmul.msk.bf16.gmra.mxu2 %vm2213_vm7, %v2209_v20 }
 0x52a   :  { %v2210_v48 = vpop.trf.xlu0 }
 0x52b   :  { %2855 = vmatmul.msk.bf16.gmra.mxu0 %vm2213_vm7, %v2210_v48  ;;  %2863 = vmatmul.msk.bf16.gmra.mxu1 %vm2213_vm7, %v2210_v48 }
 0x52c   :  { %2871 = vmatmul.msk.bf16.gmra.mxu2 %vm2213_vm7, %v2210_v48 }
 0x53a   :  { %v2211_v11 = vpop.trf.xlu0 }
 0x53b   :  { %2856 = vmatmul.msk.bf16.gmra.mxu0 %vm2213_vm7, %v2211_v11  ;;  %2864 = vmatmul.msk.bf16.gmra.mxu1 %vm2213_vm7, %v2211_v11 }
 0x53c   :  { %2872 = vmatmul.msk.bf16.vlgmr.msra.gmra.mxu3 %vm2213_vm7, %v2211_v11 }
 0x54a   :  { %v2212_v18 = vpop.trf.xlu0 }
 0x54b   :  { %2857 = vmatmul.msk.bf16.gmra.mxu0 %vm2213_vm7, %v2212_v18  ;;  %2865 = vmatmul.msk.bf16.gmra.mxu1 %vm2213_vm7, %v2212_v18 }
 0x54c   :  { %2873 = vmatmul.msk.bf16.gmra.mxu3 %vm2213_vm7, %v2212_v18 }
 0x558   :  { %v2256_v17 = vpop.f32.mrf.mxu0 }
 0x559   :  { %2394 = vst [vmem:[%s4540_s2] sm:$0xff] %v2256_v17 }
 0x55b   :  { %2858 = vmatmul.msk.bf16.vlgmr.msrb.gmra.mxu0 %vm2213_vm7, %v2205_v16 }
 0x55e   :  { %v2354_v36 = vpop.f32.mrf.mxu2 }
 0x55f   :  { %2396 = vst.msk [vmem:[%s4540_s2 + $0x10] sm:$0xff] %vm641_vm0, %v2354_v36 }
 0x560   :  { %v2258_v24 = vpop.f32.mrf.mxu0 }
 0x561   :  { %2397 = vst [vmem:[%s4540_s2 + $0x18] sm:$0xff] %v2258_v24 }
 0x566   :  { %v2356_v52 = vpop.f32.mrf.mxu2 }
 0x567   :  { %2399 = vst.msk [vmem:[%s4540_s2 + $0x28] sm:$0xff] %vm641_vm0, %v2356_v52 }
 0x568   :  { %v2261_v41 = vpop.f32.mrf.mxu0 }
 0x569   :  { %2400 = vst [vmem:[%s4540_s2 + $0x30] sm:$0xff] %v2261_v41 }
 0x56b   :  { %2859 = vmatmul.msk.bf16.gmra.mxu0 %vm2213_vm7, %v2206_v46 }
 0x56e   :  { %v2359_v19 = vpop.f32.mrf.mxu2 }
 0x56f   :  { %2402 = vst.msk [vmem:[%s4540_s2 + $0x40] sm:$0xff] %vm641_vm0, %v2359_v19 }
 0x570   :  { %v2263_v23 = vpop.f32.mrf.mxu0 }
 0x571   :  { %2403 = vst [vmem:[%s4540_s2 + $0x48] sm:$0xff] %v2263_v23 }
 0x576   :  { %v2361_v38 = vpop.f32.mrf.mxu2 }
 0x577   :  { %2405 = vst.msk [vmem:[%s4540_s2 + $0x58] sm:$0xff] %vm641_vm0, %v2361_v38 }
 0x578   :  { %v2266_v59 = vpop.f32.mrf.mxu0  ;;  %v2315_v40 = vpop.f32.mrf.mxu1 }
 0x579   :  { %2406 = vst [vmem:[%s4540_s2 + $0x60] sm:$0xff] %v2266_v59 }
 0x57a   :  { %2407 = vst [vmem:[%s4540_s2 + $0x68] sm:$0xff] %v2315_v40 }
 0x57f   :  { %v2364_v63 = vpop.f32.mrf.mxu2 }
 0x580   :  { %2408 = vst.msk [vmem:[%s4540_s2 + $0x70] sm:$0xff] %vm641_vm0, %v2364_v63  ;;  %v2268_v27 = vpop.f32.mrf.mxu0  ;;  %v2317_v25 = vpop.f32.mrf.mxu1 }
 0x581   :  { %2409 = vst [vmem:[%s4540_s2 + $0x78] sm:$0xff] %v2268_v27 }
 0x582   :  { %2410 = vst [vmem:[%s4540_s2 + $0x80] sm:$0xff] %v2317_v25 }
 0x587   :  { %v2366_v37 = vpop.f32.mrf.mxu2 }
 0x588   :  { %2411 = vst.msk [vmem:[%s4540_s2 + $0x88] sm:$0xff] %vm641_vm0, %v2366_v37  ;;  %v2271_v58 = vpop.f32.mrf.mxu0  ;;  %v2320_v14 = vpop.f32.mrf.mxu1 }
 0x589   :  { %2412 = vst [vmem:[%s4540_s2 + $0x90] sm:$0xff] %v2271_v58 }
 0x58a   :  { %2413 = vst [vmem:[%s4540_s2 + $0x98] sm:$0xff] %v2320_v14 }
 0x58f   :  { %v2369_v39 = vpop.f32.mrf.mxu2 }
 0x590   :  { %2414 = vst.msk [vmem:[%s4540_s2 + $0xa0] sm:$0xff] %vm641_vm0, %v2369_v39  ;;  %v2273_v1 = vpop.f32.mrf.mxu0  ;;  %v2322_v51 = vpop.f32.mrf.mxu1 }
 0x591   :  { %2415 = vst [vmem:[%s4540_s2 + $0xa8] sm:$0xff] %v2273_v1 }
 0x592   :  { %2416 = vst [vmem:[%s4540_s2 + $0xb0] sm:$0xff] %v2322_v51 }
 0x597   :  { %v2371_v50 = vpop.f32.mrf.mxu2 }
 0x598   :  { %2417 = vst.msk [vmem:[%s4540_s2 + $0xb8] sm:$0xff] %vm641_vm0, %v2371_v50  ;;  %v2276_v29 = vpop.f32.mrf.mxu0  ;;  %v2325_v30 = vpop.f32.mrf.mxu1 }
 0x599   :  { %2418 = vst [vmem:[%s4540_s2 + $0xc0] sm:$0xff] %v2276_v29 }
 0x59a   :  { %2419 = vst [vmem:[%s4540_s2 + $0xc8] sm:$0xff] %v2325_v30 }
 0x59f   :  { %v2374_v31 = vpop.f32.mrf.mxu2 }
 0x5a0   :  { %2420 = vst.msk [vmem:[%s4540_s2 + $0xd0] sm:$0xff] %vm641_vm0, %v2374_v31  ;;  %v2278_v43 = vpop.f32.mrf.mxu0  ;;  %v2327_v35 = vpop.f32.mrf.mxu1 }
 0x5a1   :  { %2421 = vst [vmem:[%s4540_s2 + $0xd8] sm:$0xff] %v2278_v43 }
 0x5a2   :  { %2422 = vst [vmem:[%s4540_s2 + $0xe0] sm:$0xff] %v2327_v35 }
 0x5a7   :  { %v2376_v45 = vpop.f32.mrf.mxu2 }
 0x5a8   :  { %2423 = vst.msk [vmem:[%s4540_s2 + $0xe8] sm:$0xff] %vm641_vm0, %v2376_v45  ;;  %v2281_v47 = vpop.f32.mrf.mxu0  ;;  %v2330_v15 = vpop.f32.mrf.mxu1 }
 0x5a9   :  { %2424 = vst [vmem:[%s4540_s2 + $0xf0] sm:$0xff] %v2281_v47 }
 0x5aa   :  { %2425 = vst [vmem:[%s4540_s2 + $0xf8] sm:$0xff] %v2330_v15 }
 0x5af   :  { %v2379_v62 = vpop.f32.mrf.mxu2 }
 0x5b0   :  { %2426 = vst.msk [vmem:[%s4540_s2 + $0x100] sm:$0xff] %vm641_vm0, %v2379_v62  ;;  %v2283_v55 = vpop.f32.mrf.mxu0  ;;  %v2332_v53 = vpop.f32.mrf.mxu1 }
 0x5b1   :  { %2427 = vst [vmem:[%s4540_s2 + $0x108] sm:$0xff] %v2283_v55 }
 0x5b2   :  { %2428 = vst [vmem:[%s4540_s2 + $0x110] sm:$0xff] %v2332_v53 }
 0x5b7   :  { %v2381_v3 = vpop.f32.mrf.mxu2 }
 0x5b8   :  { %2429 = vst.msk [vmem:[%s4540_s2 + $0x118] sm:$0xff] %vm641_vm0, %v2381_v3  ;;  %v2286_v28 = vpop.f32.mrf.mxu0  ;;  %v2335_v5 = vpop.f32.mrf.mxu1 }
 0x5b9   :  { %2430 = vst [vmem:[%s4540_s2 + $0x120] sm:$0xff] %v2286_v28 }
 0x5ba   :  { %2431 = vst [vmem:[%s4540_s2 + $0x128] sm:$0xff] %v2335_v5 }
 0x5bf   :  { %v2384_v8 = vpop.f32.mrf.mxu3 }
 0x5c0   :  { %2432 = vst.msk [vmem:[%s4540_s2 + $0x130] sm:$0xff] %vm641_vm0, %v2384_v8  ;;  %v2288_v0 = vpop.f32.mrf.mxu0  ;;  %v2337_v6 = vpop.f32.mrf.mxu1 }
 0x5c1   :  { %2433 = vst [vmem:[%s4540_s2 + $0x138] sm:$0xff] %v2288_v0 }
 0x5c2   :  { %2434 = vst [vmem:[%s4540_s2 + $0x140] sm:$0xff] %v2337_v6 }
 0x5c7   :  { %v2386_v42 = vpop.f32.mrf.mxu3 }
 0x5c8   :  { %2435 = vst.msk [vmem:[%s4540_s2 + $0x148] sm:$0xff] %vm641_vm0, %v2386_v42  ;;  %v2291_v21 = vpop.f32.mrf.mxu0  ;;  %v2340_v7 = vpop.f32.mrf.mxu1 }
 0x5c9   :  { %2436 = vst [vmem:[%s4540_s2 + $0x150] sm:$0xff] %v2291_v21 }
 0x5ca   :  { %2437 = vst [vmem:[%s4540_s2 + $0x158] sm:$0xff] %v2340_v7 }
 0x5cf   :  { %v2389_v9 = vpop.f32.mrf.mxu3 }
 0x5d0   :  { %2438 = vst.msk [vmem:[%s4540_s2 + $0x160] sm:$0xff] %vm641_vm0, %v2389_v9  ;;  %v2293_v33 = vpop.f32.mrf.mxu0  ;;  %v2342_v32 = vpop.f32.mrf.mxu1 }
 0x5d1   :  { %2439 = vst [vmem:[%s4540_s2 + $0x168] sm:$0xff] %v2293_v33 }
 0x5d2   :  { %2440 = vst [vmem:[%s4540_s2 + $0x170] sm:$0xff] %v2342_v32 }
 0x5d7   :  { %v2391_v60 = vpop.f32.mrf.mxu3 }
 0x5d8   :  { %2441 = vst.msk [vmem:[%s4540_s2 + $0x178] sm:$0xff] %vm641_vm0, %v2391_v60  ;;  %v2305_v57 = vpop.f32.mrf.mxu0 }
 0x5d9   :  { %2395 = vst [vmem:[%s4540_s2 + $0x8] sm:$0xff] %v2305_v57 }
 0x5e0   :  { %v2307_v49 = vpop.f32.mrf.mxu0 }
 0x5e1   :  { %2398 = vst [vmem:[%s4540_s2 + $0x20] sm:$0xff] %v2307_v49 }
 0x5e8   :  { %v2310_v61 = vpop.f32.mrf.mxu0 }
 0x5e9   :  { %2401 = vst [vmem:[%s4540_s2 + $0x38] sm:$0xff] %v2310_v61 }
 0x5f0   :  { %v2312_v13 = vpop.f32.mrf.mxu0 }
 0x5f1   :  { %2404 = vst [vmem:[%s4540_s2 + $0x50] sm:$0xff] %v2312_v13 }

</bundles_post_ra>
